<compile_context>
chip_gen: v6e
topology: v6e:2x2x1
jax: 0.10.0
libtpu: 0.0.40
codegen_flags: <defaults>
</compile_context>

<pallas_src>
import functools
import math

import jax
import jax.numpy as jnp
from jax import lax
from jax.experimental import pallas as pl
from jax.experimental.pallas import tpu as pltpu

LANES = 128


def _resident_spec(shape):
    """Full-array block with a constant block index -> stays resident in VMEM."""
    zeros = (0,) * len(shape)
    return pl.BlockSpec(shape, lambda b: zeros)


# -----------------------------------------------------------------------------
# Single fused kernel: all encoder layers + mean-pool + classifier head
# grid = (batch_splits,), batch axis "parallel"
# -----------------------------------------------------------------------------
def _fused_forward_kernel(x_ref, tok_ref,
                          wqkv_ref, bqkv_ref, wo_ref, bo_ref,
                          ln1_g_ref, ln1_b_ref, w1_ref, b1_ref,
                          w2_ref, b2_ref, ln2_g_ref, ln2_b_ref,
                          wc1_ref, bc1_ref, wc2_ref, bc2_ref,
                          o_ref, *, num_layers, num_heads, d_model):
    eps = jnp.float32(1e-5)
    Bblk, S, Din = x_ref.shape
    R = Bblk * S
    hd = num_heads * d_model

    # key-padding mask bias computed in-kernel from raw token ids (0 == pad)
    mask_bias = jnp.where(tok_ref[...] != 0, 0.0, -1e30).astype(jnp.float32)  # (Bblk,1,S)

    # Flatten (Bblk, S) into the MXU M dimension (S multiple of 8 -> layout-free).
    x = x_ref[...].reshape(R, Din)                                            # f32

    for li in range(num_layers):                     # static unroll over layers
        x_b = x.astype(jnp.bfloat16)

        # Fused Q/K/V projection for all heads in one MXU call.
        # The 1/sqrt(d_model) attention scale is pre-folded into the Q slice.
        qkv = jnp.dot(x_b, wqkv_ref[li], preferred_element_type=jnp.float32)
        qkv = qkv + bqkv_ref[li]                     # (R, 3*H*Dm) f32

        # Per-sequence attention; per-head accumulation into the output proj.
        attn_rows = []
        for b in range(Bblk):                        # small static unroll
            rows = slice(b * S, (b + 1) * S)
            m_b = mask_bias[b]                       # (1, S)
            attn_b = jnp.zeros((S, Din), jnp.float32)
            for h in range(num_heads):               # small static unroll
                c0 = h * d_model                     # 128-aligned lane offset
                qh = qkv[rows, 0 * hd + c0: 0 * hd + c0 + d_model].astype(jnp.bfloat16)
                kh = qkv[rows, 1 * hd + c0: 1 * hd + c0 + d_model].astype(jnp.bfloat16)
                vh = qkv[rows, 2 * hd + c0: 2 * hd + c0 + d_model].astype(jnp.bfloat16)
                # q @ k^T without materializing k.T: contract last dims of both.
                s = lax.dot_general(qh, kh, (((1,), (1,)), ((), ())),
                                    preferred_element_type=jnp.float32)       # (S,S)
                s = s + m_b                          # mask padded key positions
                s = s - jnp.max(s, axis=-1, keepdims=True)
                p = jnp.exp(s)
                p = p * pl.reciprocal(jnp.sum(p, axis=-1, keepdims=True),
                                      approx=True)   # EUP slot, ~free
                ctx = jnp.dot(p.astype(jnp.bfloat16), vh,
                              preferred_element_type=jnp.float32)             # (S,Dm)
                # per-head slice of the output projection, accumulated in f32
                attn_b = attn_b + jnp.dot(
                    ctx.astype(jnp.bfloat16), wo_ref[li, c0:c0 + d_model, :],
                    preferred_element_type=jnp.float32)
            attn_rows.append(attn_b)
        attn = attn_rows[0] if Bblk == 1 else jnp.concatenate(attn_rows, axis=0)
        attn = attn + bo_ref[li]                     # (R, Din)

        # residual + LayerNorm1 (f32)
        h1 = x + attn
        mu1 = jnp.mean(h1, axis=-1, keepdims=True)
        var1 = jnp.mean(jnp.square(h1 - mu1), axis=-1, keepdims=True)
        h1 = (h1 - mu1) * lax.rsqrt(var1 + eps) * ln1_g_ref[li] + ln1_b_ref[li]

        # FeedForward: fc1 -> ReLU -> fc2 (bf16 matmuls, f32 accumulate)
        f1 = jnp.dot(h1.astype(jnp.bfloat16), w1_ref[li],
                     preferred_element_type=jnp.float32) + b1_ref[li]
        f1 = jnp.maximum(f1, 0.0)
        f2 = jnp.dot(f1.astype(jnp.bfloat16), w2_ref[li],
                     preferred_element_type=jnp.float32) + b2_ref[li]

        # residual + LayerNorm2 (f32)
        h2 = h1 + f2
        mu2 = jnp.mean(h2, axis=-1, keepdims=True)
        var2 = jnp.mean(jnp.square(h2 - mu2), axis=-1, keepdims=True)
        x = (h2 - mu2) * lax.rsqrt(var2 + eps) * ln2_g_ref[li] + ln2_b_ref[li]

    # classifier head: mean over sequence -> fc1 -> ReLU -> fc2 (padded to 128)
    pooled = jnp.mean(x.reshape(Bblk, S, Din), axis=1)                       # (Bblk, Din)
    hcls = jnp.dot(pooled.astype(jnp.bfloat16), wc1_ref[...],
                   preferred_element_type=jnp.float32) + bc1_ref[...]
    hcls = jnp.maximum(hcls, 0.0)
    logits = jnp.dot(hcls.astype(jnp.bfloat16), wc2_ref[...],
                     preferred_element_type=jnp.float32) + bc2_ref[...]      # (Bblk, Cpad)
    o_ref[...] = logits.reshape(o_ref.shape).astype(o_ref.dtype)


# -----------------------------------------------------------------------------
# Full forward (embedding / positional encoding kept in plain JAX)
# -----------------------------------------------------------------------------
def classifier_forward(tokens, params, *, num_heads, d_model, num_classes,
                       batch_splits=None):
    emb_table, pe, layers, head = params
    (wqkv, bqkv, wo, bo, ln1g, ln1b, w1, b1, w2, b2, ln2g, ln2b) = layers
    wc1, bc1, wc2p, bc2p = head

    B, S = tokens.shape
    Din = emb_table.shape[1]
    num_layers = wqkv.shape[0]
    Dff = w1.shape[2]
    hd = num_heads * d_model
    c_pad = wc2p.shape[1]

    # >=2-way "parallel" batch grid so both TensorCores are used on v7x;
    # on v5e/v6e this is a cheap 2-step loop (weights stay resident in VMEM).
    if batch_splits is None:
        batch_splits = 2 if (B % 2 == 0 and B >= 2) else 1
    Bblk = B // batch_splits

    # TODO(synk): embedding gather + positional-encoding add stay in plain JAX
    # (single fused XLA gather+add, data-dependent HBM gather executed once).
    x = jnp.take(emb_table, tokens, axis=0) + pe[None, :S, :]
    tok3 = tokens.reshape(B, 1, S).astype(jnp.int32)

    kernel = functools.partial(_fused_forward_kernel, num_layers=num_layers,
                               num_heads=num_heads, d_model=d_model)

    R = B * S
    flops = (2 * R * num_layers * (Din * 3 * hd + hd * Din + 2 * Din * Dff)
             + 4 * num_layers * B * num_heads * S * S * d_model
             + 2 * B * (Din * wc1.shape[1] + wc1.shape[1] * c_pad))
    transcendentals = num_layers * B * num_heads * S * S
    bytes_accessed = (R * Din * 4 + B * S * 4 + B * c_pad * 4
                      + (wqkv.size + wo.size + w1.size + w2.size
                         + wc1.size + wc2p.size) * 2
                      + (bqkv.size + bo.size + b1.size + b2.size + ln1g.size
                         + ln1b.size + ln2g.size + ln2b.size
                         + bc1.size + bc2p.size) * 4)

    out = pl.pallas_call(
        kernel,
        out_shape=jax.ShapeDtypeStruct((B, 1, c_pad), jnp.float32),
        grid_spec=pltpu.PrefetchScalarGridSpec(
            num_scalar_prefetch=0,
            grid=(batch_splits,),
            in_specs=[
                pl.BlockSpec((Bblk, S, Din), lambda b: (b, 0, 0)),   # activations
                pl.BlockSpec((Bblk, 1, S), lambda b: (b, 0, 0)),     # token ids
                _resident_spec(wqkv.shape), _resident_spec(bqkv.shape),
                _resident_spec(wo.shape), _resident_spec(bo.shape),
                _resident_spec(ln1g.shape), _resident_spec(ln1b.shape),
                _resident_spec(w1.shape), _resident_spec(b1.shape),
                _resident_spec(w2.shape), _resident_spec(b2.shape),
                _resident_spec(ln2g.shape), _resident_spec(ln2b.shape),
                _resident_spec(wc1.shape), _resident_spec(bc1.shape),
                _resident_spec(wc2p.shape), _resident_spec(bc2p.shape),
            ],
            out_specs=pl.BlockSpec((Bblk, 1, c_pad), lambda b: (b, 0, 0)),
        ),
        compiler_params=pltpu.CompilerParams(
            dimension_semantics=("parallel",),
            # ~1.3 MiB resident weights (x2 default buffering) + tiny activations;
            # re-derive against 64 MiB on v7x if S / d_ff / num_layers grow.
            vmem_limit_bytes=32 * 1024 * 1024),
        cost_estimate=pl.CostEstimate(flops=flops,
                                      transcendentals=transcendentals,
                                      bytes_accessed=bytes_accessed),
    )(x, tok3, wqkv, bqkv, wo, bo, ln1g, ln1b, w1, b1, w2, b2,
      ln2g, ln2b, wc1, bc1, wc2p, bc2p)

    return out.reshape(B, c_pad)[:, :num_classes]


# -----------------------------------------------------------------------------
# Parameters (fused / pre-scaled / stacked layout used by kernel and reference)
# -----------------------------------------------------------------------------
def _uniform(key, shape, scale):
    return jax.random.uniform(key, shape, jnp.float32, -scale, scale)


def init_params(key, *, num_layers, num_heads, dim_in, d_model, d_ff,
                hidden_size, num_classes, vocab, max_len):
    keys = jax.random.split(key, 2 + num_layers)
    emb_table = jax.random.normal(keys[0], (vocab, dim_in), jnp.float32)

    # sinusoidal positional encoding (same formula as the torch module)
    pos = jnp.arange(max_len, dtype=jnp.float32)[:, None]
    div = jnp.exp(jnp.arange(0, dim_in, 2, dtype=jnp.float32)
                  * (-math.log(10000.0) / dim_in))
    pe = jnp.zeros((max_len, dim_in), jnp.float32)
    pe = pe.at[:, 0::2].set(jnp.sin(pos * div))
    pe = pe.at[:, 1::2].set(jnp.cos(pos * div))

    hd = num_heads * d_model
    scale_in = 1.0 / math.sqrt(dim_in)
    scale_cat = 1.0 / math.sqrt(hd)
    scale_ff2 = 1.0 / math.sqrt(d_ff)
    attn_scale = 1.0 / math.sqrt(d_model)   # AttentionHead: / sqrt(q.size(-1))

    wqkv_l, bqkv_l, wo_l, bo_l = [], [], [], []
    ln1g_l, ln1b_l, ln2g_l, ln2b_l = [], [], [], []
    w1_l, b1_l, w2_l, b2_l = [], [], [], []
    for li in range(num_layers):
        lk = jax.random.split(keys[2 + li], 12)
        wq = _uniform(lk[0], (dim_in, hd), scale_in)
        bq = _uniform(lk[1], (1, hd), scale_in)
        wk = _uniform(lk[2], (dim_in, hd), scale_in)
        bk = _uniform(lk[3], (1, hd), scale_in)
        wv = _uniform(lk[4], (dim_in, hd), scale_in)
        bv = _uniform(lk[5], (1, hd), scale_in)
        # fold the attention scale into the Q projection (weights AND bias)
        wqkv_l.append(jnp.concatenate([wq * attn_scale, wk, wv],
                                      axis=1).astype(jnp.bfloat16))
        bqkv_l.append(jnp.concatenate([bq * attn_scale, bk, bv], axis=1))
        wo_l.append(_uniform(lk[6], (hd, dim_in), scale_cat).astype(jnp.bfloat16))
        bo_l.append(_uniform(lk[7], (1, dim_in), scale_cat))
        w1_l.append(_uniform(lk[8], (dim_in, d_ff), scale_in).astype(jnp.bfloat16))
        b1_l.append(_uniform(lk[9], (1, d_ff), scale_in))
        w2_l.append(_uniform(lk[10], (d_ff, dim_in), scale_ff2).astype(jnp.bfloat16))
        b2_l.append(_uniform(lk[11], (1, dim_in), scale_ff2))
        ln1g_l.append(jnp.ones((1, dim_in), jnp.float32))
        ln1b_l.append(jnp.zeros((1, dim_in), jnp.float32))
        ln2g_l.append(jnp.ones((1, dim_in), jnp.float32))
        ln2b_l.append(jnp.zeros((1, dim_in), jnp.float32))

    layers = tuple(jnp.stack(t) for t in
                   (wqkv_l, bqkv_l, wo_l, bo_l, ln1g_l, ln1b_l,
                    w1_l, b1_l, w2_l, b2_l, ln2g_l, ln2b_l))

    hk = jax.random.split(keys[1], 4)
    sc1 = 1.0 / math.sqrt(dim_in)
    sc2 = 1.0 / math.sqrt(hidden_size)
    wc1 = _uniform(hk[0], (dim_in, hidden_size), sc1).astype(jnp.bfloat16)
    bc1 = _uniform(hk[1], (1, hidden_size), sc1)
    wc2 = _uniform(hk[2], (hidden_size, num_classes), sc2)
    bc2 = _uniform(hk[3], (1, num_classes), sc2)
    # lane-dense output: pad classes to a multiple of 128 with zeros
    c_pad = ((num_classes + LANES - 1) // LANES) * LANES
    wc2p = jnp.zeros((hidden_size, c_pad), jnp.float32)
    wc2p = wc2p.at[:, :num_classes].set(wc2).astype(jnp.bfloat16)
    bc2p = jnp.zeros((1, c_pad), jnp.float32).at[:, :num_classes].set(bc2)
    head = (wc1, bc1, wc2p, bc2p)

    return emb_table, pe, layers, head


# -----------------------------------------------------------------------------
# Pure-JAX reference with the same compute precision (bf16 matmuls, f32 accum)
# -----------------------------------------------------------------------------
def reference_forward(tokens, params, *, num_heads, d_model, num_classes):
    emb_table, pe, layers, head = params
    (wqkv, bqkv, wo, bo, ln1g, ln1b, w1, b1, w2, b2, ln2g, ln2b) = layers
    wc1, bc1, wc2p, bc2p = head
    B, S = tokens.shape
    num_layers = wqkv.shape[0]
    hd = num_heads * d_model

    x = jnp.take(emb_table, tokens, axis=0) + pe[None, :S, :]
    mask_bias = jnp.where(tokens != 0, 0.0, -1e30).astype(jnp.float32)[:, None, :]

    def bdot(a, w):
        return jnp.dot(a.astype(jnp.bfloat16), w,
                       preferred_element_type=jnp.float32)

    def layernorm(h, g, b):
        mu = jnp.mean(h, axis=-1, keepdims=True)
        var = jnp.mean(jnp.square(h - mu), axis=-1, keepdims=True)
        return (h - mu) * lax.rsqrt(var + 1e-5) * g + b

    for li in range(num_layers):
        qkv = bdot(x, wqkv[li]) + bqkv[li]
        q, k, v = qkv[..., :hd], qkv[..., hd:2 * hd], qkv[..., 2 * hd:]
        ctx = []
        for h in range(num_heads):
            sl = slice(h * d_model, (h + 1) * d_model)
            qh = q[..., sl].astype(jnp.bfloat16)
            kh = k[..., sl].astype(jnp.bfloat16)
            vh = v[..., sl].astype(jnp.bfloat16)
            s = jnp.einsum('bqd,bkd->bqk', qh, kh,
                           preferred_element_type=jnp.float32) + mask_bias
            p = jax.nn.softmax(s, axis=-1)
            ctx.append(jnp.einsum('bqk,bkd->bqd', p.astype(jnp.bfloat16), vh,
                                  preferred_element_type=jnp.float32))
        attn = bdot(jnp.concatenate(ctx, axis=-1), wo[li]) + bo[li]
        x = layernorm(x + attn, ln1g[li], ln1b[li])
        f = jnp.maximum(bdot(x, w1[li]) + b1[li], 0.0)
        x = layernorm(x + bdot(f, w2[li]) + b2[li], ln2g[li], ln2b[li])

    pooled = jnp.mean(x, axis=1)
    hcls = jnp.maximum(bdot(pooled, wc1) + bc1, 0.0)
    logits = bdot(hcls, wc2p) + bc2p
    return logits[:, :num_classes]


if __name__ == "__main__":
    # lane-friendly small shapes: feature dims multiples of 128, S multiple of 16
    num_layers, num_heads = 2, 4
    dim_in = 128          # input_size == dim_model of the torch module
    d_model = 128         # per-head projection dim (AttentionHead d_model)
    d_ff = 256
    hidden_size = 128
    num_classes = 8
    vocab = 5755
    B, S, max_len = 2, 16, 64

    root = jax.random.PRNGKey(0)
    k_params, k_tok = jax.random.split(root)
    params = init_params(k_params, num_layers=num_layers, num_heads=num_heads,
                         dim_in=dim_in, d_model=d_model, d_ff=d_ff,
                         hidden_size=hidden_size, num_classes=num_classes,
                         vocab=vocab, max_len=max_len)

    tokens = jax.random.randint(k_tok, (B, S), 1, vocab, dtype=jnp.int32)
    tokens = tokens.at[:, S - 4:].set(0)   # trailing padding exercises the mask

    fwd = jax.jit(functools.partial(classifier_forward,
                                    num_heads=num_heads, d_model=d_model,
                                    num_classes=num_classes))
    logits = jax.block_until_ready(fwd(tokens, params))

    ref = reference_forward(tokens, params, num_heads=num_heads,
                            d_model=d_model, num_classes=num_classes)
    assert logits.shape == (B, num_classes)
    # tolerance covers the approx-reciprocal softmax and bf16/MXU accumulation
    # ordering differences vs the matched-precision JAX reference.
    err = float(jnp.max(jnp.abs(logits - ref)))
    assert jnp.allclose(logits, ref, atol=5e-2, rtol=5e-2), err

    print("KERNEL_OK")
</pallas_src>

<mosaic_0001>
module attributes {stable_mosaic.version = 11 : i64} {
  func.func @_fused_forward_kernel(%arg0: i32, %arg1: memref<1x16x128xf32, #tpu.memory_space<vmem>>, %arg2: memref<1x1x16xi32, #tpu.memory_space<vmem>>, %arg3: memref<2x128x1536xbf16, #tpu.memory_space<vmem>>, %arg4: memref<2x1x1536xf32, #tpu.memory_space<vmem>>, %arg5: memref<2x512x128xbf16, #tpu.memory_space<vmem>>, %arg6: memref<2x1x128xf32, #tpu.memory_space<vmem>>, %arg7: memref<2x1x128xf32, #tpu.memory_space<vmem>>, %arg8: memref<2x1x128xf32, #tpu.memory_space<vmem>>, %arg9: memref<2x128x256xbf16, #tpu.memory_space<vmem>>, %arg10: memref<2x1x256xf32, #tpu.memory_space<vmem>>, %arg11: memref<2x256x128xbf16, #tpu.memory_space<vmem>>, %arg12: memref<2x1x128xf32, #tpu.memory_space<vmem>>, %arg13: memref<2x1x128xf32, #tpu.memory_space<vmem>>, %arg14: memref<2x1x128xf32, #tpu.memory_space<vmem>>, %arg15: memref<128x128xbf16, #tpu.memory_space<vmem>>, %arg16: memref<1x128xf32, #tpu.memory_space<vmem>>, %arg17: memref<128x128xbf16, #tpu.memory_space<vmem>>, %arg18: memref<1x128xf32, #tpu.memory_space<vmem>>, %arg19: memref<1x1x128xf32, #tpu.memory_space<vmem>>) attributes {dimension_semantics = [#tpu.dimension_semantics<parallel>], iteration_bounds = array<i64: 2>, scalar_prefetch = 0 : i64, scratch_operands = 0 : i64, tpu.core_type = #tpu.core_type<tc>, window_params = [{transform_indices = @transform_0, window_bounds = array<i64: 1, 16, 128>}, {transform_indices = @transform_1, window_bounds = array<i64: 1, 1, 16>}, {pipeline_mode = #tpu.pipeline_mode<synchronous>, transform_indices = @transform_2, window_bounds = array<i64: 2, 128, 1536>}, {pipeline_mode = #tpu.pipeline_mode<synchronous>, transform_indices = @transform_3, window_bounds = array<i64: 2, 1, 1536>}, {pipeline_mode = #tpu.pipeline_mode<synchronous>, transform_indices = @transform_4, window_bounds = array<i64: 2, 512, 128>}, {pipeline_mode = #tpu.pipeline_mode<synchronous>, transform_indices = @transform_5, window_bounds = array<i64: 2, 1, 128>}, {pipeline_mode = #tpu.pipeline_mode<synchronous>, transform_indices = @transform_6, window_bounds = array<i64: 2, 1, 128>}, {pipeline_mode = #tpu.pipeline_mode<synchronous>, transform_indices = @transform_7, window_bounds = array<i64: 2, 1, 128>}, {pipeline_mode = #tpu.pipeline_mode<synchronous>, transform_indices = @transform_8, window_bounds = array<i64: 2, 128, 256>}, {pipeline_mode = #tpu.pipeline_mode<synchronous>, transform_indices = @transform_9, window_bounds = array<i64: 2, 1, 256>}, {pipeline_mode = #tpu.pipeline_mode<synchronous>, transform_indices = @transform_10, window_bounds = array<i64: 2, 256, 128>}, {pipeline_mode = #tpu.pipeline_mode<synchronous>, transform_indices = @transform_11, window_bounds = array<i64: 2, 1, 128>}, {pipeline_mode = #tpu.pipeline_mode<synchronous>, transform_indices = @transform_12, window_bounds = array<i64: 2, 1, 128>}, {pipeline_mode = #tpu.pipeline_mode<synchronous>, transform_indices = @transform_13, window_bounds = array<i64: 2, 1, 128>}, {pipeline_mode = #tpu.pipeline_mode<synchronous>, transform_indices = @transform_14, window_bounds = array<i64: 128, 128>}, {pipeline_mode = #tpu.pipeline_mode<synchronous>, transform_indices = @transform_15, window_bounds = array<i64: 1, 128>}, {pipeline_mode = #tpu.pipeline_mode<synchronous>, transform_indices = @transform_16, window_bounds = array<i64: 128, 128>}, {pipeline_mode = #tpu.pipeline_mode<synchronous>, transform_indices = @transform_17, window_bounds = array<i64: 1, 128>}, {transform_indices = @transform_18, window_bounds = array<i64: 1, 1, 128>}]} {
    %c0 = arith.constant 0 : index
    %c0_0 = arith.constant 0 : index
    %c0_1 = arith.constant 0 : index
    %0 = vector.load %arg2[%c0, %c0_0, %c0_1] : memref<1x1x16xi32, #tpu.memory_space<vmem>>, vector<1x1x16xi32>
    %c0_i32 = arith.constant 0 : i32
    %1 = vector.broadcast %c0_i32 : i32 to vector<1x1x16xi32>
    %2 = arith.cmpi ne, %0, %1 : vector<1x1x16xi32>
    %cst = arith.constant 0.000000e+00 : f32
    %cst_2 = arith.constant -1.000000e+30 : f32
    %3 = vector.broadcast %cst : f32 to vector<1x1x16xf32>
    %4 = vector.broadcast %cst_2 : f32 to vector<1x1x16xf32>
    %5 = arith.select %2, %3, %4 : vector<1x1x16xi1>, vector<1x1x16xf32>
    %c0_3 = arith.constant 0 : index
    %c0_4 = arith.constant 0 : index
    %c0_5 = arith.constant 0 : index
    %6 = vector.load %arg1[%c0_3, %c0_4, %c0_5] : memref<1x16x128xf32, #tpu.memory_space<vmem>>, vector<1x16x128xf32>
    %7 = vector.shape_cast %6 : vector<1x16x128xf32> to vector<16x128xf32>
    %8 = arith.truncf %7 : vector<16x128xf32> to vector<16x128xbf16>
    %c0_6 = arith.constant 0 : index
    %c0_7 = arith.constant 0 : index
    %c0_8 = arith.constant 0 : index
    %9 = vector.load %arg3[%c0_6, %c0_7, %c0_8] : memref<2x128x1536xbf16, #tpu.memory_space<vmem>>, vector<1x128x1536xbf16>
    %10 = vector.shape_cast %9 : vector<1x128x1536xbf16> to vector<128x1536xbf16>
    %cst_9 = arith.constant dense<0.000000e+00> : vector<16x1536xf32>
    %11 = tpu.matmul %8, %10, %cst_9 {dimension_numbers = #tpu.dot_dimension_numbers<[1], [0], [0], [1], [0, 0, 1, 1], [], []>} : vector<16x128xbf16>, vector<128x1536xbf16>, vector<16x1536xf32> -> vector<16x1536xf32>
    %c0_10 = arith.constant 0 : index
    %c0_11 = arith.constant 0 : index
    %c0_12 = arith.constant 0 : index
    %12 = vector.load %arg4[%c0_10, %c0_11, %c0_12] : memref<2x1x1536xf32, #tpu.memory_space<vmem>>, vector<1x1x1536xf32>
    %13 = vector.shape_cast %12 : vector<1x1x1536xf32> to vector<1x1536xf32>
    %14 = vector.broadcast %13 : vector<1x1536xf32> to vector<16x1536xf32>
    %15 = arith.addf %11, %14 : vector<16x1536xf32>
    %16 = vector.shape_cast %5 : vector<1x1x16xf32> to vector<1x16xf32>
    %cst_13 = arith.constant 0.000000e+00 : f32
    %17 = vector.broadcast %cst_13 : f32 to vector<16x128xf32>
    %18 = vector.extract_strided_slice %15 {offsets = [0, 0], sizes = [16, 128], strides = [1, 1]} : vector<16x1536xf32> to vector<16x128xf32>
    %19 = arith.truncf %18 : vector<16x128xf32> to vector<16x128xbf16>
    %20 = vector.extract_strided_slice %15 {offsets = [0, 512], sizes = [16, 128], strides = [1, 1]} : vector<16x1536xf32> to vector<16x128xf32>
    %21 = arith.truncf %20 : vector<16x128xf32> to vector<16x128xbf16>
    %22 = vector.extract_strided_slice %15 {offsets = [0, 1024], sizes = [16, 128], strides = [1, 1]} : vector<16x1536xf32> to vector<16x128xf32>
    %23 = arith.truncf %22 : vector<16x128xf32> to vector<16x128xbf16>
    %cst_14 = arith.constant dense<0.000000e+00> : vector<16x16xf32>
    %24 = tpu.matmul %19, %21, %cst_14 {dimension_numbers = #tpu.dot_dimension_numbers<[1], [1], [0], [0], [0, 0, 1, 0], [], []>} : vector<16x128xbf16>, vector<16x128xbf16>, vector<16x16xf32> -> vector<16x16xf32>
    %25 = vector.broadcast %16 : vector<1x16xf32> to vector<16x16xf32>
    %26 = arith.addf %24, %25 : vector<16x16xf32>
    %cst_15 = arith.constant dense<0xFF800000> : vector<16xf32>
    %27 = vector.multi_reduction <maximumf>, %26, %cst_15 [1] : vector<16x16xf32> to vector<16xf32>
    %28 = vector.shape_cast %27 : vector<16xf32> to vector<16x1xf32>
    %29 = vector.broadcast %28 : vector<16x1xf32> to vector<16x16xf32>
    %30 = arith.subf %26, %29 : vector<16x16xf32>
    %31 = math.exp %30 : vector<16x16xf32>
    %cst_16 = arith.constant dense<0.000000e+00> : vector<16xf32>
    %32 = vector.multi_reduction <add>, %31, %cst_16 [1] : vector<16x16xf32> to vector<16xf32>
    %33 = vector.shape_cast %32 : vector<16xf32> to vector<16x1xf32>
    %34 = tpu.reciprocal %33 {approx = true} : vector<16x1xf32> -> vector<16x1xf32>
    %35 = vector.broadcast %34 : vector<16x1xf32> to vector<16x16xf32>
    %36 = arith.mulf %31, %35 : vector<16x16xf32>
    %37 = arith.truncf %36 : vector<16x16xf32> to vector<16x16xbf16>
    %cst_17 = arith.constant dense<0.000000e+00> : vector<16x128xf32>
    %38 = tpu.matmul %37, %23, %cst_17 {dimension_numbers = #tpu.dot_dimension_numbers<[1], [0], [0], [1], [0, 0, 1, 1], [], []>} : vector<16x16xbf16>, vector<16x128xbf16>, vector<16x128xf32> -> vector<16x128xf32>
    %39 = arith.truncf %38 : vector<16x128xf32> to vector<16x128xbf16>
    %c0_18 = arith.constant 0 : index
    %c0_19 = arith.constant 0 : index
    %c0_20 = arith.constant 0 : index
    %40 = vector.load %arg5[%c0_18, %c0_19, %c0_20] : memref<2x512x128xbf16, #tpu.memory_space<vmem>>, vector<1x128x128xbf16>
    %41 = vector.shape_cast %40 : vector<1x128x128xbf16> to vector<128x128xbf16>
    %cst_21 = arith.constant dense<0.000000e+00> : vector<16x128xf32>
    %42 = tpu.matmul %39, %41, %cst_21 {dimension_numbers = #tpu.dot_dimension_numbers<[1], [0], [0], [1], [0, 0, 1, 1], [], []>} : vector<16x128xbf16>, vector<128x128xbf16>, vector<16x128xf32> -> vector<16x128xf32>
    %43 = arith.addf %17, %42 : vector<16x128xf32>
    %44 = vector.extract_strided_slice %15 {offsets = [0, 128], sizes = [16, 128], strides = [1, 1]} : vector<16x1536xf32> to vector<16x128xf32>
    %45 = arith.truncf %44 : vector<16x128xf32> to vector<16x128xbf16>
    %46 = vector.extract_strided_slice %15 {offsets = [0, 640], sizes = [16, 128], strides = [1, 1]} : vector<16x1536xf32> to vector<16x128xf32>
    %47 = arith.truncf %46 : vector<16x128xf32> to vector<16x128xbf16>
    %48 = vector.extract_strided_slice %15 {offsets = [0, 1152], sizes = [16, 128], strides = [1, 1]} : vector<16x1536xf32> to vector<16x128xf32>
    %49 = arith.truncf %48 : vector<16x128xf32> to vector<16x128xbf16>
    %cst_22 = arith.constant dense<0.000000e+00> : vector<16x16xf32>
    %50 = tpu.matmul %45, %47, %cst_22 {dimension_numbers = #tpu.dot_dimension_numbers<[1], [1], [0], [0], [0, 0, 1, 0], [], []>} : vector<16x128xbf16>, vector<16x128xbf16>, vector<16x16xf32> -> vector<16x16xf32>
    %51 = vector.broadcast %16 : vector<1x16xf32> to vector<16x16xf32>
    %52 = arith.addf %50, %51 : vector<16x16xf32>
    %cst_23 = arith.constant dense<0xFF800000> : vector<16xf32>
    %53 = vector.multi_reduction <maximumf>, %52, %cst_23 [1] : vector<16x16xf32> to vector<16xf32>
    %54 = vector.shape_cast %53 : vector<16xf32> to vector<16x1xf32>
    %55 = vector.broadcast %54 : vector<16x1xf32> to vector<16x16xf32>
    %56 = arith.subf %52, %55 : vector<16x16xf32>
    %57 = math.exp %56 : vector<16x16xf32>
    %cst_24 = arith.constant dense<0.000000e+00> : vector<16xf32>
    %58 = vector.multi_reduction <add>, %57, %cst_24 [1] : vector<16x16xf32> to vector<16xf32>
    %59 = vector.shape_cast %58 : vector<16xf32> to vector<16x1xf32>
    %60 = tpu.reciprocal %59 {approx = true} : vector<16x1xf32> -> vector<16x1xf32>
    %61 = vector.broadcast %60 : vector<16x1xf32> to vector<16x16xf32>
    %62 = arith.mulf %57, %61 : vector<16x16xf32>
    %63 = arith.truncf %62 : vector<16x16xf32> to vector<16x16xbf16>
    %cst_25 = arith.constant dense<0.000000e+00> : vector<16x128xf32>
    %64 = tpu.matmul %63, %49, %cst_25 {dimension_numbers = #tpu.dot_dimension_numbers<[1], [0], [0], [1], [0, 0, 1, 1], [], []>} : vector<16x16xbf16>, vector<16x128xbf16>, vector<16x128xf32> -> vector<16x128xf32>
    %65 = arith.truncf %64 : vector<16x128xf32> to vector<16x128xbf16>
    %c0_26 = arith.constant 0 : index
    %c128 = arith.constant 128 : index
    %c0_27 = arith.constant 0 : index
    %66 = vector.load %arg5[%c0_26, %c128, %c0_27] : memref<2x512x128xbf16, #tpu.memory_space<vmem>>, vector<1x128x128xbf16>
    %67 = vector.shape_cast %66 : vector<1x128x128xbf16> to vector<128x128xbf16>
    %cst_28 = arith.constant dense<0.000000e+00> : vector<16x128xf32>
    %68 = tpu.matmul %65, %67, %cst_28 {dimension_numbers = #tpu.dot_dimension_numbers<[1], [0], [0], [1], [0, 0, 1, 1], [], []>} : vector<16x128xbf16>, vector<128x128xbf16>, vector<16x128xf32> -> vector<16x128xf32>
    %69 = arith.addf %43, %68 : vector<16x128xf32>
    %70 = vector.extract_strided_slice %15 {offsets = [0, 256], sizes = [16, 128], strides = [1, 1]} : vector<16x1536xf32> to vector<16x128xf32>
    %71 = arith.truncf %70 : vector<16x128xf32> to vector<16x128xbf16>
    %72 = vector.extract_strided_slice %15 {offsets = [0, 768], sizes = [16, 128], strides = [1, 1]} : vector<16x1536xf32> to vector<16x128xf32>
    %73 = arith.truncf %72 : vector<16x128xf32> to vector<16x128xbf16>
    %74 = vector.extract_strided_slice %15 {offsets = [0, 1280], sizes = [16, 128], strides = [1, 1]} : vector<16x1536xf32> to vector<16x128xf32>
    %75 = arith.truncf %74 : vector<16x128xf32> to vector<16x128xbf16>
    %cst_29 = arith.constant dense<0.000000e+00> : vector<16x16xf32>
    %76 = tpu.matmul %71, %73, %cst_29 {dimension_numbers = #tpu.dot_dimension_numbers<[1], [1], [0], [0], [0, 0, 1, 0], [], []>} : vector<16x128xbf16>, vector<16x128xbf16>, vector<16x16xf32> -> vector<16x16xf32>
    %77 = vector.broadcast %16 : vector<1x16xf32> to vector<16x16xf32>
    %78 = arith.addf %76, %77 : vector<16x16xf32>
    %cst_30 = arith.constant dense<0xFF800000> : vector<16xf32>
    %79 = vector.multi_reduction <maximumf>, %78, %cst_30 [1] : vector<16x16xf32> to vector<16xf32>
    %80 = vector.shape_cast %79 : vector<16xf32> to vector<16x1xf32>
    %81 = vector.broadcast %80 : vector<16x1xf32> to vector<16x16xf32>
    %82 = arith.subf %78, %81 : vector<16x16xf32>
    %83 = math.exp %82 : vector<16x16xf32>
    %cst_31 = arith.constant dense<0.000000e+00> : vector<16xf32>
    %84 = vector.multi_reduction <add>, %83, %cst_31 [1] : vector<16x16xf32> to vector<16xf32>
    %85 = vector.shape_cast %84 : vector<16xf32> to vector<16x1xf32>
    %86 = tpu.reciprocal %85 {approx = true} : vector<16x1xf32> -> vector<16x1xf32>
    %87 = vector.broadcast %86 : vector<16x1xf32> to vector<16x16xf32>
    %88 = arith.mulf %83, %87 : vector<16x16xf32>
    %89 = arith.truncf %88 : vector<16x16xf32> to vector<16x16xbf16>
    %cst_32 = arith.constant dense<0.000000e+00> : vector<16x128xf32>
    %90 = tpu.matmul %89, %75, %cst_32 {dimension_numbers = #tpu.dot_dimension_numbers<[1], [0], [0], [1], [0, 0, 1, 1], [], []>} : vector<16x16xbf16>, vector<16x128xbf16>, vector<16x128xf32> -> vector<16x128xf32>
    %91 = arith.truncf %90 : vector<16x128xf32> to vector<16x128xbf16>
    %c0_33 = arith.constant 0 : index
    %c256 = arith.constant 256 : index
    %c0_34 = arith.constant 0 : index
    %92 = vector.load %arg5[%c0_33, %c256, %c0_34] : memref<2x512x128xbf16, #tpu.memory_space<vmem>>, vector<1x128x128xbf16>
    %93 = vector.shape_cast %92 : vector<1x128x128xbf16> to vector<128x128xbf16>
    %cst_35 = arith.constant dense<0.000000e+00> : vector<16x128xf32>
    %94 = tpu.matmul %91, %93, %cst_35 {dimension_numbers = #tpu.dot_dimension_numbers<[1], [0], [0], [1], [0, 0, 1, 1], [], []>} : vector<16x128xbf16>, vector<128x128xbf16>, vector<16x128xf32> -> vector<16x128xf32>
    %95 = arith.addf %69, %94 : vector<16x128xf32>
    %96 = vector.extract_strided_slice %15 {offsets = [0, 384], sizes = [16, 128], strides = [1, 1]} : vector<16x1536xf32> to vector<16x128xf32>
    %97 = arith.truncf %96 : vector<16x128xf32> to vector<16x128xbf16>
    %98 = vector.extract_strided_slice %15 {offsets = [0, 896], sizes = [16, 128], strides = [1, 1]} : vector<16x1536xf32> to vector<16x128xf32>
    %99 = arith.truncf %98 : vector<16x128xf32> to vector<16x128xbf16>
    %100 = vector.extract_strided_slice %15 {offsets = [0, 1408], sizes = [16, 128], strides = [1, 1]} : vector<16x1536xf32> to vector<16x128xf32>
    %101 = arith.truncf %100 : vector<16x128xf32> to vector<16x128xbf16>
    %cst_36 = arith.constant dense<0.000000e+00> : vector<16x16xf32>
    %102 = tpu.matmul %97, %99, %cst_36 {dimension_numbers = #tpu.dot_dimension_numbers<[1], [1], [0], [0], [0, 0, 1, 0], [], []>} : vector<16x128xbf16>, vector<16x128xbf16>, vector<16x16xf32> -> vector<16x16xf32>
    %103 = vector.broadcast %16 : vector<1x16xf32> to vector<16x16xf32>
    %104 = arith.addf %102, %103 : vector<16x16xf32>
    %cst_37 = arith.constant dense<0xFF800000> : vector<16xf32>
    %105 = vector.multi_reduction <maximumf>, %104, %cst_37 [1] : vector<16x16xf32> to vector<16xf32>
    %106 = vector.shape_cast %105 : vector<16xf32> to vector<16x1xf32>
    %107 = vector.broadcast %106 : vector<16x1xf32> to vector<16x16xf32>
    %108 = arith.subf %104, %107 : vector<16x16xf32>
    %109 = math.exp %108 : vector<16x16xf32>
    %cst_38 = arith.constant dense<0.000000e+00> : vector<16xf32>
    %110 = vector.multi_reduction <add>, %109, %cst_38 [1] : vector<16x16xf32> to vector<16xf32>
    %111 = vector.shape_cast %110 : vector<16xf32> to vector<16x1xf32>
    %112 = tpu.reciprocal %111 {approx = true} : vector<16x1xf32> -> vector<16x1xf32>
    %113 = vector.broadcast %112 : vector<16x1xf32> to vector<16x16xf32>
    %114 = arith.mulf %109, %113 : vector<16x16xf32>
    %115 = arith.truncf %114 : vector<16x16xf32> to vector<16x16xbf16>
    %cst_39 = arith.constant dense<0.000000e+00> : vector<16x128xf32>
    %116 = tpu.matmul %115, %101, %cst_39 {dimension_numbers = #tpu.dot_dimension_numbers<[1], [0], [0], [1], [0, 0, 1, 1], [], []>} : vector<16x16xbf16>, vector<16x128xbf16>, vector<16x128xf32> -> vector<16x128xf32>
    %117 = arith.truncf %116 : vector<16x128xf32> to vector<16x128xbf16>
    %c0_40 = arith.constant 0 : index
    %c384 = arith.constant 384 : index
    %c0_41 = arith.constant 0 : index
    %118 = vector.load %arg5[%c0_40, %c384, %c0_41] : memref<2x512x128xbf16, #tpu.memory_space<vmem>>, vector<1x128x128xbf16>
    %119 = vector.shape_cast %118 : vector<1x128x128xbf16> to vector<128x128xbf16>
    %cst_42 = arith.constant dense<0.000000e+00> : vector<16x128xf32>
    %120 = tpu.matmul %117, %119, %cst_42 {dimension_numbers = #tpu.dot_dimension_numbers<[1], [0], [0], [1], [0, 0, 1, 1], [], []>} : vector<16x128xbf16>, vector<128x128xbf16>, vector<16x128xf32> -> vector<16x128xf32>
    %121 = arith.addf %95, %120 : vector<16x128xf32>
    %c0_43 = arith.constant 0 : index
    %c0_44 = arith.constant 0 : index
    %c0_45 = arith.constant 0 : index
    %122 = vector.load %arg6[%c0_43, %c0_44, %c0_45] : memref<2x1x128xf32, #tpu.memory_space<vmem>>, vector<1x1x128xf32>
    %123 = vector.shape_cast %122 : vector<1x1x128xf32> to vector<1x128xf32>
    %124 = vector.broadcast %123 : vector<1x128xf32> to vector<16x128xf32>
    %125 = arith.addf %121, %124 : vector<16x128xf32>
    %126 = arith.addf %7, %125 : vector<16x128xf32>
    %cst_46 = arith.constant dense<0.000000e+00> : vector<16xf32>
    %127 = vector.multi_reduction <add>, %126, %cst_46 [1] : vector<16x128xf32> to vector<16xf32>
    %128 = vector.shape_cast %127 : vector<16xf32> to vector<16x1xf32>
    %cst_47 = arith.constant 1.280000e+02 : f32
    %129 = vector.broadcast %cst_47 : f32 to vector<16x1xf32>
    %130 = arith.divf %128, %129 : vector<16x1xf32>
    %131 = vector.broadcast %130 : vector<16x1xf32> to vector<16x128xf32>
    %132 = arith.subf %126, %131 : vector<16x128xf32>
    %133 = arith.mulf %132, %132 : vector<16x128xf32>
    %cst_48 = arith.constant dense<0.000000e+00> : vector<16xf32>
    %134 = vector.multi_reduction <add>, %133, %cst_48 [1] : vector<16x128xf32> to vector<16xf32>
    %135 = vector.shape_cast %134 : vector<16xf32> to vector<16x1xf32>
    %cst_49 = arith.constant 1.280000e+02 : f32
    %136 = vector.broadcast %cst_49 : f32 to vector<16x1xf32>
    %137 = arith.divf %135, %136 : vector<16x1xf32>
    %138 = vector.broadcast %130 : vector<16x1xf32> to vector<16x128xf32>
    %139 = arith.subf %126, %138 : vector<16x128xf32>
    %cst_50 = arith.constant 9.99999974E-6 : f32
    %140 = vector.broadcast %cst_50 : f32 to vector<16x1xf32>
    %141 = arith.addf %137, %140 : vector<16x1xf32>
    %142 = math.rsqrt %141 : vector<16x1xf32>
    %143 = vector.broadcast %142 : vector<16x1xf32> to vector<16x128xf32>
    %144 = arith.mulf %139, %143 : vector<16x128xf32>
    %c0_51 = arith.constant 0 : index
    %c0_52 = arith.constant 0 : index
    %c0_53 = arith.constant 0 : index
    %145 = vector.load %arg7[%c0_51, %c0_52, %c0_53] : memref<2x1x128xf32, #tpu.memory_space<vmem>>, vector<1x1x128xf32>
    %146 = vector.shape_cast %145 : vector<1x1x128xf32> to vector<1x128xf32>
    %147 = vector.broadcast %146 : vector<1x128xf32> to vector<16x128xf32>
    %148 = arith.mulf %144, %147 : vector<16x128xf32>
    %c0_54 = arith.constant 0 : index
    %c0_55 = arith.constant 0 : index
    %c0_56 = arith.constant 0 : index
    %149 = vector.load %arg8[%c0_54, %c0_55, %c0_56] : memref<2x1x128xf32, #tpu.memory_space<vmem>>, vector<1x1x128xf32>
    %150 = vector.shape_cast %149 : vector<1x1x128xf32> to vector<1x128xf32>
    %151 = vector.broadcast %150 : vector<1x128xf32> to vector<16x128xf32>
    %152 = arith.addf %148, %151 : vector<16x128xf32>
    %153 = arith.truncf %152 : vector<16x128xf32> to vector<16x128xbf16>
    %c0_57 = arith.constant 0 : index
    %c0_58 = arith.constant 0 : index
    %c0_59 = arith.constant 0 : index
    %154 = vector.load %arg9[%c0_57, %c0_58, %c0_59] : memref<2x128x256xbf16, #tpu.memory_space<vmem>>, vector<1x128x256xbf16>
    %155 = vector.shape_cast %154 : vector<1x128x256xbf16> to vector<128x256xbf16>
    %cst_60 = arith.constant dense<0.000000e+00> : vector<16x256xf32>
    %156 = tpu.matmul %153, %155, %cst_60 {dimension_numbers = #tpu.dot_dimension_numbers<[1], [0], [0], [1], [0, 0, 1, 1], [], []>} : vector<16x128xbf16>, vector<128x256xbf16>, vector<16x256xf32> -> vector<16x256xf32>
    %c0_61 = arith.constant 0 : index
    %c0_62 = arith.constant 0 : index
    %c0_63 = arith.constant 0 : index
    %157 = vector.load %arg10[%c0_61, %c0_62, %c0_63] : memref<2x1x256xf32, #tpu.memory_space<vmem>>, vector<1x1x256xf32>
    %158 = vector.shape_cast %157 : vector<1x1x256xf32> to vector<1x256xf32>
    %159 = vector.broadcast %158 : vector<1x256xf32> to vector<16x256xf32>
    %160 = arith.addf %156, %159 : vector<16x256xf32>
    %cst_64 = arith.constant 0.000000e+00 : f32
    %161 = vector.broadcast %cst_64 : f32 to vector<16x256xf32>
    %162 = arith.maximumf %160, %161 : vector<16x256xf32>
    %163 = arith.truncf %162 : vector<16x256xf32> to vector<16x256xbf16>
    %c0_65 = arith.constant 0 : index
    %c0_66 = arith.constant 0 : index
    %c0_67 = arith.constant 0 : index
    %164 = vector.load %arg11[%c0_65, %c0_66, %c0_67] : memref<2x256x128xbf16, #tpu.memory_space<vmem>>, vector<1x256x128xbf16>
    %165 = vector.shape_cast %164 : vector<1x256x128xbf16> to vector<256x128xbf16>
    %cst_68 = arith.constant dense<0.000000e+00> : vector<16x128xf32>
    %166 = tpu.matmul %163, %165, %cst_68 {dimension_numbers = #tpu.dot_dimension_numbers<[1], [0], [0], [1], [0, 0, 1, 1], [], []>} : vector<16x256xbf16>, vector<256x128xbf16>, vector<16x128xf32> -> vector<16x128xf32>
    %c0_69 = arith.constant 0 : index
    %c0_70 = arith.constant 0 : index
    %c0_71 = arith.constant 0 : index
    %167 = vector.load %arg12[%c0_69, %c0_70, %c0_71] : memref<2x1x128xf32, #tpu.memory_space<vmem>>, vector<1x1x128xf32>
    %168 = vector.shape_cast %167 : vector<1x1x128xf32> to vector<1x128xf32>
    %169 = vector.broadcast %168 : vector<1x128xf32> to vector<16x128xf32>
    %170 = arith.addf %166, %169 : vector<16x128xf32>
    %171 = arith.addf %152, %170 : vector<16x128xf32>
    %cst_72 = arith.constant dense<0.000000e+00> : vector<16xf32>
    %172 = vector.multi_reduction <add>, %171, %cst_72 [1] : vector<16x128xf32> to vector<16xf32>
    %173 = vector.shape_cast %172 : vector<16xf32> to vector<16x1xf32>
    %cst_73 = arith.constant 1.280000e+02 : f32
    %174 = vector.broadcast %cst_73 : f32 to vector<16x1xf32>
    %175 = arith.divf %173, %174 : vector<16x1xf32>
    %176 = vector.broadcast %175 : vector<16x1xf32> to vector<16x128xf32>
    %177 = arith.subf %171, %176 : vector<16x128xf32>
    %178 = arith.mulf %177, %177 : vector<16x128xf32>
    %cst_74 = arith.constant dense<0.000000e+00> : vector<16xf32>
    %179 = vector.multi_reduction <add>, %178, %cst_74 [1] : vector<16x128xf32> to vector<16xf32>
    %180 = vector.shape_cast %179 : vector<16xf32> to vector<16x1xf32>
    %cst_75 = arith.constant 1.280000e+02 : f32
    %181 = vector.broadcast %cst_75 : f32 to vector<16x1xf32>
    %182 = arith.divf %180, %181 : vector<16x1xf32>
    %183 = vector.broadcast %175 : vector<16x1xf32> to vector<16x128xf32>
    %184 = arith.subf %171, %183 : vector<16x128xf32>
    %cst_76 = arith.constant 9.99999974E-6 : f32
    %185 = vector.broadcast %cst_76 : f32 to vector<16x1xf32>
    %186 = arith.addf %182, %185 : vector<16x1xf32>
    %187 = math.rsqrt %186 : vector<16x1xf32>
    %188 = vector.broadcast %187 : vector<16x1xf32> to vector<16x128xf32>
    %189 = arith.mulf %184, %188 : vector<16x128xf32>
    %c0_77 = arith.constant 0 : index
    %c0_78 = arith.constant 0 : index
    %c0_79 = arith.constant 0 : index
    %190 = vector.load %arg13[%c0_77, %c0_78, %c0_79] : memref<2x1x128xf32, #tpu.memory_space<vmem>>, vector<1x1x128xf32>
    %191 = vector.shape_cast %190 : vector<1x1x128xf32> to vector<1x128xf32>
    %192 = vector.broadcast %191 : vector<1x128xf32> to vector<16x128xf32>
    %193 = arith.mulf %189, %192 : vector<16x128xf32>
    %c0_80 = arith.constant 0 : index
    %c0_81 = arith.constant 0 : index
    %c0_82 = arith.constant 0 : index
    %194 = vector.load %arg14[%c0_80, %c0_81, %c0_82] : memref<2x1x128xf32, #tpu.memory_space<vmem>>, vector<1x1x128xf32>
    %195 = vector.shape_cast %194 : vector<1x1x128xf32> to vector<1x128xf32>
    %196 = vector.broadcast %195 : vector<1x128xf32> to vector<16x128xf32>
    %197 = arith.addf %193, %196 : vector<16x128xf32>
    %198 = arith.truncf %197 : vector<16x128xf32> to vector<16x128xbf16>
    %c1 = arith.constant 1 : index
    %c0_83 = arith.constant 0 : index
    %c0_84 = arith.constant 0 : index
    %199 = vector.load %arg3[%c1, %c0_83, %c0_84] : memref<2x128x1536xbf16, #tpu.memory_space<vmem>>, vector<1x128x1536xbf16>
    %200 = vector.shape_cast %199 : vector<1x128x1536xbf16> to vector<128x1536xbf16>
    %cst_85 = arith.constant dense<0.000000e+00> : vector<16x1536xf32>
    %201 = tpu.matmul %198, %200, %cst_85 {dimension_numbers = #tpu.dot_dimension_numbers<[1], [0], [0], [1], [0, 0, 1, 1], [], []>} : vector<16x128xbf16>, vector<128x1536xbf16>, vector<16x1536xf32> -> vector<16x1536xf32>
    %c1_86 = arith.constant 1 : index
    %c0_87 = arith.constant 0 : index
    %c0_88 = arith.constant 0 : index
    %202 = vector.load %arg4[%c1_86, %c0_87, %c0_88] : memref<2x1x1536xf32, #tpu.memory_space<vmem>>, vector<1x1x1536xf32>
    %203 = vector.shape_cast %202 : vector<1x1x1536xf32> to vector<1x1536xf32>
    %204 = vector.broadcast %203 : vector<1x1536xf32> to vector<16x1536xf32>
    %205 = arith.addf %201, %204 : vector<16x1536xf32>
    %206 = vector.shape_cast %5 : vector<1x1x16xf32> to vector<1x16xf32>
    %cst_89 = arith.constant 0.000000e+00 : f32
    %207 = vector.broadcast %cst_89 : f32 to vector<16x128xf32>
    %208 = vector.extract_strided_slice %205 {offsets = [0, 0], sizes = [16, 128], strides = [1, 1]} : vector<16x1536xf32> to vector<16x128xf32>
    %209 = arith.truncf %208 : vector<16x128xf32> to vector<16x128xbf16>
    %210 = vector.extract_strided_slice %205 {offsets = [0, 512], sizes = [16, 128], strides = [1, 1]} : vector<16x1536xf32> to vector<16x128xf32>
    %211 = arith.truncf %210 : vector<16x128xf32> to vector<16x128xbf16>
    %212 = vector.extract_strided_slice %205 {offsets = [0, 1024], sizes = [16, 128], strides = [1, 1]} : vector<16x1536xf32> to vector<16x128xf32>
    %213 = arith.truncf %212 : vector<16x128xf32> to vector<16x128xbf16>
    %cst_90 = arith.constant dense<0.000000e+00> : vector<16x16xf32>
    %214 = tpu.matmul %209, %211, %cst_90 {dimension_numbers = #tpu.dot_dimension_numbers<[1], [1], [0], [0], [0, 0, 1, 0], [], []>} : vector<16x128xbf16>, vector<16x128xbf16>, vector<16x16xf32> -> vector<16x16xf32>
    %215 = vector.broadcast %206 : vector<1x16xf32> to vector<16x16xf32>
    %216 = arith.addf %214, %215 : vector<16x16xf32>
    %cst_91 = arith.constant dense<0xFF800000> : vector<16xf32>
    %217 = vector.multi_reduction <maximumf>, %216, %cst_91 [1] : vector<16x16xf32> to vector<16xf32>
    %218 = vector.shape_cast %217 : vector<16xf32> to vector<16x1xf32>
    %219 = vector.broadcast %218 : vector<16x1xf32> to vector<16x16xf32>
    %220 = arith.subf %216, %219 : vector<16x16xf32>
    %221 = math.exp %220 : vector<16x16xf32>
    %cst_92 = arith.constant dense<0.000000e+00> : vector<16xf32>
    %222 = vector.multi_reduction <add>, %221, %cst_92 [1] : vector<16x16xf32> to vector<16xf32>
    %223 = vector.shape_cast %222 : vector<16xf32> to vector<16x1xf32>
    %224 = tpu.reciprocal %223 {approx = true} : vector<16x1xf32> -> vector<16x1xf32>
    %225 = vector.broadcast %224 : vector<16x1xf32> to vector<16x16xf32>
    %226 = arith.mulf %221, %225 : vector<16x16xf32>
    %227 = arith.truncf %226 : vector<16x16xf32> to vector<16x16xbf16>
    %cst_93 = arith.constant dense<0.000000e+00> : vector<16x128xf32>
    %228 = tpu.matmul %227, %213, %cst_93 {dimension_numbers = #tpu.dot_dimension_numbers<[1], [0], [0], [1], [0, 0, 1, 1], [], []>} : vector<16x16xbf16>, vector<16x128xbf16>, vector<16x128xf32> -> vector<16x128xf32>
    %229 = arith.truncf %228 : vector<16x128xf32> to vector<16x128xbf16>
    %c1_94 = arith.constant 1 : index
    %c0_95 = arith.constant 0 : index
    %c0_96 = arith.constant 0 : index
    %230 = vector.load %arg5[%c1_94, %c0_95, %c0_96] : memref<2x512x128xbf16, #tpu.memory_space<vmem>>, vector<1x128x128xbf16>
    %231 = vector.shape_cast %230 : vector<1x128x128xbf16> to vector<128x128xbf16>
    %cst_97 = arith.constant dense<0.000000e+00> : vector<16x128xf32>
    %232 = tpu.matmul %229, %231, %cst_97 {dimension_numbers = #tpu.dot_dimension_numbers<[1], [0], [0], [1], [0, 0, 1, 1], [], []>} : vector<16x128xbf16>, vector<128x128xbf16>, vector<16x128xf32> -> vector<16x128xf32>
    %233 = arith.addf %207, %232 : vector<16x128xf32>
    %234 = vector.extract_strided_slice %205 {offsets = [0, 128], sizes = [16, 128], strides = [1, 1]} : vector<16x1536xf32> to vector<16x128xf32>
    %235 = arith.truncf %234 : vector<16x128xf32> to vector<16x128xbf16>
    %236 = vector.extract_strided_slice %205 {offsets = [0, 640], sizes = [16, 128], strides = [1, 1]} : vector<16x1536xf32> to vector<16x128xf32>
    %237 = arith.truncf %236 : vector<16x128xf32> to vector<16x128xbf16>
    %238 = vector.extract_strided_slice %205 {offsets = [0, 1152], sizes = [16, 128], strides = [1, 1]} : vector<16x1536xf32> to vector<16x128xf32>
    %239 = arith.truncf %238 : vector<16x128xf32> to vector<16x128xbf16>
    %cst_98 = arith.constant dense<0.000000e+00> : vector<16x16xf32>
    %240 = tpu.matmul %235, %237, %cst_98 {dimension_numbers = #tpu.dot_dimension_numbers<[1], [1], [0], [0], [0, 0, 1, 0], [], []>} : vector<16x128xbf16>, vector<16x128xbf16>, vector<16x16xf32> -> vector<16x16xf32>
    %241 = vector.broadcast %206 : vector<1x16xf32> to vector<16x16xf32>
    %242 = arith.addf %240, %241 : vector<16x16xf32>
    %cst_99 = arith.constant dense<0xFF800000> : vector<16xf32>
    %243 = vector.multi_reduction <maximumf>, %242, %cst_99 [1] : vector<16x16xf32> to vector<16xf32>
    %244 = vector.shape_cast %243 : vector<16xf32> to vector<16x1xf32>
    %245 = vector.broadcast %244 : vector<16x1xf32> to vector<16x16xf32>
    %246 = arith.subf %242, %245 : vector<16x16xf32>
    %247 = math.exp %246 : vector<16x16xf32>
    %cst_100 = arith.constant dense<0.000000e+00> : vector<16xf32>
    %248 = vector.multi_reduction <add>, %247, %cst_100 [1] : vector<16x16xf32> to vector<16xf32>
    %249 = vector.shape_cast %248 : vector<16xf32> to vector<16x1xf32>
    %250 = tpu.reciprocal %249 {approx = true} : vector<16x1xf32> -> vector<16x1xf32>
    %251 = vector.broadcast %250 : vector<16x1xf32> to vector<16x16xf32>
    %252 = arith.mulf %247, %251 : vector<16x16xf32>
    %253 = arith.truncf %252 : vector<16x16xf32> to vector<16x16xbf16>
    %cst_101 = arith.constant dense<0.000000e+00> : vector<16x128xf32>
    %254 = tpu.matmul %253, %239, %cst_101 {dimension_numbers = #tpu.dot_dimension_numbers<[1], [0], [0], [1], [0, 0, 1, 1], [], []>} : vector<16x16xbf16>, vector<16x128xbf16>, vector<16x128xf32> -> vector<16x128xf32>
    %255 = arith.truncf %254 : vector<16x128xf32> to vector<16x128xbf16>
    %c1_102 = arith.constant 1 : index
    %c128_103 = arith.constant 128 : index
    %c0_104 = arith.constant 0 : index
    %256 = vector.load %arg5[%c1_102, %c128_103, %c0_104] : memref<2x512x128xbf16, #tpu.memory_space<vmem>>, vector<1x128x128xbf16>
    %257 = vector.shape_cast %256 : vector<1x128x128xbf16> to vector<128x128xbf16>
    %cst_105 = arith.constant dense<0.000000e+00> : vector<16x128xf32>
    %258 = tpu.matmul %255, %257, %cst_105 {dimension_numbers = #tpu.dot_dimension_numbers<[1], [0], [0], [1], [0, 0, 1, 1], [], []>} : vector<16x128xbf16>, vector<128x128xbf16>, vector<16x128xf32> -> vector<16x128xf32>
    %259 = arith.addf %233, %258 : vector<16x128xf32>
    %260 = vector.extract_strided_slice %205 {offsets = [0, 256], sizes = [16, 128], strides = [1, 1]} : vector<16x1536xf32> to vector<16x128xf32>
    %261 = arith.truncf %260 : vector<16x128xf32> to vector<16x128xbf16>
    %262 = vector.extract_strided_slice %205 {offsets = [0, 768], sizes = [16, 128], strides = [1, 1]} : vector<16x1536xf32> to vector<16x128xf32>
    %263 = arith.truncf %262 : vector<16x128xf32> to vector<16x128xbf16>
    %264 = vector.extract_strided_slice %205 {offsets = [0, 1280], sizes = [16, 128], strides = [1, 1]} : vector<16x1536xf32> to vector<16x128xf32>
    %265 = arith.truncf %264 : vector<16x128xf32> to vector<16x128xbf16>
    %cst_106 = arith.constant dense<0.000000e+00> : vector<16x16xf32>
    %266 = tpu.matmul %261, %263, %cst_106 {dimension_numbers = #tpu.dot_dimension_numbers<[1], [1], [0], [0], [0, 0, 1, 0], [], []>} : vector<16x128xbf16>, vector<16x128xbf16>, vector<16x16xf32> -> vector<16x16xf32>
    %267 = vector.broadcast %206 : vector<1x16xf32> to vector<16x16xf32>
    %268 = arith.addf %266, %267 : vector<16x16xf32>
    %cst_107 = arith.constant dense<0xFF800000> : vector<16xf32>
    %269 = vector.multi_reduction <maximumf>, %268, %cst_107 [1] : vector<16x16xf32> to vector<16xf32>
    %270 = vector.shape_cast %269 : vector<16xf32> to vector<16x1xf32>
    %271 = vector.broadcast %270 : vector<16x1xf32> to vector<16x16xf32>
    %272 = arith.subf %268, %271 : vector<16x16xf32>
    %273 = math.exp %272 : vector<16x16xf32>
    %cst_108 = arith.constant dense<0.000000e+00> : vector<16xf32>
    %274 = vector.multi_reduction <add>, %273, %cst_108 [1] : vector<16x16xf32> to vector<16xf32>
    %275 = vector.shape_cast %274 : vector<16xf32> to vector<16x1xf32>
    %276 = tpu.reciprocal %275 {approx = true} : vector<16x1xf32> -> vector<16x1xf32>
    %277 = vector.broadcast %276 : vector<16x1xf32> to vector<16x16xf32>
    %278 = arith.mulf %273, %277 : vector<16x16xf32>
    %279 = arith.truncf %278 : vector<16x16xf32> to vector<16x16xbf16>
    %cst_109 = arith.constant dense<0.000000e+00> : vector<16x128xf32>
    %280 = tpu.matmul %279, %265, %cst_109 {dimension_numbers = #tpu.dot_dimension_numbers<[1], [0], [0], [1], [0, 0, 1, 1], [], []>} : vector<16x16xbf16>, vector<16x128xbf16>, vector<16x128xf32> -> vector<16x128xf32>
    %281 = arith.truncf %280 : vector<16x128xf32> to vector<16x128xbf16>
    %c1_110 = arith.constant 1 : index
    %c256_111 = arith.constant 256 : index
    %c0_112 = arith.constant 0 : index
    %282 = vector.load %arg5[%c1_110, %c256_111, %c0_112] : memref<2x512x128xbf16, #tpu.memory_space<vmem>>, vector<1x128x128xbf16>
    %283 = vector.shape_cast %282 : vector<1x128x128xbf16> to vector<128x128xbf16>
    %cst_113 = arith.constant dense<0.000000e+00> : vector<16x128xf32>
    %284 = tpu.matmul %281, %283, %cst_113 {dimension_numbers = #tpu.dot_dimension_numbers<[1], [0], [0], [1], [0, 0, 1, 1], [], []>} : vector<16x128xbf16>, vector<128x128xbf16>, vector<16x128xf32> -> vector<16x128xf32>
    %285 = arith.addf %259, %284 : vector<16x128xf32>
    %286 = vector.extract_strided_slice %205 {offsets = [0, 384], sizes = [16, 128], strides = [1, 1]} : vector<16x1536xf32> to vector<16x128xf32>
    %287 = arith.truncf %286 : vector<16x128xf32> to vector<16x128xbf16>
    %288 = vector.extract_strided_slice %205 {offsets = [0, 896], sizes = [16, 128], strides = [1, 1]} : vector<16x1536xf32> to vector<16x128xf32>
    %289 = arith.truncf %288 : vector<16x128xf32> to vector<16x128xbf16>
    %290 = vector.extract_strided_slice %205 {offsets = [0, 1408], sizes = [16, 128], strides = [1, 1]} : vector<16x1536xf32> to vector<16x128xf32>
    %291 = arith.truncf %290 : vector<16x128xf32> to vector<16x128xbf16>
    %cst_114 = arith.constant dense<0.000000e+00> : vector<16x16xf32>
    %292 = tpu.matmul %287, %289, %cst_114 {dimension_numbers = #tpu.dot_dimension_numbers<[1], [1], [0], [0], [0, 0, 1, 0], [], []>} : vector<16x128xbf16>, vector<16x128xbf16>, vector<16x16xf32> -> vector<16x16xf32>
    %293 = vector.broadcast %206 : vector<1x16xf32> to vector<16x16xf32>
    %294 = arith.addf %292, %293 : vector<16x16xf32>
    %cst_115 = arith.constant dense<0xFF800000> : vector<16xf32>
    %295 = vector.multi_reduction <maximumf>, %294, %cst_115 [1] : vector<16x16xf32> to vector<16xf32>
    %296 = vector.shape_cast %295 : vector<16xf32> to vector<16x1xf32>
    %297 = vector.broadcast %296 : vector<16x1xf32> to vector<16x16xf32>
    %298 = arith.subf %294, %297 : vector<16x16xf32>
    %299 = math.exp %298 : vector<16x16xf32>
    %cst_116 = arith.constant dense<0.000000e+00> : vector<16xf32>
    %300 = vector.multi_reduction <add>, %299, %cst_116 [1] : vector<16x16xf32> to vector<16xf32>
    %301 = vector.shape_cast %300 : vector<16xf32> to vector<16x1xf32>
    %302 = tpu.reciprocal %301 {approx = true} : vector<16x1xf32> -> vector<16x1xf32>
    %303 = vector.broadcast %302 : vector<16x1xf32> to vector<16x16xf32>
    %304 = arith.mulf %299, %303 : vector<16x16xf32>
    %305 = arith.truncf %304 : vector<16x16xf32> to vector<16x16xbf16>
    %cst_117 = arith.constant dense<0.000000e+00> : vector<16x128xf32>
    %306 = tpu.matmul %305, %291, %cst_117 {dimension_numbers = #tpu.dot_dimension_numbers<[1], [0], [0], [1], [0, 0, 1, 1], [], []>} : vector<16x16xbf16>, vector<16x128xbf16>, vector<16x128xf32> -> vector<16x128xf32>
    %307 = arith.truncf %306 : vector<16x128xf32> to vector<16x128xbf16>
    %c1_118 = arith.constant 1 : index
    %c384_119 = arith.constant 384 : index
    %c0_120 = arith.constant 0 : index
    %308 = vector.load %arg5[%c1_118, %c384_119, %c0_120] : memref<2x512x128xbf16, #tpu.memory_space<vmem>>, vector<1x128x128xbf16>
    %309 = vector.shape_cast %308 : vector<1x128x128xbf16> to vector<128x128xbf16>
    %cst_121 = arith.constant dense<0.000000e+00> : vector<16x128xf32>
    %310 = tpu.matmul %307, %309, %cst_121 {dimension_numbers = #tpu.dot_dimension_numbers<[1], [0], [0], [1], [0, 0, 1, 1], [], []>} : vector<16x128xbf16>, vector<128x128xbf16>, vector<16x128xf32> -> vector<16x128xf32>
    %311 = arith.addf %285, %310 : vector<16x128xf32>
    %c1_122 = arith.constant 1 : index
    %c0_123 = arith.constant 0 : index
    %c0_124 = arith.constant 0 : index
    %312 = vector.load %arg6[%c1_122, %c0_123, %c0_124] : memref<2x1x128xf32, #tpu.memory_space<vmem>>, vector<1x1x128xf32>
    %313 = vector.shape_cast %312 : vector<1x1x128xf32> to vector<1x128xf32>
    %314 = vector.broadcast %313 : vector<1x128xf32> to vector<16x128xf32>
    %315 = arith.addf %311, %314 : vector<16x128xf32>
    %316 = arith.addf %197, %315 : vector<16x128xf32>
    %cst_125 = arith.constant dense<0.000000e+00> : vector<16xf32>
    %317 = vector.multi_reduction <add>, %316, %cst_125 [1] : vector<16x128xf32> to vector<16xf32>
    %318 = vector.shape_cast %317 : vector<16xf32> to vector<16x1xf32>
    %cst_126 = arith.constant 1.280000e+02 : f32
    %319 = vector.broadcast %cst_126 : f32 to vector<16x1xf32>
    %320 = arith.divf %318, %319 : vector<16x1xf32>
    %321 = vector.broadcast %320 : vector<16x1xf32> to vector<16x128xf32>
    %322 = arith.subf %316, %321 : vector<16x128xf32>
    %323 = arith.mulf %322, %322 : vector<16x128xf32>
    %cst_127 = arith.constant dense<0.000000e+00> : vector<16xf32>
    %324 = vector.multi_reduction <add>, %323, %cst_127 [1] : vector<16x128xf32> to vector<16xf32>
    %325 = vector.shape_cast %324 : vector<16xf32> to vector<16x1xf32>
    %cst_128 = arith.constant 1.280000e+02 : f32
    %326 = vector.broadcast %cst_128 : f32 to vector<16x1xf32>
    %327 = arith.divf %325, %326 : vector<16x1xf32>
    %328 = vector.broadcast %320 : vector<16x1xf32> to vector<16x128xf32>
    %329 = arith.subf %316, %328 : vector<16x128xf32>
    %cst_129 = arith.constant 9.99999974E-6 : f32
    %330 = vector.broadcast %cst_129 : f32 to vector<16x1xf32>
    %331 = arith.addf %327, %330 : vector<16x1xf32>
    %332 = math.rsqrt %331 : vector<16x1xf32>
    %333 = vector.broadcast %332 : vector<16x1xf32> to vector<16x128xf32>
    %334 = arith.mulf %329, %333 : vector<16x128xf32>
    %c1_130 = arith.constant 1 : index
    %c0_131 = arith.constant 0 : index
    %c0_132 = arith.constant 0 : index
    %335 = vector.load %arg7[%c1_130, %c0_131, %c0_132] : memref<2x1x128xf32, #tpu.memory_space<vmem>>, vector<1x1x128xf32>
    %336 = vector.shape_cast %335 : vector<1x1x128xf32> to vector<1x128xf32>
    %337 = vector.broadcast %336 : vector<1x128xf32> to vector<16x128xf32>
    %338 = arith.mulf %334, %337 : vector<16x128xf32>
    %c1_133 = arith.constant 1 : index
    %c0_134 = arith.constant 0 : index
    %c0_135 = arith.constant 0 : index
    %339 = vector.load %arg8[%c1_133, %c0_134, %c0_135] : memref<2x1x128xf32, #tpu.memory_space<vmem>>, vector<1x1x128xf32>
    %340 = vector.shape_cast %339 : vector<1x1x128xf32> to vector<1x128xf32>
    %341 = vector.broadcast %340 : vector<1x128xf32> to vector<16x128xf32>
    %342 = arith.addf %338, %341 : vector<16x128xf32>
    %343 = arith.truncf %342 : vector<16x128xf32> to vector<16x128xbf16>
    %c1_136 = arith.constant 1 : index
    %c0_137 = arith.constant 0 : index
    %c0_138 = arith.constant 0 : index
    %344 = vector.load %arg9[%c1_136, %c0_137, %c0_138] : memref<2x128x256xbf16, #tpu.memory_space<vmem>>, vector<1x128x256xbf16>
    %345 = vector.shape_cast %344 : vector<1x128x256xbf16> to vector<128x256xbf16>
    %cst_139 = arith.constant dense<0.000000e+00> : vector<16x256xf32>
    %346 = tpu.matmul %343, %345, %cst_139 {dimension_numbers = #tpu.dot_dimension_numbers<[1], [0], [0], [1], [0, 0, 1, 1], [], []>} : vector<16x128xbf16>, vector<128x256xbf16>, vector<16x256xf32> -> vector<16x256xf32>
    %c1_140 = arith.constant 1 : index
    %c0_141 = arith.constant 0 : index
    %c0_142 = arith.constant 0 : index
    %347 = vector.load %arg10[%c1_140, %c0_141, %c0_142] : memref<2x1x256xf32, #tpu.memory_space<vmem>>, vector<1x1x256xf32>
    %348 = vector.shape_cast %347 : vector<1x1x256xf32> to vector<1x256xf32>
    %349 = vector.broadcast %348 : vector<1x256xf32> to vector<16x256xf32>
    %350 = arith.addf %346, %349 : vector<16x256xf32>
    %cst_143 = arith.constant 0.000000e+00 : f32
    %351 = vector.broadcast %cst_143 : f32 to vector<16x256xf32>
    %352 = arith.maximumf %350, %351 : vector<16x256xf32>
    %353 = arith.truncf %352 : vector<16x256xf32> to vector<16x256xbf16>
    %c1_144 = arith.constant 1 : index
    %c0_145 = arith.constant 0 : index
    %c0_146 = arith.constant 0 : index
    %354 = vector.load %arg11[%c1_144, %c0_145, %c0_146] : memref<2x256x128xbf16, #tpu.memory_space<vmem>>, vector<1x256x128xbf16>
    %355 = vector.shape_cast %354 : vector<1x256x128xbf16> to vector<256x128xbf16>
    %cst_147 = arith.constant dense<0.000000e+00> : vector<16x128xf32>
    %356 = tpu.matmul %353, %355, %cst_147 {dimension_numbers = #tpu.dot_dimension_numbers<[1], [0], [0], [1], [0, 0, 1, 1], [], []>} : vector<16x256xbf16>, vector<256x128xbf16>, vector<16x128xf32> -> vector<16x128xf32>
    %c1_148 = arith.constant 1 : index
    %c0_149 = arith.constant 0 : index
    %c0_150 = arith.constant 0 : index
    %357 = vector.load %arg12[%c1_148, %c0_149, %c0_150] : memref<2x1x128xf32, #tpu.memory_space<vmem>>, vector<1x1x128xf32>
    %358 = vector.shape_cast %357 : vector<1x1x128xf32> to vector<1x128xf32>
    %359 = vector.broadcast %358 : vector<1x128xf32> to vector<16x128xf32>
    %360 = arith.addf %356, %359 : vector<16x128xf32>
    %361 = arith.addf %342, %360 : vector<16x128xf32>
    %cst_151 = arith.constant dense<0.000000e+00> : vector<16xf32>
    %362 = vector.multi_reduction <add>, %361, %cst_151 [1] : vector<16x128xf32> to vector<16xf32>
    %363 = vector.shape_cast %362 : vector<16xf32> to vector<16x1xf32>
    %cst_152 = arith.constant 1.280000e+02 : f32
    %364 = vector.broadcast %cst_152 : f32 to vector<16x1xf32>
    %365 = arith.divf %363, %364 : vector<16x1xf32>
    %366 = vector.broadcast %365 : vector<16x1xf32> to vector<16x128xf32>
    %367 = arith.subf %361, %366 : vector<16x128xf32>
    %368 = arith.mulf %367, %367 : vector<16x128xf32>
    %cst_153 = arith.constant dense<0.000000e+00> : vector<16xf32>
    %369 = vector.multi_reduction <add>, %368, %cst_153 [1] : vector<16x128xf32> to vector<16xf32>
    %370 = vector.shape_cast %369 : vector<16xf32> to vector<16x1xf32>
    %cst_154 = arith.constant 1.280000e+02 : f32
    %371 = vector.broadcast %cst_154 : f32 to vector<16x1xf32>
    %372 = arith.divf %370, %371 : vector<16x1xf32>
    %373 = vector.broadcast %365 : vector<16x1xf32> to vector<16x128xf32>
    %374 = arith.subf %361, %373 : vector<16x128xf32>
    %cst_155 = arith.constant 9.99999974E-6 : f32
    %375 = vector.broadcast %cst_155 : f32 to vector<16x1xf32>
    %376 = arith.addf %372, %375 : vector<16x1xf32>
    %377 = math.rsqrt %376 : vector<16x1xf32>
    %378 = vector.broadcast %377 : vector<16x1xf32> to vector<16x128xf32>
    %379 = arith.mulf %374, %378 : vector<16x128xf32>
    %c1_156 = arith.constant 1 : index
    %c0_157 = arith.constant 0 : index
    %c0_158 = arith.constant 0 : index
    %380 = vector.load %arg13[%c1_156, %c0_157, %c0_158] : memref<2x1x128xf32, #tpu.memory_space<vmem>>, vector<1x1x128xf32>
    %381 = vector.shape_cast %380 : vector<1x1x128xf32> to vector<1x128xf32>
    %382 = vector.broadcast %381 : vector<1x128xf32> to vector<16x128xf32>
    %383 = arith.mulf %379, %382 : vector<16x128xf32>
    %c1_159 = arith.constant 1 : index
    %c0_160 = arith.constant 0 : index
    %c0_161 = arith.constant 0 : index
    %384 = vector.load %arg14[%c1_159, %c0_160, %c0_161] : memref<2x1x128xf32, #tpu.memory_space<vmem>>, vector<1x1x128xf32>
    %385 = vector.shape_cast %384 : vector<1x1x128xf32> to vector<1x128xf32>
    %386 = vector.broadcast %385 : vector<1x128xf32> to vector<16x128xf32>
    %387 = arith.addf %383, %386 : vector<16x128xf32>
    %388 = vector.shape_cast %387 : vector<16x128xf32> to vector<1x16x128xf32>
    %cst_162 = arith.constant dense<0.000000e+00> : vector<1x128xf32>
    %389 = vector.multi_reduction <add>, %388, %cst_162 [1] : vector<1x16x128xf32> to vector<1x128xf32>
    %cst_163 = arith.constant 1.600000e+01 : f32
    %390 = vector.broadcast %cst_163 : f32 to vector<1x128xf32>
    %391 = arith.divf %389, %390 : vector<1x128xf32>
    %392 = arith.truncf %391 : vector<1x128xf32> to vector<1x128xbf16>
    %c0_164 = arith.constant 0 : index
    %c0_165 = arith.constant 0 : index
    %393 = vector.load %arg15[%c0_164, %c0_165] : memref<128x128xbf16, #tpu.memory_space<vmem>>, vector<128x128xbf16>
    %cst_166 = arith.constant dense<0.000000e+00> : vector<1x128xf32>
    %394 = tpu.matmul %392, %393, %cst_166 {dimension_numbers = #tpu.dot_dimension_numbers<[1], [0], [0], [1], [0, 0, 1, 1], [], []>} : vector<1x128xbf16>, vector<128x128xbf16>, vector<1x128xf32> -> vector<1x128xf32>
    %c0_167 = arith.constant 0 : index
    %c0_168 = arith.constant 0 : index
    %395 = vector.load %arg16[%c0_167, %c0_168] : memref<1x128xf32, #tpu.memory_space<vmem>>, vector<1x128xf32>
    %396 = arith.addf %394, %395 : vector<1x128xf32>
    %cst_169 = arith.constant 0.000000e+00 : f32
    %397 = vector.broadcast %cst_169 : f32 to vector<1x128xf32>
    %398 = arith.maximumf %396, %397 : vector<1x128xf32>
    %399 = arith.truncf %398 : vector<1x128xf32> to vector<1x128xbf16>
    %c0_170 = arith.constant 0 : index
    %c0_171 = arith.constant 0 : index
    %400 = vector.load %arg17[%c0_170, %c0_171] : memref<128x128xbf16, #tpu.memory_space<vmem>>, vector<128x128xbf16>
    %cst_172 = arith.constant dense<0.000000e+00> : vector<1x128xf32>
    %401 = tpu.matmul %399, %400, %cst_172 {dimension_numbers = #tpu.dot_dimension_numbers<[1], [0], [0], [1], [0, 0, 1, 1], [], []>} : vector<1x128xbf16>, vector<128x128xbf16>, vector<1x128xf32> -> vector<1x128xf32>
    %c0_173 = arith.constant 0 : index
    %c0_174 = arith.constant 0 : index
    %402 = vector.load %arg18[%c0_173, %c0_174] : memref<1x128xf32, #tpu.memory_space<vmem>>, vector<1x128xf32>
    %403 = arith.addf %401, %402 : vector<1x128xf32>
    %404 = vector.shape_cast %403 : vector<1x128xf32> to vector<1x1x128xf32>
    %c0_175 = arith.constant 0 : index
    %c0_176 = arith.constant 0 : index
    %c0_177 = arith.constant 0 : index
    %405 = vector.load %arg19[%c0_175, %c0_176, %c0_177] : memref<1x1x128xf32, #tpu.memory_space<vmem>>, vector<1x1x128xf32>
    tpu.vector_store %arg19[%c0_175, %c0_176, %c0_177], %404 {strides = array<i32>} : memref<1x1x128xf32, #tpu.memory_space<vmem>>, vector<1x1x128xf32>,
    return
  }
  func.func @transform_0(%arg0: i32) -> (i32, i32, i32) {
    %c0_i32 = arith.constant 0 : i32
    %c0_i32_0 = arith.constant 0 : i32
    %c0_i32_1 = arith.constant 0 : i32
    return %arg0, %c0_i32, %c0_i32_0 : i32, i32, i32
  }
  func.func @transform_1(%arg0: i32) -> (i32, i32, i32) {
    %c0_i32 = arith.constant 0 : i32
    %c0_i32_0 = arith.constant 0 : i32
    %c0_i32_1 = arith.constant 0 : i32
    return %arg0, %c0_i32, %c0_i32_0 : i32, i32, i32
  }
  func.func @transform_2(%arg0: i32) -> (i32, i32, i32) {
    %c0_i32 = arith.constant 0 : i32
    %c0_i32_0 = arith.constant 0 : i32
    %c0_i32_1 = arith.constant 0 : i32
    %c0_i32_2 = arith.constant 0 : i32
    return %c0_i32, %c0_i32_0, %c0_i32_1 : i32, i32, i32
  }
  func.func @transform_3(%arg0: i32) -> (i32, i32, i32) {
    %c0_i32 = arith.constant 0 : i32
    %c0_i32_0 = arith.constant 0 : i32
    %c0_i32_1 = arith.constant 0 : i32
    %c0_i32_2 = arith.constant 0 : i32
    return %c0_i32, %c0_i32_0, %c0_i32_1 : i32, i32, i32
  }
  func.func @transform_4(%arg0: i32) -> (i32, i32, i32) {
    %c0_i32 = arith.constant 0 : i32
    %c0_i32_0 = arith.constant 0 : i32
    %c0_i32_1 = arith.constant 0 : i32
    %c0_i32_2 = arith.constant 0 : i32
    return %c0_i32, %c0_i32_0, %c0_i32_1 : i32, i32, i32
  }
  func.func @transform_5(%arg0: i32) -> (i32, i32, i32) {
    %c0_i32 = arith.constant 0 : i32
    %c0_i32_0 = arith.constant 0 : i32
    %c0_i32_1 = arith.constant 0 : i32
    %c0_i32_2 = arith.constant 0 : i32
    return %c0_i32, %c0_i32_0, %c0_i32_1 : i32, i32, i32
  }
  func.func @transform_6(%arg0: i32) -> (i32, i32, i32) {
    %c0_i32 = arith.constant 0 : i32
    %c0_i32_0 = arith.constant 0 : i32
    %c0_i32_1 = arith.constant 0 : i32
    %c0_i32_2 = arith.constant 0 : i32
    return %c0_i32, %c0_i32_0, %c0_i32_1 : i32, i32, i32
  }
  func.func @transform_7(%arg0: i32) -> (i32, i32, i32) {
    %c0_i32 = arith.constant 0 : i32
    %c0_i32_0 = arith.constant 0 : i32
    %c0_i32_1 = arith.constant 0 : i32
    %c0_i32_2 = arith.constant 0 : i32
    return %c0_i32, %c0_i32_0, %c0_i32_1 : i32, i32, i32
  }
  func.func @transform_8(%arg0: i32) -> (i32, i32, i32) {
    %c0_i32 = arith.constant 0 : i32
    %c0_i32_0 = arith.constant 0 : i32
    %c0_i32_1 = arith.constant 0 : i32
    %c0_i32_2 = arith.constant 0 : i32
    return %c0_i32, %c0_i32_0, %c0_i32_1 : i32, i32, i32
  }
  func.func @transform_9(%arg0: i32) -> (i32, i32, i32) {
    %c0_i32 = arith.constant 0 : i32
    %c0_i32_0 = arith.constant 0 : i32
    %c0_i32_1 = arith.constant 0 : i32
    %c0_i32_2 = arith.constant 0 : i32
    return %c0_i32, %c0_i32_0, %c0_i32_1 : i32, i32, i32
  }
  func.func @transform_10(%arg0: i32) -> (i32, i32, i32) {
    %c0_i32 = arith.constant 0 : i32
    %c0_i32_0 = arith.constant 0 : i32
    %c0_i32_1 = arith.constant 0 : i32
    %c0_i32_2 = arith.constant 0 : i32
    return %c0_i32, %c0_i32_0, %c0_i32_1 : i32, i32, i32
  }
  func.func @transform_11(%arg0: i32) -> (i32, i32, i32) {
    %c0_i32 = arith.constant 0 : i32
    %c0_i32_0 = arith.constant 0 : i32
    %c0_i32_1 = arith.constant 0 : i32
    %c0_i32_2 = arith.constant 0 : i32
    return %c0_i32, %c0_i32_0, %c0_i32_1 : i32, i32, i32
  }
  func.func @transform_12(%arg0: i32) -> (i32, i32, i32) {
    %c0_i32 = arith.constant 0 : i32
    %c0_i32_0 = arith.constant 0 : i32
    %c0_i32_1 = arith.constant 0 : i32
    %c0_i32_2 = arith.constant 0 : i32
    return %c0_i32, %c0_i32_0, %c0_i32_1 : i32, i32, i32
  }
  func.func @transform_13(%arg0: i32) -> (i32, i32, i32) {
    %c0_i32 = arith.constant 0 : i32
    %c0_i32_0 = arith.constant 0 : i32
    %c0_i32_1 = arith.constant 0 : i32
    %c0_i32_2 = arith.constant 0 : i32
    return %c0_i32, %c0_i32_0, %c0_i32_1 : i32, i32, i32
  }
  func.func @transform_14(%arg0: i32) -> (i32, i32) {
    %c0_i32 = arith.constant 0 : i32
    %c0_i32_0 = arith.constant 0 : i32
    %c0_i32_1 = arith.constant 0 : i32
    return %c0_i32, %c0_i32_0 : i32, i32
  }
  func.func @transform_15(%arg0: i32) -> (i32, i32) {
    %c0_i32 = arith.constant 0 : i32
    %c0_i32_0 = arith.constant 0 : i32
    %c0_i32_1 = arith.constant 0 : i32
    return %c0_i32, %c0_i32_0 : i32, i32
  }
  func.func @transform_16(%arg0: i32) -> (i32, i32) {
    %c0_i32 = arith.constant 0 : i32
    %c0_i32_0 = arith.constant 0 : i32
    %c0_i32_1 = arith.constant 0 : i32
    return %c0_i32, %c0_i32_0 : i32, i32
  }
  func.func @transform_17(%arg0: i32) -> (i32, i32) {
    %c0_i32 = arith.constant 0 : i32
    %c0_i32_0 = arith.constant 0 : i32
    %c0_i32_1 = arith.constant 0 : i32
    return %c0_i32, %c0_i32_0 : i32, i32
  }
  func.func @transform_18(%arg0: i32) -> (i32, i32, i32) {
    %c0_i32 = arith.constant 0 : i32
    %c0_i32_0 = arith.constant 0 : i32
    %c0_i32_1 = arith.constant 0 : i32
    return %arg0, %c0_i32, %c0_i32_0 : i32, i32, i32
  }
}

</mosaic_0001>

<bundles_post_ra>
// kernel: classifier_forward.1
= control target key start
LH: loop header
LB: loop body
LE: loop exit
PB: predicated region body
PF: predicated region fallthrough
CT: control target
= control target key end

     0   :  { %s8880_s0 = inlined_call_operand.vmem [shape: f32[2,16,128], index: 0, kind: input, shape index: {}]   ;;  %s8881_s1 = inlined_call_operand.hbm [shape: s32[2,1,16], index: 1, kind: input, shape index: {}]   ;;  %s8882_s2 = inlined_call_operand.hbm [shape: bf16[2,128,1536], index: 2, kind: input, shape index: {}]   ;;  %s8883_s3 = inlined_call_operand.hbm [shape: f32[2,1,1536], index: 3, kind: input, shape index: {}]   ;;  %s8884_s4 = inlined_call_operand.hbm [shape: bf16[2,512,128], index: 4, kind: input, shape index: {}]   ;;  %s8885_s5 = inlined_call_operand.hbm [shape: f32[2,1,128], index: 5, kind: input, shape index: {}]   ;;  %s8886_s6 = inlined_call_operand.hbm [shape: f32[2,1,128], index: 6, kind: input, shape index: {}]   ;;  %s8887_s7 = inlined_call_operand.hbm [shape: f32[2,1,128], index: 7, kind: input, shape index: {}]   ;;  %s8888_s8 = inlined_call_operand.hbm [shape: bf16[2,128,256], index: 8, kind: input, shape index: {}]   ;;  %s8889_s9 = inlined_call_operand.hbm [shape: f32[2,1,256], index: 9, kind: input, shape index: {}]   ;;  %s8890_s10 = inlined_call_operand.hbm [shape: bf16[2,256,128], index: 10, kind: input, shape index: {}]   ;;  %s8891_s11 = inlined_call_operand.hbm [shape: f32[2,1,128], index: 11, kind: input, shape index: {}]   ;;  %s8892_s12 = inlined_call_operand.hbm [shape: f32[2,1,128], index: 12, kind: input, shape index: {}]   ;;  %s8893_s13 = inlined_call_operand.hbm [shape: f32[2,1,128], index: 13, kind: input, shape index: {}]   ;;  %s8894_s14 = inlined_call_operand.hbm [shape: bf16[128,128], index: 14, kind: input, shape index: {}]   ;;  %s8895_s15 = inlined_call_operand.hbm [shape: f32[1,128], index: 15, kind: input, shape index: {}]   ;;  %s8896_s16 = inlined_call_operand.hbm [shape: bf16[128,128], index: 16, kind: input, shape index: {}]   ;;  %s8897_s17 = inlined_call_operand.hbm [shape: f32[1,128], index: 17, kind: input, shape index: {}]   ;;  %s8898_s18 = inlined_call_operand.hbm [shape: f32[2,1,128], index: 18, kind: output, shape index: {}]  }
   0x1   :  { %8917 = sst [smem:[#allocation43_spill]] %s8880_s0 }
   0x2   :  { %8918 = sst [smem:[#allocation44_spill]] %s8881_s1 }
   0x3   :  { %8919 = sst [smem:[#allocation45_spill]] %s8882_s2 }
   0x4   :  { %8920 = sst [smem:[#allocation46_spill]] %s8883_s3 }
   0x5   :  { %8921 = sst [smem:[#allocation47_spill]] %s8884_s4 }
   0x6   :  { %8922 = sst [smem:[#allocation48_spill]] %s8885_s5 }
   0x7   :  { %8923 = sst [smem:[#allocation49_spill]] %s8886_s6 }
   0x8   :  { %8924 = sst [smem:[#allocation50_spill]] %s8887_s7 }
   0x9   :  { %8925 = sst [smem:[#allocation51_spill]] %s8888_s8 }
   0xa   :  { %8926 = sst [smem:[#allocation52_spill]] %s8889_s9 }
   0xb   :  { %8927 = sst [smem:[#allocation53_spill]] %s8898_s18 }
   0xc   :  { %23 = vsyncpa [#allocation3], 0 }
   0xd   :  { %25 = vsyncpa [#allocation3 + $0x1], 0 }
   0xe   :  { %26 = vsyncpa [#allocation6], 0 }
   0xf   :  { %27 = vsyncpa [#allocation9], 0 }
  0x10   :  { %28 = vsyncpa [#allocation12], 0 }
  0x11   :  { %29 = vsyncpa [#allocation15], 0 }
  0x12   :  { %30 = vsyncpa [#allocation18], 0 }
  0x13   :  { %31 = vsyncpa [#allocation21], 0 }
  0x14   :  { %32 = vsyncpa [#allocation24], 0 }
  0x15   :  { %33 = vsyncpa [#allocation27], 0 }
  0x16   :  { %34 = vsyncpa [#allocation4], 0 }
  0x17   :  { %36 = vsyncpa [#allocation4 + $0x1], 0  ;;  %s8005_s27 = smov 0   ;;  %s8007_s28 = smov 0  }
  0x18   :  { %s8009_s29 = smov 0   ;;  %s8011_s30 = smov 0  }
  0x19 LB: > { %8928 = sst [smem:[#allocation40_spill]] %s7862_s27  ;;  %s7876_s0 = smov [#allocation5]   ;;  %s7874_s30 = sphi %s8011_s30, %s8983_s30   ;;  %s7870_s29 = sphi %s8009_s29, %s8982_s29   ;;  %s7866_s28 = sphi %s8007_s28, %s8981_s28   ;;  %s7862_s27 = sphi %s8005_s27, %s8980_s27  }
  0x1a   : > { %s473_s19 = sshll.u32 %s7876_s0, 4  ;;  %s8026_s1 = sadd.s32 4294967295, %s7874_s30   ;;  %s474_s19 = int_to_ptr.vmem [resolvable:$true] %s473_s19 }
  0x1b   : > { %8929 = sst [smem:[#allocation41_spill]] %s8026_s1  ;;  %p5721_p0 = scmp.ge.s32.totalorder %s7874_s30, 1 }
  0x1c   : > { %p8902_p1 = scmp.eq.s32.totalorder %s8026_s1, 0  ;;  %p461_p2 = scmp.lt.s32.totalorder %s7874_s30, 3 }
  0x1d   : > { %s7877_s21 = smov [#allocation8]   ;;  %s7345_s24 = scalar_lea.vmem %s474_s19, 24576 }
  0x1e   : > { %p8031_p3 = pnand %p5721_p0, %p461_p2  ;;  %s499_s22 = sshll.u32 %s7877_s21, 4  ;;  %s500_s22 = int_to_ptr.vmem [resolvable:$true] %s499_s22 }
  0x1f   : > { %p7346_p8 = scmp.ne.s32.totalorder %s474_s19, %s7345_s24  ;;  %p7353_p11 = scmp.lt.s32.totalorder %s474_s19, %s474_s19 }
  0x20   : > { %s8930_s20 = scalar_select %p8031_p3, 1, 0 }
  0x21   : > { %p6649_p5 = pneg %p8031_p3  ;;  %p7354_p12 = scmp.lt.s32.totalorder %s7345_s24, %s7345_s24 }
  0x22   : > { %8931 = sst [smem:[#allocation42_spill]] %s8930_s20 }
  0x23   : > { %p8040_p6 = pnand %p6649_p5, %p8902_p1  ;;  %p7355_p13 = por %p7354_p12, %p7353_p11 }
  0x25   : > { %p8046_p7 = pneg %p8040_p6 }
  0x27   : > { %p7348_p9 = pnand %p7346_p8, %p8046_p7 }
  0x29   : > { %p7349_p10 = pneg %p7348_p9 }
  0x2b   : > { %p7356_p0 = pnand %p7355_p13, %p7349_p10 }
  0x2d   : > { %7359 = shalt.err (!%p7356_p0)
}
  0x2e   : > { %s7878_s25 = smov 768   ;;  %s7879_s26 = smov 48  }
  0x2f   : > { %s8934_s18 = sld [smem:[#allocation45_spill]]  ;;  %s7371_s20 = scalar_lea.vmem %s500_s22, 8192 }
  0x30   : > { %p7372_p2 = scmp.ne.s32.totalorder %s500_s22, %s7371_s20  ;;  %p7379_p9 = scmp.lt.s32.totalorder %s500_s22, %s500_s22 }
  0x31   : > { %p7380_p4 = scmp.lt.s32.totalorder %s7371_s20, %s7371_s20 }
  0x32   : > { %p7374_p5 = pnand %p7372_p2, %p8046_p7 }
  0x33   : > { %p7381_p1 = por %p7380_p4, %p7379_p9 }
  0x34   : > { %p7375_p8 = pneg %p7374_p5 }
  0x35   : > { %6652 = dma.hbm_to_vmem [thread:$0]  (!%p8040_p6), %s8934_s18, 24576, %s474_s19, [#allocation6], %s7878_s25, %s7878_s25, %s7879_s26  }
  0x36   : > { %p7382_p11 = pnand %p7381_p1, %p7375_p8 }
  0x38   : > { %7385 = shalt.err (!%p7382_p11)
}
  0x39   : > { %s8906_s24 = smov 64   ;;  %s8908_s1 = smov 4  }
  0x3a   : > { %s8935_s4 = sld [smem:[#allocation47_spill]]  ;;  %s7882_s19 = smov [#allocation11]  }
  0x3b   : > { %s525_s25 = sshll.u32 %s7882_s19, 4  ;;  %s7883_s26 = smov [#allocation14]   ;;  %s526_s25 = int_to_ptr.vmem [resolvable:$true] %s525_s25 }
  0x3c   : > { %s551_s21 = sshll.u32 %s7883_s26, 4  ;;  %s7397_s20 = scalar_lea.vmem %s526_s25, 32  ;;  %s552_s21 = int_to_ptr.vmem [resolvable:$true] %s551_s21 }
  0x3d   : > { %p7398_p1 = scmp.ne.s32.totalorder %s526_s25, %s7397_s20  ;;  %p7405_p12 = scmp.lt.s32.totalorder %s526_s25, %s526_s25 }
  0x3e   : > { %p7406_p13 = scmp.lt.s32.totalorder %s7397_s20, %s7397_s20 }
  0x3f   : > { %p7400_p4 = pnand %p7398_p1, %p8046_p7 }
  0x40   : > { %6658 = dma.hbm_to_vmem [thread:$0]  (!%p8040_p6), %s8935_s4, 8192, %s500_s22, [#allocation9], %s8906_s24, %s8906_s24, %s8908_s1  }
  0x41   : > { %p7401_p10 = pneg %p7400_p4  ;;  %p7407_p0 = por %p7406_p13, %p7405_p12 }
  0x43   : > { %p7408_p2 = pnand %p7407_p0, %p7401_p10 }
  0x45   : > { %7411 = shalt.err (!%p7408_p2)
}
  0x46   : > { %s8910_s27 = smov 16   ;;  %s8912_s22 = smov 1  }
  0x47   : > { %s8936_s6 = sld [smem:[#allocation49_spill]]  ;;  %s7423_s19 = scalar_lea.vmem %s552_s21, 4096 }
  0x48   : > { %p7424_p5 = scmp.ne.s32.totalorder %s552_s21, %s7423_s19  ;;  %p7431_p11 = scmp.lt.s32.totalorder %s552_s21, %s552_s21 }
  0x49   : > { %p7432_p1 = scmp.lt.s32.totalorder %s7423_s19, %s7423_s19 }
  0x4a   : > { %p7426_p8 = pnand %p7424_p5, %p8046_p7 }
  0x4b   : > { %p7433_p4 = por %p7432_p1, %p7431_p11 }
  0x4c   : > { %p7427_p9 = pneg %p7426_p8 }
  0x4d   : > { %6664 = dma.hbm_to_vmem [thread:$0]  (!%p8040_p6), %s8936_s6, 32, %s526_s25, [#allocation12], %s8910_s27, %s8910_s27, %s8912_s22  }
  0x4e   : > { %p7434_p10 = pnand %p7433_p4, %p7427_p9 }
  0x50   : > { %7437 = shalt.err (!%p7434_p10)
}
  0x51   : > { %s7886_s26 = smov 128   ;;  %s7887_s20 = smov 8  }
  0x52   : > { %s8937_s8 = sld [smem:[#allocation51_spill]]  ;;  %s7888_s25 = smov [#allocation17]  }
  0x53   : > { %s577_s0 = sshll.u32 %s7888_s25, 4  ;;  %s7889_s18 = smov [#allocation20]   ;;  %s578_s0 = int_to_ptr.vmem [resolvable:$true] %s577_s0 }
  0x54   : > { %s603_s27 = sshll.u32 %s7889_s18, 4  ;;  %s7449_s22 = scalar_lea.vmem %s578_s0, 4096  ;;  %s604_s27 = int_to_ptr.vmem [resolvable:$true] %s603_s27 }
  0x55   : > { %p7450_p12 = scmp.ne.s32.totalorder %s578_s0, %s7449_s22  ;;  %p7457_p2 = scmp.lt.s32.totalorder %s578_s0, %s578_s0 }
  0x56   : > { %p7458_p5 = scmp.lt.s32.totalorder %s7449_s22, %s7449_s22 }
  0x57   : > { %p7452_p13 = pnand %p7450_p12, %p8046_p7 }
  0x58   : > { %6670 = dma.hbm_to_vmem [thread:$0]  (!%p8040_p6), %s8937_s8, 4096, %s552_s21, [#allocation15], %s7886_s26, %s7886_s26, %s7887_s20  }
  0x59   : > { %p7453_p0 = pneg %p7452_p13  ;;  %p7459_p8 = por %p7458_p5, %p7457_p2 }
  0x5b   : > { %p7460_p9 = pnand %p7459_p8, %p7453_p0 }
  0x5d   : > { %7463 = shalt.err (!%p7460_p9)
}
  0x5e   : > { %s8938_s1 = smov 4   ;;  %s8939_s24 = smov 64  }
  0x5f   : > { %6676 = dma.hbm_to_vmem [thread:$0]  (!%p8040_p6), %s8890_s10, 4096, %s578_s0, [#allocation18], %s8939_s24, %s8939_s24, %s8938_s1  }
  0x60   : > { %s7475_s26 = scalar_lea.vmem %s604_s27, 32  ;;  %p7483_p10 = scmp.lt.s32.totalorder %s604_s27, %s604_s27 }
  0x61   : > { %p7476_p11 = scmp.ne.s32.totalorder %s604_s27, %s7475_s26  ;;  %p7484_p12 = scmp.lt.s32.totalorder %s7475_s26, %s7475_s26 }
  0x63   : > { %p7478_p1 = pnand %p7476_p11, %p8046_p7  ;;  %p7485_p13 = por %p7484_p12, %p7483_p10 }
  0x65   : > { %p7479_p4 = pneg %p7478_p1 }
  0x67   : > { %p7486_p0 = pnand %p7485_p13, %p7479_p4 }
  0x69   : > { %7489 = shalt.err (!%p7486_p0)
}
  0x6a   : > { %s8940_s22 = smov 1   ;;  %s8941_s20 = smov 16  }
  0x6b   : > { %6682 = dma.hbm_to_vmem [thread:$0]  (!%p8040_p6), %s8892_s12, 32, %s604_s27, [#allocation21], %s8941_s20, %s8941_s20, %s8940_s22  }
  0x6c   : > { %s7890_s0 = smov [#allocation23]   ;;  %s7891_s19 = smov [#allocation26]  }
  0x6d   : > { %s629_s21 = sshll.u32 %s7890_s0, 4  ;;  %s653_s4 = sshll.u32 %s7891_s19, 4  ;;  %s630_s21 = int_to_ptr.vmem [resolvable:$true] %s629_s21  ;;  %s654_s4 = int_to_ptr.vmem [resolvable:$true] %s653_s4 }
  0x6e   : > { %s7501_s26 = scalar_lea.vmem %s630_s21, 1024  ;;  %p7509_p9 = scmp.lt.s32.totalorder %s630_s21, %s630_s21 }
  0x6f   : > { %p7502_p2 = scmp.ne.s32.totalorder %s630_s21, %s7501_s26  ;;  %p7510_p11 = scmp.lt.s32.totalorder %s7501_s26, %s7501_s26 }
  0x71   : > { %p7504_p5 = pnand %p7502_p2, %p8046_p7  ;;  %p7511_p1 = por %p7510_p11, %p7509_p9 }
  0x73   : > { %p7505_p8 = pneg %p7504_p5 }
  0x75   : > { %p7512_p4 = pnand %p7511_p1, %p7505_p8 }
  0x77   : > { %7515 = shalt.err (!%p7512_p4)
}
  0x78   : > { %6688 = dma.hbm_to_vmem [thread:$0]  (!%p8040_p6), %s8894_s14, 1024, %s630_s21, [#allocation24], %s8939_s24, %s8939_s24, %s8938_s1  }
  0x79   : > { %s7527_s18 = scalar_lea.vmem %s654_s4, 1024  ;;  %p7535_p0 = scmp.lt.s32.totalorder %s654_s4, %s654_s4 }
  0x7a   : > { %p7528_p10 = scmp.ne.s32.totalorder %s654_s4, %s7527_s18  ;;  %p7536_p2 = scmp.lt.s32.totalorder %s7527_s18, %s7527_s18 }
  0x7c   : > { %p7530_p12 = pnand %p7528_p10, %p8046_p7  ;;  %p7537_p5 = por %p7536_p2, %p7535_p0 }
  0x7e   : > { %p7531_p13 = pneg %p7530_p12 }
  0x80   : > { %p7538_p8 = pnand %p7537_p5, %p7531_p13 }
  0x82   : > { %7541 = shalt.err (!%p7538_p8)
}
  0x83   : > { %6694 = dma.hbm_to_vmem [thread:$0]  (!%p8040_p6), %s8896_s16, 1024, %s654_s4, [#allocation27], %s8939_s24, %s8939_s24, %s8938_s1  }
  0x84   : > { %s7892_s21 = smov [#allocation7]  }
  0x85   : > { %s486_s26 = sshll.u32 %s7892_s21, 4  ;;  %s487_s26 = int_to_ptr.vmem [resolvable:$true] %s486_s26 }
  0x86   : > { %s7553_s27 = scalar_lea.vmem %s487_s26, 384  ;;  %p7561_p4 = scmp.lt.s32.totalorder %s487_s26, %s487_s26 }
  0x87   : > { %p7554_p9 = scmp.ne.s32.totalorder %s487_s26, %s7553_s27  ;;  %p7562_p10 = scmp.lt.s32.totalorder %s7553_s27, %s7553_s27 }
  0x89   : > { %p7556_p11 = pnand %p7554_p9, %p8046_p7  ;;  %p7563_p12 = por %p7562_p10, %p7561_p4 }
  0x8b   : > { %p7557_p1 = pneg %p7556_p11 }
  0x8d   : > { %p7564_p13 = pnand %p7563_p12, %p7557_p1 }
  0x8f   : > { %7567 = shalt.err (!%p7564_p13)
}
  0x90   : > { %s7893_s25 = smov 192   ;;  %s7894_s18 = smov 12  }
  0x91   : > { %s8942_s3 = sld [smem:[#allocation46_spill]]  ;;  %s7895_s1 = smov [#allocation10]  }
  0x92   : > { %s512_s24 = sshll.u32 %s7895_s1, 4  ;;  %s7896_s19 = smov [#allocation13]   ;;  %s513_s24 = int_to_ptr.vmem [resolvable:$true] %s512_s24 }
  0x93   : > { %s538_s21 = sshll.u32 %s7896_s19, 4  ;;  %s7579_s6 = scalar_lea.vmem %s513_s24, 32  ;;  %s539_s21 = int_to_ptr.vmem [resolvable:$true] %s538_s21 }
  0x94   : > { %p7580_p0 = scmp.ne.s32.totalorder %s513_s24, %s7579_s6  ;;  %p7587_p8 = scmp.lt.s32.totalorder %s513_s24, %s513_s24 }
  0x95   : > { %p7588_p9 = scmp.lt.s32.totalorder %s7579_s6, %s7579_s6 }
  0x96   : > { %p7582_p2 = pnand %p7580_p0, %p8046_p7 }
  0x97   : > { %6655 = dma.hbm_to_vmem [thread:$0]  (!%p8040_p6), %s8942_s3, 384, %s487_s26, [#allocation6], %s7893_s25, %s7893_s25, %s7894_s18  }
  0x98   : > { %p7583_p5 = pneg %p7582_p2  ;;  %p7589_p11 = por %p7588_p9, %p7587_p8 }
  0x9a   : > { %p7590_p1 = pnand %p7589_p11, %p7583_p5 }
  0x9c   : > { %7593 = shalt.err (!%p7590_p1)
}
  0x9d   : > { %s8943_s5 = sld [smem:[#allocation48_spill]]  ;;  %s7605_s25 = scalar_lea.vmem %s539_s21, 32 }
  0x9e   : > { %p7606_p4 = scmp.ne.s32.totalorder %s539_s21, %s7605_s25  ;;  %p7613_p13 = scmp.lt.s32.totalorder %s539_s21, %s539_s21 }
  0x9f   : > { %p7614_p0 = scmp.lt.s32.totalorder %s7605_s25, %s7605_s25 }
  0xa0   : > { %p7608_p10 = pnand %p7606_p4, %p8046_p7 }
  0xa1   : > { %p7615_p2 = por %p7614_p0, %p7613_p13 }
  0xa2   : > { %p7609_p12 = pneg %p7608_p10 }
  0xa3   : > { %6661 = dma.hbm_to_vmem [thread:$0]  (!%p8040_p6), %s8943_s5, 32, %s513_s24, [#allocation9], %s8941_s20, %s8941_s20, %s8940_s22  }
  0xa4   : > { %p7616_p5 = pnand %p7615_p2, %p7609_p12 }
  0xa6   : > { %7619 = shalt.err (!%p7616_p5)
}
  0xa7   : > { %s8944_s7 = sld [smem:[#allocation50_spill]]  ;;  %s7897_s0 = smov [#allocation16]  }
  0xa8   : > { %s564_s4 = sshll.u32 %s7897_s0, 4  ;;  %s565_s4 = int_to_ptr.vmem [resolvable:$true] %s564_s4 }
  0xa9   : > { %s7631_s1 = scalar_lea.vmem %s565_s4, 64  ;;  %p7639_p1 = scmp.lt.s32.totalorder %s565_s4, %s565_s4 }
  0xaa   : > { %p7632_p8 = scmp.ne.s32.totalorder %s565_s4, %s7631_s1  ;;  %p7640_p4 = scmp.lt.s32.totalorder %s7631_s1, %s7631_s1 }
  0xac   : > { %p7634_p9 = pnand %p7632_p8, %p8046_p7  ;;  %p7641_p10 = por %p7640_p4, %p7639_p1 }
  0xad   : > { %6667 = dma.hbm_to_vmem [thread:$0]  (!%p8040_p6), %s8944_s7, 32, %s539_s21, [#allocation12], %s8941_s20, %s8941_s20, %s8940_s22  }
  0xae   : > { %p7635_p11 = pneg %p7634_p9 }
  0xb0   : > { %p7642_p12 = pnand %p7641_p10, %p7635_p11 }
  0xb2   : > { %7645 = shalt.err (!%p7642_p12)
}
  0xb3   : > { %s7898_s24 = smov 32   ;;  %s7899_s19 = smov 2  }
  0xb4   : > { %s8945_s9 = sld [smem:[#allocation52_spill]]  ;;  %s7900_s27 = smov [#allocation19]  }
  0xb5   : > { %s590_s25 = sshll.u32 %s7900_s27, 4  ;;  %s7901_s6 = smov [#allocation22]   ;;  %s591_s25 = int_to_ptr.vmem [resolvable:$true] %s590_s25 }
  0xb6   : > { %s616_s18 = sshll.u32 %s7901_s6, 4  ;;  %s7657_s0 = scalar_lea.vmem %s591_s25, 32  ;;  %s617_s18 = int_to_ptr.vmem [resolvable:$true] %s616_s18 }
  0xb7   : > { %p7658_p13 = scmp.ne.s32.totalorder %s591_s25, %s7657_s0  ;;  %p7665_p5 = scmp.lt.s32.totalorder %s591_s25, %s591_s25 }
  0xb8   : > { %p7666_p8 = scmp.lt.s32.totalorder %s7657_s0, %s7657_s0 }
  0xb9   : > { %p7660_p0 = pnand %p7658_p13, %p8046_p7 }
  0xba   : > { %6673 = dma.hbm_to_vmem [thread:$0]  (!%p8040_p6), %s8945_s9, 64, %s565_s4, [#allocation15], %s7898_s24, %s7898_s24, %s7899_s19  }
  0xbb   : > { %p7661_p2 = pneg %p7660_p0  ;;  %p7667_p9 = por %p7666_p8, %p7665_p5 }
  0xbd   : > { %p7668_p11 = pnand %p7667_p9, %p7661_p2 }
  0xbf   : > { %7671 = shalt.err (!%p7668_p11)
}
  0xc0   : > { %6679 = dma.hbm_to_vmem [thread:$0]  (!%p8040_p6), %s8891_s11, 32, %s591_s25, [#allocation18], %s8941_s20, %s8941_s20, %s8940_s22  }
  0xc1   : > { %s7683_s24 = scalar_lea.vmem %s617_s18, 32  ;;  %p7691_p12 = scmp.lt.s32.totalorder %s617_s18, %s617_s18 }
  0xc2   : > { %p7684_p1 = scmp.ne.s32.totalorder %s617_s18, %s7683_s24  ;;  %p7692_p13 = scmp.lt.s32.totalorder %s7683_s24, %s7683_s24 }
  0xc4   : > { %p7686_p4 = pnand %p7684_p1, %p8046_p7  ;;  %p7693_p0 = por %p7692_p13, %p7691_p12 }
  0xc6   : > { %p7687_p10 = pneg %p7686_p4 }
  0xc8   : > { %p7694_p2 = pnand %p7693_p0, %p7687_p10 }
  0xca   : > { %7697 = shalt.err (!%p7694_p2)
}
  0xcb   : > { %6685 = dma.hbm_to_vmem [thread:$0]  (!%p8040_p6), %s8893_s13, 32, %s617_s18, [#allocation21], %s8941_s20, %s8941_s20, %s8940_s22  }
  0xcc   : > { %s7902_s21 = smov [#allocation25]   ;;  %s7903_s25 = smov [#allocation28]  }
  0xcd   : > { %s643_s27 = sshll.u32 %s7902_s21, 4  ;;  %s667_s6 = sshll.u32 %s7903_s25, 4  ;;  %s644_s27 = int_to_ptr.vmem [resolvable:$true] %s643_s27  ;;  %s668_s6 = int_to_ptr.vmem [resolvable:$true] %s667_s6 }
  0xce   : > { %s7709_s0 = scalar_lea.vmem %s644_s27, 16  ;;  %s7716_s4 = scalar_lea.vmem %s644_s27, 32 }
  0xcf   : > { %p7710_p5 = scmp.ne.s32.totalorder %s644_s27, %s7709_s0  ;;  %p7717_p11 = scmp.lt.s32.totalorder %s644_s27, %s644_s27 }
  0xd0   : > { %p7718_p1 = scmp.lt.s32.totalorder %s7716_s4, %s7709_s0 }
  0xd1   : > { %p7712_p8 = pnand %p7710_p5, %p8046_p7 }
  0xd2   : > { %p7719_p4 = por %p7718_p1, %p7717_p11 }
  0xd3   : > { %p7713_p9 = pneg %p7712_p8 }
  0xd5   : > { %p7720_p10 = pnand %p7719_p4, %p7713_p9 }
  0xd7   : > { %7723 = shalt.err (!%p7720_p10)
}
  0xd8   : > { %6691 = dma.hbm_to_vmem [thread:$0]  (!%p8040_p6), %s8895_s15, 16, %s644_s27, [#allocation24]  }
  0xd9   : > { %s7735_s18 = scalar_lea.vmem %s668_s6, 16  ;;  %s7742_s1 = scalar_lea.vmem %s668_s6, 32 }
  0xda   : > { %p7736_p12 = scmp.ne.s32.totalorder %s668_s6, %s7735_s18  ;;  %p7743_p2 = scmp.lt.s32.totalorder %s668_s6, %s668_s6 }
  0xdb   : > { %p7744_p5 = scmp.lt.s32.totalorder %s7742_s1, %s7735_s18 }
  0xdc   : > { %p7738_p13 = pnand %p7736_p12, %p8046_p7 }
  0xdd   : > { %p7745_p8 = por %p7744_p5, %p7743_p2 }
  0xde   : > { %p7739_p0 = pneg %p7738_p13 }
  0xe0   : > { %p7746_p3 = pnand %p7745_p8, %p7739_p0 }
  0xe2   : > { %7749 = shalt.err (!%p7746_p3)
}
  0xe3   : > { %s8946_s23 = sld [smem:[#allocation40_spill]]  ;;  %s5720_s21 = sadd.s32 4294967294, %s7874_s30  }
  0xe4   : > { %s8947_s26 = sld [smem:[#allocation41_spill]]  ;;  %s8194_s2 = sadd.s32 1, %s7874_s30  }
  0xe5   : > { %6697 = dma.hbm_to_vmem [thread:$0]  (!%p8040_p6), %s8897_s17, 16, %s668_s6, [#allocation27]  }
  0xe6   : > { %s72_s27 = ssub.s32 %s7874_s30, %s8194_s2  ;;  %s75_s25 = sadd.s32 1, %s7870_s29 }
  0xe7   : > { %p73_p3 = scmp.eq.s32.totalorder %s72_s27, 0  ;;  %p82_p7 = scmp.ne.s32.totalorder %s7870_s29, %s7866_s28 }
  0xe8   : > { %p83_p9 = scmp.eq.s32.totalorder %s7874_s30, 0  ;;  %p454_p12 = scmp.eq.s32.totalorder %s5720_s21, 1 }
  0xe9   : > { %p88_p11 = scmp.ne.s32.totalorder %s7866_s28, %s8946_s23  ;;  %p6722_p13 = scmp.lt.s32.totalorder %s7874_s30, 2 }
  0xea   : > { %s8205_s0 = scalar_select %p73_p3, %s7870_s29, %s75_s25  }
  0xeb   : > { %p8207_p1 = por %p83_p9, %p82_p7  ;;  %p8949_p4 = scmp.eq.s32.totalorder %s8947_s26, 0 }
  0xec   : > { %p448_p10 = scmp.eq.s32.totalorder %s8947_s26, 1  ;;  %s686_s22 = sand.u32 1, %s7870_s29  }
  0xed   : > { %p8213_p6 = por %p8949_p4, %p88_p11  ;;  %p8224_p2 = por %p454_p12, %p88_p11 }
  0xee   : > { %p8220_p0 = por %p448_p10, %p82_p7  ;;  %s5739_s1 = sshll.u32 %s7874_s30, 4 }
  0xef   : > { %s8950_s6 = scalar_select %p8213_p6, 1, 0 }
  0xf0   : > { %s8951_s20 = scalar_select %p8220_p0, 1, 0 }
  0xf1   : > { %s8952_s18 = scalar_select %p8224_p2, 1, 0 }
  0xf2   : > { %s689_s24 = scalar_lea.vmem [#allocation2], %s686_s22  ;;  %s8953_s25 = sld [smem:[#allocation44_spill]] }
  0xf3   : > { %s696_s19 = sshll.u32 %s689_s24, 4  ;;  %p8236_p5 = pnand %p6722_p13, %p8207_p1  ;;  %s697_s19 = int_to_ptr.vmem [resolvable:$true] %s696_s19 }
  0xf4   : > { %s687_s21 = scalar_lea.sflag [#allocation3], %s686_s22 }
  0xf5   : > { %p7752_p3 = pneg %p8236_p5 }
  0xf8   : > { %s8232_s3 = scalar_lea.hbm %s8953_s25, %s5739_s1  ;;  %s7755_s23 = scalar_lea.hbm %s8953_s25, 32 }
  0xf9   : > { %s7750_s5 = scalar_lea.hbm %s8232_s3, 16  ;;  %p7756_p11 = scmp.lt.s32.totalorder %s8232_s3, %s8953_s25 }
  0xfa   : > { %p7751_p8 = scmp.ne.s32.totalorder %s8232_s3, %s7750_s5  ;;  %p7757_p1 = scmp.lt.s32.totalorder %s7755_s23, %s7750_s5 }
  0xfc   : > { %p7753_p7 = pnand %p7752_p3, %p7751_p8  ;;  %p7758_p4 = por %p7757_p1, %p7756_p11 }
  0xfe   : > { %p7754_p9 = pneg %p7753_p7 }
 0x100   : > { %p7759_p10 = pnand %p7758_p4, %p7754_p9 }
 0x102   : > { %7762 = shalt.err (!%p7759_p10)
}
 0x103   : > { %s7763_s4 = scalar_lea.vmem %s697_s19, 16  ;;  %s7904_s22 = smov [#allocation2]  }
 0x104   : > { %p7764_p12 = scmp.ne.s32.totalorder %s697_s19, %s7763_s4  ;;  %s7768_s8 = sshll.u32 %s7904_s22, 4  ;;  %s7769_s8 = int_to_ptr.vmem [resolvable:$false] %s7768_s8 }
 0x105   : > { %s7770_s9 = scalar_lea.vmem %s7769_s8, 32  ;;  %p7771_p8 = scmp.lt.s32.totalorder %s697_s19, %s7769_s8 }
 0x106   : > { %p7766_p13 = pnand %p7764_p12, %p7752_p3  ;;  %p7772_p7 = scmp.lt.s32.totalorder %s7770_s9, %s7763_s4 }
 0x108   : > { %p7767_p2 = pneg %p7766_p13  ;;  %p7773_p0 = por %p7772_p7, %p7771_p8 }
 0x10a   : > { %p7774_p6 = pnand %p7773_p0, %p7767_p2 }
 0x10c   : > { %7777 = shalt.err (!%p7774_p6)
}
 0x10d   : > { %6701 = dma.hbm_to_vmem [thread:$0]  (!%p8236_p5), %s8232_s3, 16, %s697_s19, %s687_s21  }
 0x10e   : > { %s8955_s5 = sld [smem:[#allocation42_spill]] }
 0x114   : > { %p8956_p9 = scmp.ne.s32.totalorder %s8955_s5, 0 }
 0x115   : > { %s8257_s7 = sand.u32 (!%p8956_p9), 1, %s7866_s28   ;;  %p8957_p3 = scmp.ne.s32.totalorder (!%p8956_p9), %s8950_s6, 0 }
 0x116   : > { %705 = sbr.rel (%p8956_p9) target bundleno = 8661 (0x21d5), region = 92  ;;  %s708_s24 = scalar_lea.sflag (!%p8956_p9), [#allocation3], %s8257_s7 }
 0x117   : > { %s710_s1 = scalar_lea.vmem (!%p8956_p9), [#allocation2], %s8257_s7 }
 0x11b   : > { %7821 = dma.done.wait (%p8957_p3), %s708_s24, 16  }
 0x11c   : > { %7823 = vsyncadd (%p8957_p3), %s708_s24, 4294967280  ;;  %s8958_s8 = sld [smem:[#allocation41_spill]] }
 0x122   : > { %p8959_p6 = scmp.eq.s32.totalorder %s8958_s8, 0 }
 0x124   : > { %7825 = dma.done.wait (%p8959_p6), [#allocation6], 24960   ;;  %p8960_p0 = pmov %p8959_p6 }
 0x126   : > { %7827 = vsyncadd (%p8960_p0), [#allocation6], 4294942336  ;;  %p8961_p2 = pmov %p8960_p0 }
 0x127   : > { %p8962_p5 = pmov %p8960_p0 }
 0x128   : > { %7829 = dma.done.wait (%p8961_p2), [#allocation9], 8224  }
 0x129   : > { %7831 = vsyncadd (%p8962_p5), [#allocation9], 4294959072  ;;  %p8963_p11 = pmov %p8960_p0 }
 0x12a   : > { %p8964_p1 = pmov %p8960_p0 }
 0x12b   : > { %7833 = dma.done.wait (%p8963_p11), [#allocation12], 64  }
 0x12c   : > { %7835 = vsyncadd (%p8964_p1), [#allocation12], 4294967232  ;;  %p8965_p4 = pmov %p8960_p0 }
 0x12d   : > { %p8966_p10 = pmov %p8960_p0 }
 0x12e   : > { %7837 = dma.done.wait (%p8965_p4), [#allocation15], 4160  }
 0x12f   : > { %7839 = vsyncadd (%p8966_p10), [#allocation15], 4294963136  ;;  %p8967_p12 = pmov %p8960_p0 }
 0x130   : > { %p8968_p13 = pmov %p8960_p0 }
 0x131   : > { %7841 = dma.done.wait (%p8967_p12), [#allocation18], 4128  }
 0x132   : > { %7843 = vsyncadd (%p8968_p13), [#allocation18], 4294963168  ;;  %p8969_p8 = pmov %p8960_p0 }
 0x133   : > { %p8970_p7 = pmov %p8960_p0 }
 0x134   : > { %7845 = dma.done.wait (%p8969_p8), [#allocation21], 64  }
 0x135   : > { %7847 = vsyncadd (%p8970_p7), [#allocation21], 4294967232  ;;  %p8971_p9 = pmov %p8960_p0 }
 0x136   : > { %p8972_p3 = pmov %p8960_p0 }
 0x137   : > { %7849 = dma.done.wait (%p8971_p9), [#allocation24], 1040  }
 0x138   : > { %7851 = vsyncadd (%p8972_p3), [#allocation24], 4294966256  ;;  %p8973_p6 = pmov %p8960_p0 }
 0x13a   : > { %7853 = dma.done.wait (%p8973_p6), [#allocation27], 1040  }
 0x13b   : > { %7855 = vsyncadd (%p8960_p0), [#allocation27], 4294966256  ;;  %v7905_v0 = vmov 0   ;;  %v6804_v1 = vld [vmem:[#allocation5 + $0x2a4] ss:$48 sps:$4 sm:$0xff]   ;;  %p830_p2 = scmp.lt.s32.totalorder %s8958_s8, 1 }
 0x13c   : > { %1514 = vmatprep.mubr.bf16.mxu0 %v7905_v0  ;;  %1557 = vmatprep.mubr.bf16.mxu1 %v7905_v0  ;;  %v6806_v2 = vld [vmem:[#allocation5 + $0x2a0] ss:$48 sps:$4 sm:$0xff]   ;;  %v6807_v3 = vld [vmem:[#allocation5 + $0x244] ss:$48 sps:$4 sm:$0xff]   ;;  %s8974_s26 = sld [smem:[#allocation43_spill]]  ;;  %v7906_v52 = vmov 0.0  }
 0x13d   : > { %1482 = vmatprep.subr.bf16.mxu0 %v6804_v1  ;;  %v6809_v4 = vld [vmem:[#allocation5 + $0x240] ss:$48 sps:$4 sm:$0xff]   ;;  %v6810_v5 = vld [vmem:[#allocation5 + $0x1e4] ss:$48 sps:$4 sm:$0xff]   ;;  %s831_s3 = scalar_select %p830_p2, %s8958_s8, 1  ;;  %vm7907_vm0 = vmmov 0  }
 0x13e   : > { %1483 = vmatpush1.bf16.msra.mxu0 %v6806_v2  ;;  %v6812_v6 = vld [vmem:[#allocation5 + $0x1e0] ss:$48 sps:$4 sm:$0xff]   ;;  %v6813_v7 = vld [vmem:[#allocation5 + $0x184] ss:$48 sps:$4 sm:$0xff]   ;;  %v6876_v53 = vld [vmem:[#allocation5 + $0x2ac] ss:$48 sps:$4 sm:$0xff]  }
 0x13f   : > { %1484 = vmatprep.subr.bf16.mxu0 %v6807_v3  ;;  %v6815_v8 = vld [vmem:[#allocation5 + $0x180] ss:$48 sps:$4 sm:$0xff]   ;;  %v6816_v9 = vld [vmem:[#allocation5 + $0x124] ss:$48 sps:$4 sm:$0xff]   ;;  %s6118_s9 = sshll.u32 %s831_s3, 4  ;;  %1525 = vmatprep.subr.bf16.mxu1 %v6876_v53  ;;  %vm1790_vm2 = vcmask 130048  }
 0x140   : > { %v6818_v10 = vld [vmem:[#allocation5 + $0x120] ss:$48 sps:$4 sm:$0xff]   ;;  %v6819_v11 = vld [vmem:[#allocation5 + $0xc4] ss:$48 sps:$4 sm:$0xff]   ;;  %v6878_v54 = vld [vmem:[#allocation5 + $0x2a8] ss:$48 sps:$4 sm:$0xff]  }
 0x141   : > { %v6821_v12 = vld [vmem:[#allocation5 + $0xc0] ss:$48 sps:$4 sm:$0xff]   ;;  %v6822_v13 = vld [vmem:[#allocation5 + $0x64] ss:$48 sps:$4 sm:$0xff]   ;;  %v6879_v55 = vld [vmem:[#allocation5 + $0x24c] ss:$48 sps:$4 sm:$0xff]   ;;  %1526 = vmatpush1.bf16.msra.mxu1 %v6878_v54 }
 0x142   : > { %1485 = vmatpush1.bf16.msra.mxu0 %v6809_v4  ;;  %v6824_v14 = vld [vmem:[#allocation5 + $0x60] ss:$48 sps:$4 sm:$0xff]   ;;  %v6825_v15 = vld [vmem:[#allocation5 + $0x4] ss:$48 sps:$4 sm:$0xff]   ;;  %s8304_s21 = scalar_lea.vmem %s8974_s26, %s6118_s9  ;;  %v6881_v56 = vld [vmem:[#allocation5 + $0x248] ss:$48 sps:$4 sm:$0xff]   ;;  %1527 = vmatprep.subr.bf16.mxu1 %v6879_v55 }
 0x143   : > { %1486 = vmatprep.subr.bf16.mxu0 %v6810_v5  ;;  %v6827_v16 = vld [vmem:[#allocation5] ss:$48 sps:$4 sm:$0xff]   ;;  %v840_v18 = vld [vmem:[%s8304_s21 + $0x8] sm:$0xff]  ;;  %s6115_s23 = sshll.u32 %s8958_s8, 4  ;;  %s829_s27 = scalar_lea.vmem [#allocation29], %s8257_s7 }
 0x144   : > { %v839_v17 = vld [vmem:[%s8304_s21] sm:$0xff]  ;;  %v6884_v58 = vld [vmem:[#allocation5 + $0x1e8] ss:$48 sps:$4 sm:$0xff]   ;;  %s5493_s4 = sshll.u32 %s829_s27, 4  ;;  %s8975_s24 = sld [smem:[#allocation53_spill]]  ;;  %s8839_s4 = int_to_ptr.vmem [resolvable:$true] %s5493_s4 }
 0x145   : > { %v6830_v19 = vld [vmem:[#allocation5 + $0x2b4] ss:$48 sps:$4 sm:$0xff]   ;;  %v6828_v20 = vld [vmem:[#allocation5 + $0x2b0] ss:$48 sps:$4 sm:$0xff]   ;;  %v8308_v21 = vpack.c.bf16 %v840_v18, %v839_v17  ;;  %v6882_v57 = vld [vmem:[#allocation5 + $0x1ec] ss:$48 sps:$4 sm:$0xff]   ;;  %1528 = vmatpush1.bf16.msra.mxu1 %v6881_v56 }
 0x146   : > { %1487 = vmatpush1.bf16.msra.mxu0 %v6812_v6  ;;  %v6833_v22 = vld [vmem:[#allocation5 + $0x254] ss:$48 sps:$4 sm:$0xff]   ;;  %v6831_v23 = vld [vmem:[#allocation5 + $0x250] ss:$48 sps:$4 sm:$0xff]   ;;  %1529 = vmatprep.subr.bf16.mxu1 %v6882_v57  ;;  %v6885_v59 = vld [vmem:[#allocation5 + $0x18c] ss:$48 sps:$4 sm:$0xff]  }
 0x147   : > { %1488 = vmatprep.subr.bf16.mxu0 %v6813_v7  ;;  %v6836_v24 = vld [vmem:[#allocation5 + $0x1f4] ss:$48 sps:$4 sm:$0xff]   ;;  %v6834_v25 = vld [vmem:[#allocation5 + $0x1f0] ss:$48 sps:$4 sm:$0xff]   ;;  %v6887_v60 = vld [vmem:[#allocation5 + $0x188] ss:$48 sps:$4 sm:$0xff]  }
 0x148   : > { %v6839_v26 = vld [vmem:[#allocation5 + $0x194] ss:$48 sps:$4 sm:$0xff]   ;;  %v6837_v27 = vld [vmem:[#allocation5 + $0x190] ss:$48 sps:$4 sm:$0xff]   ;;  %v6888_v61 = vld [vmem:[#allocation5 + $0x12c] ss:$48 sps:$4 sm:$0xff]  }
 0x149   : > { %v6842_v28 = vld [vmem:[#allocation5 + $0x134] ss:$48 sps:$4 sm:$0xff]   ;;  %v6840_v29 = vld [vmem:[#allocation5 + $0x130] ss:$48 sps:$4 sm:$0xff]   ;;  %1530 = vmatpush1.bf16.msra.mxu1 %v6884_v58  ;;  %v6890_v62 = vld [vmem:[#allocation5 + $0x128] ss:$48 sps:$4 sm:$0xff]  }
 0x14a   : > { %1489 = vmatpush1.bf16.msra.mxu0 %v6815_v8  ;;  %v6845_v30 = vld [vmem:[#allocation5 + $0xd4] ss:$48 sps:$4 sm:$0xff]   ;;  %v6843_v31 = vld [vmem:[#allocation5 + $0xd0] ss:$48 sps:$4 sm:$0xff]   ;;  %1531 = vmatprep.subr.bf16.mxu1 %v6885_v59  ;;  %v6891_v63 = vld [vmem:[#allocation5 + $0xcc] ss:$48 sps:$4 sm:$0xff]  }
 0x14b   : > { %1490 = vmatprep.subr.bf16.mxu0 %v6816_v9  ;;  %v6848_v32 = vld [vmem:[#allocation5 + $0x74] ss:$48 sps:$4 sm:$0xff]   ;;  %v6846_v33 = vld [vmem:[#allocation5 + $0x70] ss:$48 sps:$4 sm:$0xff]   ;;  %v6893_v1 = vld [vmem:[#allocation5 + $0xc8] ss:$48 sps:$4 sm:$0xff]  }
 0x14c   : > { %v6851_v34 = vld [vmem:[#allocation5 + $0x14] ss:$48 sps:$4 sm:$0xff]   ;;  %v6849_v35 = vld [vmem:[#allocation5 + $0x10] ss:$48 sps:$4 sm:$0xff]   ;;  %v6894_v2 = vld [vmem:[#allocation5 + $0x6c] ss:$48 sps:$4 sm:$0xff]  }
 0x14d   : > { %v6854_v36 = vld [vmem:[#allocation5 + $0x2c4] ss:$48 sps:$4 sm:$0xff]   ;;  %v6852_v37 = vld [vmem:[#allocation5 + $0x2c0] ss:$48 sps:$4 sm:$0xff]   ;;  %1532 = vmatpush1.bf16.msra.mxu1 %v6887_v60  ;;  %v6896_v3 = vld [vmem:[#allocation5 + $0x68] ss:$48 sps:$4 sm:$0xff]  }
 0x14e   : > { %1491 = vmatpush1.bf16.msra.mxu0 %v6818_v10  ;;  %v6857_v38 = vld [vmem:[#allocation5 + $0x264] ss:$48 sps:$4 sm:$0xff]   ;;  %v6855_v39 = vld [vmem:[#allocation5 + $0x260] ss:$48 sps:$4 sm:$0xff]   ;;  %1533 = vmatprep.subr.bf16.mxu1 %v6888_v61  ;;  %v6897_v4 = vld [vmem:[#allocation5 + $0xc] ss:$48 sps:$4 sm:$0xff]  }
 0x14f   : > { %1492 = vmatprep.subr.bf16.mxu0 %v6819_v11  ;;  %v6860_v40 = vld [vmem:[#allocation5 + $0x204] ss:$48 sps:$4 sm:$0xff]   ;;  %v6858_v41 = vld [vmem:[#allocation5 + $0x200] ss:$48 sps:$4 sm:$0xff]   ;;  %v6899_v5 = vld [vmem:[#allocation5 + $0x8] ss:$48 sps:$4 sm:$0xff]  }
 0x150   : > { %v6863_v42 = vld [vmem:[#allocation5 + $0x1a4] ss:$48 sps:$4 sm:$0xff]   ;;  %v6861_v43 = vld [vmem:[#allocation5 + $0x1a0] ss:$48 sps:$4 sm:$0xff]   ;;  %v6902_v6 = vld [vmem:[#allocation5 + $0x2bc] ss:$48 sps:$4 sm:$0xff]  }
 0x151   : > { %v6866_v44 = vld [vmem:[#allocation5 + $0x144] ss:$48 sps:$4 sm:$0xff]   ;;  %v6864_v45 = vld [vmem:[#allocation5 + $0x140] ss:$48 sps:$4 sm:$0xff]   ;;  %1534 = vmatpush1.bf16.msra.mxu1 %v6890_v62  ;;  %v6900_v7 = vld [vmem:[#allocation5 + $0x2b8] ss:$48 sps:$4 sm:$0xff]  }
 0x152   : > { %1493 = vmatpush1.bf16.msra.mxu0 %v6821_v12  ;;  %v6869_v46 = vld [vmem:[#allocation5 + $0xe4] ss:$48 sps:$4 sm:$0xff]   ;;  %v6867_v47 = vld [vmem:[#allocation5 + $0xe0] ss:$48 sps:$4 sm:$0xff]   ;;  %1535 = vmatprep.subr.bf16.mxu1 %v6891_v63  ;;  %v6905_v8 = vld [vmem:[#allocation5 + $0x25c] ss:$48 sps:$4 sm:$0xff]  }
 0x153   : > { %1494 = vmatprep.subr.bf16.mxu0 %v6822_v13  ;;  %v6872_v48 = vld [vmem:[#allocation5 + $0x84] ss:$48 sps:$4 sm:$0xff]   ;;  %v6870_v49 = vld [vmem:[#allocation5 + $0x80] ss:$48 sps:$4 sm:$0xff]   ;;  %v6903_v9 = vld [vmem:[#allocation5 + $0x258] ss:$48 sps:$4 sm:$0xff]  }
 0x154   : > { %v6875_v50 = vld [vmem:[#allocation5 + $0x24] ss:$48 sps:$4 sm:$0xff]   ;;  %v6873_v51 = vld [vmem:[#allocation5 + $0x20] ss:$48 sps:$4 sm:$0xff]   ;;  %v6908_v10 = vld [vmem:[#allocation5 + $0x1fc] ss:$48 sps:$4 sm:$0xff]  }
 0x155   : > { %1536 = vmatpush1.bf16.msra.mxu1 %v6893_v1  ;;  %v6906_v11 = vld [vmem:[#allocation5 + $0x1f8] ss:$48 sps:$4 sm:$0xff]   ;;  %v6911_v12 = vld [vmem:[#allocation5 + $0x19c] ss:$48 sps:$4 sm:$0xff]   ;;  %s5481_s3 = scalar_lea.sflag [#allocation4], %s8257_s7  ;;  %s7778_s9 = scalar_lea.vmem %s8839_s4, 16 }
 0x156   : > { %1495 = vmatpush1.bf16.msra.mxu0 %v6824_v14  ;;  %1537 = vmatprep.subr.bf16.mxu1 %v6894_v2  ;;  %v6909_v13 = vld [vmem:[#allocation5 + $0x198] ss:$48 sps:$4 sm:$0xff]   ;;  %v6914_v14 = vld [vmem:[#allocation5 + $0x13c] ss:$48 sps:$4 sm:$0xff]   ;;  %p7779_p5 = scmp.ne.s32.totalorder %s8839_s4, %s7778_s9  ;;  %p8976_p11 = scmp.ne.s32.totalorder %s8951_s20, 0 }
 0x157   : > { %1496 = vmatprep.subr.bf16.mxu0 %v6825_v15  ;;  %v6912_v15 = vld [vmem:[#allocation5 + $0x138] ss:$48 sps:$4 sm:$0xff]   ;;  %v6920_v18 = vld [vmem:[#allocation5 + $0x7c] ss:$48 sps:$4 sm:$0xff]   ;;  %s7909_s8 = smov [#allocation29]  }
 0x158   : > { %v6915_v17 = vld [vmem:[#allocation5 + $0xd8] ss:$48 sps:$4 sm:$0xff]   ;;  %p7780_p1 = pnand %p7779_p5, %p8976_p11  ;;  %s7782_s6 = sshll.u32 %s7909_s8, 4  ;;  %s7783_s6 = int_to_ptr.vmem [resolvable:$false] %s7782_s6 }
 0x159   : > { %1538 = vmatpush1.bf16.msra.mxu1 %v6896_v3  ;;  %s7784_s19 = scalar_lea.vmem %s7783_s6, 32  ;;  %p7785_p10 = scmp.lt.s32.totalorder %s8839_s4, %s7783_s6 }
 0x15a   : > { %1497 = vmatpush1.bf16.msra.mxu0 %v6827_v16  ;;  %1539 = vmatprep.subr.bf16.mxu1 %v6897_v4  ;;  %v6917_v16 = vld [vmem:[#allocation5 + $0xdc] ss:$48 sps:$4 sm:$0xff]   ;;  %p7781_p4 = pneg %p7780_p1  ;;  %p7786_p12 = scmp.lt.s32.totalorder %s7784_s19, %s7778_s9 }
 0x15b   : > { %1568 = vmatprep.subr.bf16.mxu0 %v6830_v19  ;;  %v6918_v19 = vld [vmem:[#allocation5 + $0x78] ss:$48 sps:$4 sm:$0xff]  }
 0x15c   : > { %p7787_p13 = por %p7786_p12, %p7785_p10 }
 0x15d   : > { %1515 = vmatmul.mubr.bf16.vlgmr.msra.gmra.mxu0 %v8308_v21  ;;  %1540 = vmatpush1.bf16.msra.mxu1 %v6899_v5 }
 0x15e   : > { %1569 = vmatpush1.bf16.msra.mxu0 %v6828_v20  ;;  %1600 = vmatprep.mubr.bf16.mxu0 %v7905_v0  ;;  %v6923_v20 = vld [vmem:[#allocation5 + $0x1c] ss:$48 sps:$4 sm:$0xff]   ;;  %p7788_p8 = pnand %p7787_p13, %p7781_p4 }
 0x15f   : > { %1570 = vmatprep.subr.bf16.mxu0 %v6833_v22  ;;  %1611 = vmatprep.subr.bf16.mxu1 %v6902_v6  ;;  %v6921_v22 = vld [vmem:[#allocation5 + $0x18] ss:$48 sps:$4 sm:$0xff]  }
 0x160   : > { %1558 = vmatmul.mubr.bf16.vlgmr.msra.gmra.mxu1 %v8308_v21 }
 0x161   : > { %1612 = vmatpush1.bf16.msra.mxu1 %v6900_v7  ;;  %1643 = vmatprep.mubr.bf16.mxu1 %v7905_v0  ;;  %v8363_v7 = vld [vmem:[#allocation7 + $0x8] sm:$0xf] }
 0x162   : > { %1571 = vmatpush1.bf16.msra.mxu0 %v6831_v23  ;;  %1613 = vmatprep.subr.bf16.mxu1 %v6905_v8  ;;  %v6926_v23 = vld [vmem:[#allocation5 + $0x2cc] ss:$48 sps:$4 sm:$0xff]  }
 0x163   : > { %1572 = vmatprep.subr.bf16.mxu0 %v6836_v24  ;;  %v6924_v24 = vld [vmem:[#allocation5 + $0x2c8] ss:$48 sps:$4 sm:$0xff]  }
 0x165   : > { %1614 = vmatpush1.bf16.msra.mxu1 %v6903_v9 }
 0x166   : > { %1573 = vmatpush1.bf16.msra.mxu0 %v6834_v25  ;;  %1615 = vmatprep.subr.bf16.mxu1 %v6908_v10  ;;  %v6929_v25 = vld [vmem:[#allocation5 + $0x26c] ss:$48 sps:$4 sm:$0xff]  }
 0x167   : > { %1574 = vmatprep.subr.bf16.mxu0 %v6839_v26  ;;  %v6927_v26 = vld [vmem:[#allocation5 + $0x268] ss:$48 sps:$4 sm:$0xff]  }
 0x169   : > { %1616 = vmatpush1.bf16.msra.mxu1 %v6906_v11 }
 0x16a   : > { %1575 = vmatpush1.bf16.msra.mxu0 %v6837_v27  ;;  %1617 = vmatprep.subr.bf16.mxu1 %v6911_v12  ;;  %v6932_v27 = vld [vmem:[#allocation5 + $0x20c] ss:$48 sps:$4 sm:$0xff]  }
 0x16b   : > { %1576 = vmatprep.subr.bf16.mxu0 %v6842_v28  ;;  %v942_v28 = vlaneseq }
 0x16d   : > { %1618 = vmatpush1.bf16.msra.mxu1 %v6909_v13 }
 0x16e   : > { %1577 = vmatpush1.bf16.msra.mxu0 %v6840_v29  ;;  %1619 = vmatprep.subr.bf16.mxu1 %v6914_v14  ;;  %v6930_v29 = vld [vmem:[#allocation5 + $0x208] ss:$48 sps:$4 sm:$0xff]  }
 0x16f   : > { %1578 = vmatprep.subr.bf16.mxu0 %v6845_v30  ;;  %v6935_v30 = vld [vmem:[#allocation5 + $0x1ac] ss:$48 sps:$4 sm:$0xff]  }
 0x171   : > { %1620 = vmatpush1.bf16.msra.mxu1 %v6912_v15 }
 0x172   : > { %1579 = vmatpush1.bf16.msra.mxu0 %v6843_v31  ;;  %1621 = vmatprep.subr.bf16.mxu1 %v6917_v16  ;;  %v8322_v31 = vshrl.u32 %v942_v28, 7 }
 0x173   : > { %1580 = vmatprep.subr.bf16.mxu0 %v6848_v32  ;;  %v6933_v32 = vld [vmem:[#allocation5 + $0x1a8] ss:$48 sps:$4 sm:$0xff]  }
 0x174   : > { %v964_v53 = vsub.s32 5, %v8322_v31  ;;  %v8350_v58 = vsub.s32 0, %v8322_v31 }
 0x175   : > { %1622 = vmatpush1.bf16.msra.mxu1 %v6915_v17 }
 0x176   : > { %1581 = vmatpush1.bf16.msra.mxu0 %v6846_v33  ;;  %1623 = vmatprep.subr.bf16.mxu1 %v6920_v18  ;;  %v6938_v33 = vld [vmem:[#allocation5 + $0x14c] ss:$48 sps:$4 sm:$0xff]   ;;  %v977_v8 = vrot.slane %v8363_v7, %v8350_v58 }
 0x177   : > { %1582 = vmatprep.subr.bf16.mxu0 %v6851_v34  ;;  %v8325_v34 = vsub.s32 1, %v8322_v31 }
 0x179   : > { %1624 = vmatpush1.bf16.msra.mxu1 %v6918_v19  ;;  %v981_v10 = vrot.slane %v8363_v7, %v8325_v34 }
 0x17a   : > { %1583 = vmatpush1.bf16.msra.mxu0 %v6849_v35  ;;  %1625 = vmatprep.subr.bf16.mxu1 %v6923_v20  ;;  %v6936_v35 = vld [vmem:[#allocation5 + $0x148] ss:$48 sps:$4 sm:$0xff]   ;;  %v836_v20 = vld [vmem:[%s710_s1] sm:$0x1]  ;;  %s8837_s1 = scalar_lea.hbm %s8975_s24, %s6115_s23 }
 0x17b   : > { %1654 = vmatprep.subr.bf16.mxu0 %v6854_v36  ;;  %v8327_v36 = vld [vmem:[#allocation7] sm:$0xff]  ;;  %vm837_vm1 = vcmp.ne.s32.totalorder %v836_v20, 0  ;;  %v6956_v20 = vld [vmem:[#allocation8 + $0x78] sm:$0xff]  }
 0x17c   : > { %v965_v57 = vrot.slane %v8327_v36, %v964_v53  ;;  %v945_v2 = vrot.slane %v8327_v36, %v8350_v58 }
 0x17d   : > { %1601 = vmatmul.mubr.bf16.vlgmr.msra.gmra.mxu0 %v8308_v21  ;;  %1626 = vmatpush1.bf16.msra.mxu1 %v6921_v22  ;;  %v7908_v22 = vmov -1e+30  }
 0x17e   : > { %1686 = vmatprep.mubr.bf16.mxu0 %v7905_v0  ;;  %1655 = vmatpush1.bf16.msra.mxu0 %v6852_v37 }
 0x17f   : > { %1656 = vmatprep.subr.bf16.mxu0 %v6857_v38  ;;  %1697 = vmatprep.subr.bf16.mxu1 %v6926_v23  ;;  %v6941_v38 = vld [vmem:[#allocation5 + $0xec] ss:$48 sps:$4 sm:$0xff]   ;;  %v838_v23 = vsel %vm837_vm1, 0.0, %v7908_v22 }
 0x180   : > { %1644 = vmatmul.mubr.bf16.vlgmr.msra.gmra.mxu1 %v8308_v21 }
 0x181   : > { %1698 = vmatpush1.bf16.msra.mxu1 %v6924_v24  ;;  %1729 = vmatprep.mubr.bf16.mxu1 %v7905_v0  ;;  %v8374_v24 = vrot.slane %v838_v23, %v8350_v58 }
 0x182   : > { %1657 = vmatpush1.bf16.msra.mxu0 %v6855_v39  ;;  %1699 = vmatprep.subr.bf16.mxu1 %v6929_v25 }
 0x183   : > { %1658 = vmatprep.subr.bf16.mxu0 %v6860_v40  ;;  %v949_v40 = vrot.slane %v8327_v36, %v8325_v34 }
 0x185   : > { %1700 = vmatpush1.bf16.msra.mxu1 %v6927_v26 }
 0x186   : > { %1659 = vmatpush1.bf16.msra.mxu0 %v6858_v41  ;;  %1701 = vmatprep.subr.bf16.mxu1 %v6932_v27  ;;  %v6939_v41 = vld [vmem:[#allocation5 + $0xe8] ss:$48 sps:$4 sm:$0xff]  }
 0x187   : > { %1660 = vmatprep.subr.bf16.mxu0 %v6863_v42 }
 0x189   : > { %1702 = vmatpush1.bf16.msra.mxu1 %v6930_v29 }
 0x18a   : > { %1661 = vmatpush1.bf16.msra.mxu0 %v6861_v43  ;;  %1703 = vmatprep.subr.bf16.mxu1 %v6935_v30  ;;  %v6944_v43 = vld [vmem:[#allocation5 + $0x8c] ss:$48 sps:$4 sm:$0xff]  }
 0x18b   : > { %1662 = vmatprep.subr.bf16.mxu0 %v6866_v44 }
 0x18d   : > { %1704 = vmatpush1.bf16.msra.mxu1 %v6933_v32 }
 0x18e   : > { %1663 = vmatpush1.bf16.msra.mxu0 %v6864_v45  ;;  %1705 = vmatprep.subr.bf16.mxu1 %v6938_v33 }
 0x18f   : > { %1664 = vmatprep.subr.bf16.mxu0 %v6869_v46 }
 0x191   : > { %1706 = vmatpush1.bf16.msra.mxu1 %v6936_v35 }
 0x192   : > { %1665 = vmatpush1.bf16.msra.mxu0 %v6867_v47  ;;  %1707 = vmatprep.subr.bf16.mxu1 %v6941_v38  ;;  %v6942_v47 = vld [vmem:[#allocation5 + $0x88] ss:$48 sps:$4 sm:$0xff]  }
 0x193   : > { %1666 = vmatprep.subr.bf16.mxu0 %v6872_v48  ;;  %v6947_v48 = vld [vmem:[#allocation5 + $0x2c] ss:$48 sps:$4 sm:$0xff]  }
 0x195   : > { %1708 = vmatpush1.bf16.msra.mxu1 %v6939_v41 }
 0x196   : > { %1667 = vmatpush1.bf16.msra.mxu0 %v6870_v49  ;;  %1709 = vmatprep.subr.bf16.mxu1 %v6944_v43 }
 0x197   : > { %1668 = vmatprep.subr.bf16.mxu0 %v6875_v50  ;;  %v6945_v50 = vld [vmem:[#allocation5 + $0x28] ss:$48 sps:$4 sm:$0xff]  }
 0x199   : > { %1710 = vmatpush1.bf16.msra.mxu1 %v6942_v47 }
 0x19a   : > { %1669 = vmatpush1.bf16.msra.mxu0 %v6873_v51  ;;  %1711 = vmatprep.subr.bf16.mxu1 %v6947_v48  ;;  %v960_v51 = vsub.s32 4, %v8322_v31 }
 0x19b   : > { %6285 = vmatprep.subr.bf16.mxu0 %v7906_v52 }
 0x19c   : > { %v961_v55 = vrot.slane %v8327_v36, %v960_v51 }
 0x19d   : > { %1687 = vmatmul.mubr.bf16.vlgmr.msra.gmra.mxu0 %v8308_v21  ;;  %1712 = vmatpush1.bf16.msra.mxu1 %v6945_v50 }
 0x19e   : > { %6287 = vmatprep.mubr.msk.bf16.mxu0 %vm7907_vm0, %v7906_v52  ;;  %6303 = vmatprep.subr.bf16.mxu1 %v7906_v52 }
 0x1a0   : > { %1730 = vmatmul.mubr.bf16.vlgmr.msra.gmra.mxu1 %v8308_v21 }
 0x1a1   : > { %6305 = vmatprep.mubr.msk.bf16.mxu1 %vm7907_vm0, %v7906_v52 }
 0x21d   : > { %v1516_v37 = vpop.f32.mrf.mxu0 }
 0x21e   : > { %v1517_v5 = vadd.f32 %v1516_v37, %v945_v2 }
 0x21f   : > { %v1518_v39 = vpop.f32.mrf.mxu0 }
 0x220   : > { %v8331_v45 = vadd.f32 %v1518_v39, %v949_v40 }
 0x221   : > { %v1520_v42 = vpop.f32.mrf.mxu0 }
 0x222   : > { %v1521_v4 = vadd.f32 %v1520_v42, %v945_v2 }
 0x223   : > { %v1522_v44 = vpop.f32.mrf.mxu0 }
 0x224   : > { %v8333_v46 = vadd.f32 %v1522_v44, %v949_v40  ;;  %v1740_v6 = vpack.c.bf16 %v1521_v4, %v1517_v5 }
 0x226   : > { %v1875_v49 = vpack.c.bf16 %v8333_v46, %v8331_v45 }
 0x23d   : > { %v1602_v54 = vpop.f32.mrf.mxu0 }
 0x23e   : > { %v1603_v59 = vadd.f32 %v1602_v54, %v961_v55 }
 0x23f   : > { %v1604_v56 = vpop.f32.mrf.mxu0 }
 0x240   : > { %v8352_v62 = vadd.f32 %v1604_v56, %v965_v57 }
 0x241   : > { %v1606_v21 = vpop.f32.mrf.mxu0 }
 0x242   : > { %v1607_v60 = vadd.f32 %v1606_v21, %v961_v55 }
 0x243   : > { %v1608_v61 = vpop.f32.mrf.mxu0 }
 0x244   : > { %v1741_v63 = vpack.c.bf16 %v1607_v60, %v1603_v59  ;;  %v8354_v1 = vadd.f32 %v1608_v61, %v965_v57 }
 0x246   : > { %v1876_v3 = vpack.c.bf16 %v8354_v1, %v8352_v62  ;;  %6286 = vmatpush3.bf16.xpose.msra.mxu0 %v1741_v63 }
 0x247   : > { %6291 = vmatprep.subr.bf16.mxu0 %v7906_v52 }
 0x24d   : > { %6288 = vmatmul.mubr.bf16.vlgmr.msra.gmra.mxu0 %v1740_v6 }
 0x24e   : > { %6293 = vmatprep.mubr.msk.bf16.mxu0 %vm7907_vm0, %v7906_v52 }
 0x25d   : > { %v1688_v9 = vpop.f32.mrf.mxu0 }
 0x25e   : > { %v1689_v12 = vadd.f32 %v1688_v9, %v977_v8 }
 0x25f   : > { %v1690_v11 = vpop.f32.mrf.mxu0 }
 0x260   : > { %v1691_v14 = vadd.f32 %v1690_v11, %v981_v10 }
 0x261   : > { %v1692_v13 = vpop.f32.mrf.mxu0 }
 0x262   : > { %v1693_v15 = vadd.f32 %v1692_v13, %v977_v8 }
 0x263   : > { %v1694_v16 = vpop.f32.mrf.mxu0 }
 0x264   : > { %v1742_v17 = vpack.c.bf16 %v1693_v15, %v1689_v12  ;;  %v1695_v18 = vadd.f32 %v1694_v16, %v981_v10 }
 0x266   : > { %v1877_v19 = vpack.c.bf16 %v1695_v18, %v1691_v14  ;;  %6292 = vmatpush3.bf16.msra.mxu0 %v1742_v17  ;;  %v8407_v17 = vsub.s32 2, %v8322_v31  ;;  %v1559_v18 = vpop.f32.mrf.mxu1 }
 0x267   : > { %6297 = vmatprep.subr.bf16.mxu0 %v7906_v52 }
 0x268   : > { %6304 = vmatpush3.bf16.msra.mxu1 %v1877_v19  ;;  %v8410_v19 = vsub.s32 3, %v8322_v31  ;;  %v953_v22 = vrot.slane %v8327_v36, %v8407_v17 }
 0x269   : > { %6329 = vmatprep.subr.bf16.mxu1 %v7906_v52 }
 0x26a   : > { %v957_v23 = vrot.slane %v8327_v36, %v8410_v19 }
 0x30d   : > { %v1783_v25 = vpop.f32.mrf.mxu0 }
 0x30e   : > { %v1784_v26 = vadd.f32 %v1783_v25, %v8374_v24  ;;  %v1561_v25 = vpop.f32.mrf.mxu1 }
 0x30f   : > { %v6289_v27 = vpop.f32.mrf.mxu0 }
 0x310   : > { %v1791_v28 = vsel %vm1790_vm2, %v1784_v26, -inf  ;;  %v968_v27 = vsub.s32 6, %v8322_v31 }
 0x311   : > { %v1786_v29 = vpop.f32.mrf.mxu0  ;;  %1792 = vmax.xlane.f32.xlu0 %v1791_v28  ;;  %v8418_v28 = vadd.f32 %v1559_v18, %v953_v22 }
 0x312   : > { %v1787_v30 = vadd.f32 %v1786_v29, %v8374_v24  ;;  %v1563_v29 = vpop.f32.mrf.mxu1 }
 0x313   : > { %v6290_v32 = vpop.f32.mrf.mxu0 }
 0x314   : > { %v1794_v33 = vsel %vm1790_vm2, %v1787_v30, -inf  ;;  %v8422_v32 = vadd.f32 %v1563_v29, %v953_v22 }
 0x315   : > { %1795 = vmax.xlane.f32.xlu0 %v1794_v33  ;;  %v972_v33 = vsub.s32 7, %v8322_v31 }
 0x39a   : > { %v1793_v35 = vpop.xlane.xlu0 %1792 }
 0x39b   : > { %v1797_v37 = vsub.f32 %v1784_v26, %v1793_v35  ;;  %v6957_v26 = vld [vmem:[#allocation8 + $0x70] sm:$0xff]   ;;  %v1565_v35 = vpop.f32.mrf.mxu1 }
 0x39d   : > { %v1799_v38 = vmul.f32 1.442695, %v1797_v37  ;;  %v6958_v37 = vld [vmem:[#allocation8 + $0x68] sm:$0xff]  }
 0x39e   : > { %v1796_v39 = vpop.xlane.xlu0 %1795 }
 0x39f   : > { %7252 = vpow2.f32 %v1799_v38  ;;  %v1798_v40 = vsub.f32 %v1787_v30, %v1796_v39  ;;  %v8420_v30 = vadd.f32 %v1561_v25, %v957_v23  ;;  %v2181_v38 = vpack.c.bf16 %v8422_v32, %v8418_v28 }
 0x3a0   : > { %v8427_v39 = vadd.f32 %v1565_v35, %v957_v23 }
 0x3a1   : > { %v1801_v41 = vmul.f32 1.442695, %v1798_v40  ;;  %v969_v40 = vrot.slane %v8327_v36, %v968_v27 }
 0x3a3   : > { %7254 = vpow2.f32 %v1801_v41  ;;  %v1645_v41 = vpop.f32.mrf.mxu1 }
 0x3ac   : > { %v7253_v42 = vpop.eup %7252 }
 0x3ad   : > { %v1803_v43 = vsel %vm1790_vm2, %v7253_v42, 0.0 }
 0x3ae   : > { %1804 = vadd.xlane.f32.xlu1 %v1803_v43  ;;  %v973_v43 = vrot.slane %v8327_v36, %v972_v33 }
 0x3b0   : > { %v7255_v44 = vpop.eup %7254 }
 0x3b1   : > { %v1806_v47 = vsel %vm1790_vm2, %v7255_v44, 0.0 }
 0x3b2   : > { %1807 = vadd.xlane.f32.xlu1 %v1806_v47  ;;  %v6959_v47 = vld [vmem:[#allocation8 + $0x60] sm:$0xff]  }
 0x437   : > { %v1805_v48 = vpop.xlane.xlu1 %1804 }
 0x438   : > { %7256 = vrcp.f32 %v1805_v48  ;;  %v8438_v48 = vadd.f32 %v1645_v41, %v969_v40 }
 0x43b   : > { %v1808_v50 = vpop.xlane.xlu1 %1807 }
 0x43c   : > { %7258 = vrcp.f32 %v1808_v50 }
 0x445   : > { %v7257_v54 = vpop.eup %7256 }
 0x446   : > { %v1811_v56 = vmul.f32 %v7257_v54, %v7253_v42  ;;  %v2400_v42 = vpack.c.bf16 %v8427_v39, %v8420_v30 }
 0x449   : > { %v7259_v55 = vpop.eup %7258 }
 0x44a   : > { %v1812_v57 = vmul.f32 %v7259_v55, %v7255_v44  ;;  %v1647_v44 = vpop.f32.mrf.mxu1 }
 0x44b   : > { %v8441_v54 = vadd.f32 %v1647_v44, %v973_v43 }
 0x44c   : > { %v1813_v21 = vpack.c.bf16 %v1812_v57, %v1811_v56  ;;  %v1649_v50 = vpop.f32.mrf.mxu1  ;;  %v6960_v57 = vld [vmem:[#allocation8 + $0x58] sm:$0xff]  }
 0x44d   : > { %v8443_v55 = vadd.f32 %v1649_v50, %v969_v40 }
 0x44e   : > { %6294 = vmatmul.mubr.msk.bf16.vlgmr.msra.gmra.mxu0 %vm1790_vm2, %v1813_v21  ;;  %v1651_v56 = vpop.f32.mrf.mxu1 }
 0x44f   : > { %6298 = vmatpush3.bf16.xpose.msra.mxu0 %v1876_v3  ;;  %6299 = vmatprep.mubr.msk.bf16.mxu0 %vm7907_vm0, %v7906_v52  ;;  %v2182_v21 = vpack.c.bf16 %v8443_v55, %v8438_v48 }
 0x450   : > { %6309 = vmatprep.subr.bf16.mxu0 %v7906_v52 }
 0x456   : > { %6300 = vmatmul.mubr.bf16.vlgmr.msra.gmra.mxu0 %v1875_v49 }
 0x457   : > { %6325 = vmatprep.mubr.msk.bf16.mxu0 %vm7907_vm0, %v7906_v52  ;;  %6310 = vmatpush3.bf16.msra.mxu0 %v6956_v20  ;;  %v6955_v20 = vld [vmem:[#allocation8] sm:$0xff]  }
 0x458   : > { %6311 = vmatprep.subr.bf16.mxu0 %v7906_v52 }
 0x45b   : > { %6312 = vmatpush3.bf16.msra.mxu0 %v6957_v26  ;;  %v6963_v26 = vld [vmem:[#allocation8 + $0x40] sm:$0xff]  }
 0x45c   : > { %6313 = vmatprep.subr.bf16.mxu0 %v7906_v52 }
 0x45f   : > { %6314 = vmatpush3.bf16.msra.mxu0 %v6958_v37 }
 0x460   : > { %6315 = vmatprep.subr.bf16.mxu0 %v7906_v52 }
 0x463   : > { %6316 = vmatpush3.bf16.msra.mxu0 %v6959_v47 }
 0x464   : > { %6317 = vmatprep.subr.bf16.mxu0 %v7906_v52 }
 0x467   : > { %6318 = vmatpush3.bf16.msra.mxu0 %v6960_v57 }
 0x468   : > { %6319 = vmatprep.subr.bf16.mxu0 %v7906_v52 }
 0x50e   : > { %v8394_v59 = vpop.f32.mrf.mxu0 }
 0x510   : > { %v6295_v60 = vpop.f32.mrf.mxu0 }
 0x511   : > { %v8447_v60 = vadd.f32 %v1651_v56, %v973_v43 }
 0x512   : > { %v8396_v61 = vpop.f32.mrf.mxu0 }
 0x513   : > { %v1858_v62 = vpack.c.bf16 %v8396_v61, %v8394_v59  ;;  %v2401_v36 = vpack.c.bf16 %v8447_v60, %v8441_v54  ;;  %v6971_v54 = vld [vmem:[#allocation8 + $0x80] sm:$0xff]  }
 0x514   : > { %v6296_v63 = vpop.f32.mrf.mxu0 }
 0x515   : > { %v6961_v63 = vld [vmem:[#allocation8 + $0x50] sm:$0xff]  }
 0x516   : > { %v1912_v1 = vpop.f32.mrf.mxu0  ;;  %6320 = vmatpush3.bf16.msra.mxu0 %v6961_v63 }
 0x517   : > { %v1913_v2 = vadd.f32 %v1912_v1, %v8374_v24  ;;  %v6962_v1 = vld [vmem:[#allocation8 + $0x48] sm:$0xff]   ;;  %6321 = vmatprep.subr.bf16.mxu0 %v7906_v52 }
 0x518   : > { %v6301_v3 = vpop.f32.mrf.mxu0 }
 0x519   : > { %v1919_v4 = vsel %vm1790_vm2, %v1913_v2, -inf }
 0x51a   : > { %1920 = vmax.xlane.f32.xlu0 %v1919_v4  ;;  %v1915_v45 = vpop.f32.mrf.mxu0  ;;  %6322 = vmatpush3.bf16.msra.mxu0 %v6962_v1 }
 0x51b   : > { %v1916_v46 = vadd.f32 %v1915_v45, %v8374_v24  ;;  %6323 = vmatprep.subr.bf16.mxu0 %v7906_v52 }
 0x51c   : > { %v6302_v49 = vpop.f32.mrf.mxu0 }
 0x51d   : > { %v1922_v5 = vsel %vm1790_vm2, %v1916_v46, -inf }
 0x51e   : > { %1923 = vmax.xlane.f32.xlu1 %v1922_v5  ;;  %v6948_v5 = vld [vmem:[#allocation8 + $0x38] sm:$0xff]   ;;  %6324 = vmatpush3.bf16.msra.mxu0 %v6963_v26 }
 0x51f   : > { %6349 = vmatprep.subr.bf16.mxu0 %v7906_v52 }
 0x5a3   : > { %v1921_v6 = vpop.xlane.xlu0 %1920 }
 0x5a4   : > { %v1925_v8 = vsub.f32 %v1913_v2, %v1921_v6 }
 0x5a6   : > { %v1927_v9 = vmul.f32 1.442695, %v1925_v8  ;;  %v6949_v8 = vld [vmem:[#allocation8 + $0x30] sm:$0xff]  }
 0x5a7   : > { %v1924_v10 = vpop.xlane.xlu1 %1923 }
 0x5a8   : > { %7260 = vpow2.f32 %v1927_v9  ;;  %v1926_v11 = vsub.f32 %v1916_v46, %v1924_v10  ;;  %v6950_v9 = vld [vmem:[#allocation8 + $0x28] sm:$0xff]   ;;  %v6951_v10 = vld [vmem:[#allocation8 + $0x20] sm:$0xff]  }
 0x5aa   : > { %v1929_v12 = vmul.f32 1.442695, %v1926_v11  ;;  %v6952_v11 = vld [vmem:[#allocation8 + $0x18] sm:$0xff]  }
 0x5ac   : > { %7262 = vpow2.f32 %v1929_v12  ;;  %v1731_v12 = vpop.f32.mrf.mxu1 }
 0x5b5   : > { %v7261_v13 = vpop.eup %7260 }
 0x5b6   : > { %v1931_v14 = vsel %vm1790_vm2, %v7261_v13, 0.0 }
 0x5b7   : > { %1932 = vadd.xlane.f32.xlu0 %v1931_v14  ;;  %v8463_v14 = vpop.f32.mrf.mxu1 }
 0x5b9   : > { %v7263_v15 = vpop.eup %7262  ;;  %v1735_v18 = vpop.f32.mrf.mxu1 }
 0x5ba   : > { %v1934_v16 = vsel %vm1790_vm2, %v7263_v15, 0.0 }
 0x5bb   : > { %1935 = vadd.xlane.f32.xlu1 %v1934_v16  ;;  %v985_v16 = vrot.slane %v8363_v7, %v8407_v17  ;;  %v8477_v29 = vpop.f32.mrf.mxu1 }
 0x5bd   : > { %v1732_v22 = vadd.f32 %v1731_v12, %v985_v16  ;;  %v1736_v23 = vadd.f32 %v1735_v18, %v985_v16  ;;  %v6966_v12 = vld [vmem:[#allocation8 + $0xa8] sm:$0xff]   ;;  %v6969_v16 = vld [vmem:[#allocation8 + $0x90] sm:$0xff]  }
 0x5bf   : > { %v2183_v25 = vpack.c.bf16 %v1736_v23, %v1732_v22 }
 0x640   : > { %v1933_v2 = vpop.xlane.xlu0 %1932 }
 0x641   : > { %7264 = vrcp.f32 %v1933_v2 }
 0x644   : > { %v1936_v3 = vpop.xlane.xlu1 %1935 }
 0x645   : > { %7266 = vrcp.f32 %v1936_v3 }
 0x64e   : > { %v7265_v4 = vpop.eup %7264 }
 0x64f   : > { %v1939_v46 = vmul.f32 %v7265_v4, %v7261_v13  ;;  %v6953_v13 = vld [vmem:[#allocation8 + $0x10] sm:$0xff]  }
 0x652   : > { %v7267_v45 = vpop.eup %7266 }
 0x653   : > { %v1940_v49 = vmul.f32 %v7267_v45, %v7263_v15  ;;  %v6954_v15 = vld [vmem:[#allocation8 + $0x8] sm:$0xff]  }
 0x655   : > { %v1941_v6 = vpack.c.bf16 %v1940_v49, %v1939_v46 }
 0x657   : > { %6306 = vmatmul.mubr.msk.bf16.vlgmr.msra.gmra.mxu1 %vm1790_vm2, %v1941_v6 }
 0x658   : > { %6330 = vmatpush3.bf16.msra.mxu1 %v6948_v5  ;;  %6345 = vmatprep.mubr.msk.bf16.mxu1 %vm7907_vm0, %v7906_v52 }
 0x659   : > { %6331 = vmatprep.subr.bf16.mxu1 %v7906_v52 }
 0x65c   : > { %6332 = vmatpush3.bf16.msra.mxu1 %v6949_v8 }
 0x65d   : > { %6333 = vmatprep.subr.bf16.mxu1 %v7906_v52 }
 0x660   : > { %6334 = vmatpush3.bf16.msra.mxu1 %v6950_v9 }
 0x661   : > { %6335 = vmatprep.subr.bf16.mxu1 %v7906_v52 }
 0x664   : > { %6336 = vmatpush3.bf16.msra.mxu1 %v6951_v10  ;;  %v6964_v10 = vld [vmem:[#allocation8 + $0xb8] sm:$0xff]  }
 0x665   : > { %6337 = vmatprep.subr.bf16.mxu1 %v7906_v52 }
 0x668   : > { %6338 = vmatpush3.bf16.msra.mxu1 %v6952_v11  ;;  %v6965_v11 = vld [vmem:[#allocation8 + $0xb0] sm:$0xff]  }
 0x669   : > { %6339 = vmatprep.subr.bf16.mxu1 %v7906_v52 }
 0x66c   : > { %6340 = vmatpush3.bf16.msra.mxu1 %v6953_v13  ;;  %v6967_v13 = vld [vmem:[#allocation8 + $0xa0] sm:$0xff]  }
 0x66d   : > { %6341 = vmatprep.subr.bf16.mxu1 %v7906_v52 }
 0x670   : > { %6342 = vmatpush3.bf16.msra.mxu1 %v6954_v15  ;;  %v6968_v15 = vld [vmem:[#allocation8 + $0x98] sm:$0xff]  }
 0x671   : > { %6343 = vmatprep.subr.bf16.mxu1 %v7906_v52 }
 0x674   : > { %6344 = vmatpush3.bf16.msra.mxu1 %v6955_v20 }
 0x675   : > { %6355 = vmatprep.subr.bf16.mxu1 %v7906_v52 }
 0x677   : > { %6346 = vmatmul.mubr.bf16.vlgmr.msra.gmra.mxu1 %v1858_v62 }
 0x678   : > { %6356 = vmatpush3.bf16.msra.mxu1 %v2183_v25  ;;  %6357 = vmatprep.mubr.msk.bf16.mxu1 %vm7907_vm0, %v7906_v52 }
 0x679   : > { %6381 = vmatprep.subr.bf16.mxu1 %v7906_v52 }
 0x717   : > { %v1979_v35 = vpop.f32.mrf.mxu1 }
 0x719   : > { %v6307_v37 = vpop.f32.mrf.mxu1 }
 0x71a   : > { %v989_v37 = vrot.slane %v8363_v7, %v8410_v19  ;;  %v6970_v7 = vld [vmem:[#allocation8 + $0x88] sm:$0xff]  }
 0x71b   : > { %v1982_v40 = vpop.f32.mrf.mxu1 }
 0x71c   : > { %v1986_v41 = vpack.c.bf16 %v1982_v40, %v1979_v35  ;;  %v1734_v40 = vadd.f32 %v8463_v14, %v989_v37 }
 0x71d   : > { %v6308_v43 = vpop.f32.mrf.mxu1 }
 0x71e   : > { %6326 = vmatmul.mubr.bf16.vlgmr.msra.gmra.mxu0 %v1986_v41  ;;  %v1738_v41 = vadd.f32 %v8477_v29, %v989_v37 }
 0x71f   : > { %6350 = vmatpush3.bf16.xpose.msra.mxu0 %v2182_v21  ;;  %6351 = vmatprep.mubr.msk.bf16.mxu0 %vm7907_vm0, %v7906_v52 }
 0x720   : > { %6361 = vmatprep.subr.bf16.mxu0 %v7906_v52  ;;  %v2402_v43 = vpack.c.bf16 %v1738_v41, %v1734_v40 }
 0x726   : > { %6352 = vmatmul.mubr.bf16.vlgmr.msra.gmra.mxu0 %v2181_v38 }
 0x727   : > { %6377 = vmatprep.mubr.msk.bf16.mxu0 %vm7907_vm0, %v7906_v52  ;;  %6362 = vmatpush3.bf16.msra.mxu0 %v6964_v10 }
 0x728   : > { %6363 = vmatprep.subr.bf16.mxu0 %v7906_v52 }
 0x72b   : > { %6364 = vmatpush3.bf16.msra.mxu0 %v6965_v11 }
 0x72c   : > { %6365 = vmatprep.subr.bf16.mxu0 %v7906_v52 }
 0x72f   : > { %6366 = vmatpush3.bf16.msra.mxu0 %v6966_v12 }
 0x730   : > { %6367 = vmatprep.subr.bf16.mxu0 %v7906_v52 }
 0x733   : > { %6368 = vmatpush3.bf16.msra.mxu0 %v6967_v13 }
 0x734   : > { %6369 = vmatprep.subr.bf16.mxu0 %v7906_v52 }
 0x737   : > { %v8490_v59 = vpop.f32.mrf.mxu1  ;;  %6370 = vmatpush3.bf16.msra.mxu0 %v6968_v15 }
 0x738   : > { %6371 = vmatprep.subr.bf16.mxu0 %v7906_v52 }
 0x739   : > { %v6347_v61 = vpop.f32.mrf.mxu1 }
 0x73b   : > { %v8492_v62 = vpop.f32.mrf.mxu1  ;;  %6372 = vmatpush3.bf16.msra.mxu0 %v6969_v16 }
 0x73c   : > { %6373 = vmatprep.subr.bf16.mxu0 %v7906_v52 }
 0x73d   : > { %v6348_v44 = vpop.f32.mrf.mxu1 }
 0x73f   : > { %6374 = vmatpush3.bf16.msra.mxu0 %v6970_v7 }
 0x740   : > { %6375 = vmatprep.subr.bf16.mxu0 %v7906_v52 }
 0x743   : > { %6376 = vmatpush3.bf16.msra.mxu0 %v6971_v54 }
 0x7de   : > { %v8494_v47 = vpop.f32.mrf.mxu0 }
 0x7e0   : > { %v6327_v48 = vpop.f32.mrf.mxu0 }
 0x7e2   : > { %v8496_v50 = vpop.f32.mrf.mxu0 }
 0x7e4   : > { %v6328_v55 = vpop.f32.mrf.mxu0 }
 0x7e6   : > { %v2218_v56 = vpop.f32.mrf.mxu0 }
 0x7e7   : > { %v2219_v57 = vadd.f32 %v2218_v56, %v8374_v24 }
 0x7e8   : > { %v6353_v28 = vpop.f32.mrf.mxu0 }
 0x7e9   : > { %v2225_v32 = vsel %vm1790_vm2, %v2219_v57, -inf }
 0x7ea   : > { %2226 = vmax.xlane.f32.xlu0 %v2225_v32  ;;  %v2221_v38 = vpop.f32.mrf.mxu0 }
 0x7eb   : > { %v2222_v21 = vadd.f32 %v2221_v38, %v8374_v24 }
 0x7ec   : > { %v6354_v63 = vpop.f32.mrf.mxu0 }
 0x7ed   : > { %v2228_v1 = vsel %vm1790_vm2, %v2222_v21, -inf }
 0x7ee   : > { %2229 = vmax.xlane.f32.xlu1 %v2228_v1 }
 0x873   : > { %v2227_v2 = vpop.xlane.xlu0 %2226 }
 0x874   : > { %v2231_v3 = vsub.f32 %v2219_v57, %v2227_v2 }
 0x876   : > { %v2233_v4 = vmul.f32 1.442695, %v2231_v3 }
 0x877   : > { %v2230_v45 = vpop.xlane.xlu1 %2229 }
 0x878   : > { %7268 = vpow2.f32 %v2233_v4  ;;  %v2232_v46 = vsub.f32 %v2222_v21, %v2230_v45 }
 0x87a   : > { %v2235_v49 = vmul.f32 1.442695, %v2232_v46  ;;  %v2175_v46 = vadd.f32 %v8490_v59, %v8494_v47  ;;  %v6973_v59 = vld [vmem:[#allocation8 + $0xf0] sm:$0xff]   ;;  %v6975_v47 = vld [vmem:[#allocation8 + $0xe0] sm:$0xff]  }
 0x87c   : > { %7270 = vpow2.f32 %v2235_v49 }
 0x885   : > { %v7269_v5 = vpop.eup %7268 }
 0x886   : > { %v2237_v6 = vsel %vm1790_vm2, %v7269_v5, 0.0 }
 0x887   : > { %2238 = vadd.xlane.f32.xlu0 %v2237_v6 }
 0x889   : > { %v7271_v8 = vpop.eup %7270 }
 0x88a   : > { %v2240_v9 = vsel %vm1790_vm2, %v7271_v8, 0.0 }
 0x88b   : > { %2241 = vadd.xlane.f32.xlu1 %v2240_v9 }
 0x910   : > { %v2239_v18 = vpop.xlane.xlu0 %2238 }
 0x911   : > { %7272 = vrcp.f32 %v2239_v18 }
 0x914   : > { %v2242_v20 = vpop.xlane.xlu1 %2241 }
 0x915   : > { %7274 = vrcp.f32 %v2242_v20 }
 0x91e   : > { %v7273_v22 = vpop.eup %7272 }
 0x91f   : > { %v2245_v25 = vmul.f32 %v7273_v22, %v7269_v5  ;;  %v6972_v22 = vld [vmem:[#allocation8 + $0xf8] sm:$0xff]  }
 0x922   : > { %v7275_v23 = vpop.eup %7274 }
 0x923   : > { %v2246_v26 = vmul.f32 %v7275_v23, %v7271_v8  ;;  %v2178_v8 = vadd.f32 %v8492_v62, %v8496_v50  ;;  %v6974_v62 = vld [vmem:[#allocation8 + $0xe8] sm:$0xff]   ;;  %v6976_v50 = vld [vmem:[#allocation8 + $0xd8] sm:$0xff]  }
 0x925   : > { %v2247_v35 = vpack.c.bf16 %v2246_v26, %v2245_v25  ;;  %v6977_v25 = vld [vmem:[#allocation8 + $0xd0] sm:$0xff]   ;;  %v6978_v26 = vld [vmem:[#allocation8 + $0xc8] sm:$0xff]  }
 0x927   : > { %6358 = vmatmul.mubr.msk.bf16.vlgmr.msra.gmra.mxu1 %vm1790_vm2, %v2247_v35  ;;  %v6979_v35 = vld [vmem:[#allocation8 + $0xc0] sm:$0xff]  }
 0x928   : > { %6382 = vmatpush3.bf16.xpose.msra.mxu1 %v2401_v36  ;;  %6383 = vmatprep.mubr.msk.bf16.mxu1 %vm7907_vm0, %v7906_v52 }
 0x929   : > { %6387 = vmatprep.subr.bf16.mxu1 %v7906_v52 }
 0x92f   : > { %6384 = vmatmul.mubr.bf16.vlgmr.msra.gmra.mxu1 %v2400_v42 }
 0x930   : > { %6388 = vmatpush3.bf16.msra.mxu1 %v2402_v43  ;;  %6389 = vmatprep.mubr.msk.bf16.mxu1 %vm7907_vm0, %v7906_v52 }
 0x931   : > { %6393 = vmatprep.subr.bf16.mxu1 %v7906_v52 }
 0x9e7   : > { %v2285_v60 = vpop.f32.mrf.mxu1 }
 0x9e9   : > { %v6359_v36 = vpop.f32.mrf.mxu1 }
 0x9eb   : > { %v2288_v14 = vpop.f32.mrf.mxu1 }
 0x9ec   : > { %v2292_v29 = vpack.c.bf16 %v2288_v14, %v2285_v60  ;;  %v5891_v60 = vld [vmem:[#allocation10] ss:$0 sm:$0xff] }
 0x9ed   : > { %v6360_v61 = vpop.f32.mrf.mxu1 }
 0x9ee   : > { %6378 = vmatmul.mubr.bf16.vlgmr.msra.gmra.mxu0 %v2292_v29 }
 0x9ef   : > { %v2437_v30 = vpop.f32.mrf.mxu1  ;;  %2812 = vmatprep.mubr.bf16.mxu0 %v7905_v0 }
 0x9f0   : > { %v2438_v39 = vadd.f32 %v2437_v30, %v8374_v24 }
 0x9f1   : > { %v6385_v42 = vpop.f32.mrf.mxu1 }
 0x9f2   : > { %v2444_v44 = vsel %vm1790_vm2, %v2438_v39, -inf }
 0x9f3   : > { %2445 = vmax.xlane.f32.xlu0 %v2444_v44  ;;  %v2440_v48 = vpop.f32.mrf.mxu1 }
 0x9f4   : > { %v2441_v55 = vadd.f32 %v2440_v48, %v8374_v24 }
 0x9f5   : > { %v6386_v56 = vpop.f32.mrf.mxu1 }
 0x9f6   : > { %v2447_v57 = vsel %vm1790_vm2, %v2441_v55, -inf }
 0x9f7   : > { %2448 = vmax.xlane.f32.xlu1 %v2447_v57  ;;  %v6980_v57 = vld [vmem:[#allocation14 + $0x70] ss:$8 sps:$4 sm:$0xff]  }
 0xa7c   : > { %v2446_v28 = vpop.xlane.xlu0 %2445 }
 0xa7d   : > { %v2450_v32 = vsub.f32 %v2438_v39, %v2446_v28  ;;  %v7332_v39 = vld [vmem:[%s8304_s21] sm:$0xff]  ;;  %v6982_v28 = vld [vmem:[#allocation14 + $0x74] ss:$8 sps:$4 sm:$0xff]  }
 0xa7e   : > { %2780 = vmatprep.subr.bf16.mxu0 %v6982_v28  ;;  %v7016_v28 = vld [vmem:[#allocation17 + $0x48] sm:$0xff]  }
 0xa7f   : > { %v2452_v38 = vmul.f32 1.442695, %v2450_v32  ;;  %2781 = vmatpush1.bf16.msra.mxu0 %v6980_v57  ;;  %v7015_v57 = vld [vmem:[#allocation17 + $0x10] sm:$0xff]  }
 0xa80   : > { %v2449_v21 = vpop.xlane.xlu1 %2448 }
 0xa81   : > { %7276 = vpow2.f32 %v2452_v38  ;;  %v2451_v63 = vsub.f32 %v2441_v55, %v2449_v21  ;;  %v7333_v55 = vld [vmem:[%s8304_s21 + $0x8] sm:$0xff] }
 0xa83   : > { %v2454_v1 = vmul.f32 1.442695, %v2451_v63 }
 0xa85   : > { %7278 = vpow2.f32 %v2454_v1 }
 0xa8e   : > { %v7277_v2 = vpop.eup %7276 }
 0xa8f   : > { %v2456_v3 = vsel %vm1790_vm2, %v7277_v2, 0.0 }
 0xa90   : > { %2457 = vadd.xlane.f32.xlu0 %v2456_v3 }
 0xa92   : > { %v7279_v4 = vpop.eup %7278 }
 0xa93   : > { %v2459_v45 = vsel %vm1790_vm2, %v7279_v4, 0.0 }
 0xa94   : > { %2460 = vadd.xlane.f32.xlu1 %v2459_v45  ;;  %v6985_v45 = vld [vmem:[#allocation14 + $0x64] ss:$8 sps:$4 sm:$0xff]  }
 0xa95   : > { %2782 = vmatprep.subr.bf16.mxu0 %v6985_v45 }
 0xaae   : > { %v2391_v49 = vpop.f32.mrf.mxu0 }
 0xaaf   : > { %v2398_v5 = vadd.f32 %v2391_v49, %v2175_v46  ;;  %v6983_v46 = vld [vmem:[#allocation14 + $0x60] ss:$8 sps:$4 sm:$0xff]   ;;  %v6988_v49 = vld [vmem:[#allocation14 + $0x54] ss:$8 sps:$4 sm:$0xff]  }
 0xab0   : > { %v6379_v6 = vpop.f32.mrf.mxu0  ;;  %2783 = vmatpush1.bf16.msra.mxu0 %v6983_v46 }
 0xab1   : > { %2784 = vmatprep.subr.bf16.mxu0 %v6988_v49  ;;  %v6989_v6 = vld [vmem:[#allocation14 + $0x40] ss:$8 sps:$4 sm:$0xff]  }
 0xab2   : > { %v2394_v9 = vpop.f32.mrf.mxu0 }
 0xab3   : > { %v2399_v10 = vadd.f32 %v2394_v9, %v2178_v8  ;;  %v6991_v8 = vld [vmem:[#allocation14 + $0x44] ss:$8 sps:$4 sm:$0xff]   ;;  %v6994_v9 = vld [vmem:[#allocation14 + $0x34] ss:$8 sps:$4 sm:$0xff]  }
 0xab4   : > { %v6380_v11 = vpop.f32.mrf.mxu0 }
 0xab5   : > { %v6997_v11 = vld [vmem:[#allocation14 + $0x24] ss:$8 sps:$4 sm:$0xff]  }
 0xb19   : > { %v2458_v12 = vpop.xlane.xlu0 %2457 }
 0xb1a   : > { %7280 = vrcp.f32 %v2458_v12  ;;  %v6995_v12 = vld [vmem:[#allocation14 + $0x20] ss:$8 sps:$4 sm:$0xff]  }
 0xb1d   : > { %v2461_v13 = vpop.xlane.xlu1 %2460 }
 0xb1e   : > { %7282 = vrcp.f32 %v2461_v13  ;;  %v7000_v13 = vld [vmem:[#allocation14 + $0x14] ss:$8 sps:$4 sm:$0xff]  }
 0xb27   : > { %v7281_v15 = vpop.eup %7280 }
 0xb28   : > { %v2464_v18 = vmul.f32 %v7281_v15, %v7277_v2  ;;  %v6998_v15 = vld [vmem:[#allocation14 + $0x10] ss:$8 sps:$4 sm:$0xff]  }
 0xb2b   : > { %v7283_v16 = vpop.eup %7282 }
 0xb2c   : > { %v2465_v20 = vmul.f32 %v7283_v16, %v7279_v4  ;;  %v7003_v16 = vld [vmem:[#allocation14 + $0x4] ss:$8 sps:$4 sm:$0xff]  }
 0xb2e   : > { %v2466_v23 = vpack.c.bf16 %v2465_v20, %v2464_v18  ;;  %v7001_v18 = vld [vmem:[#allocation14] ss:$8 sps:$4 sm:$0xff]  }
 0xb2f   : > { %v7004_v20 = vld [vmem:[#allocation17 + $0x78] sm:$0xff]  }
 0xb30   : > { %6390 = vmatmul.mubr.msk.bf16.vlgmr.msra.gmra.mxu1 %vm1790_vm2, %v2466_v23  ;;  %v7006_v23 = vld [vmem:[#allocation17 + $0x70] sm:$0xff]  }
 0xb31   : > { %6394 = vmatpush3.bf16.msra.mxu1 %v6972_v22  ;;  %6409 = vmatprep.mubr.msk.bf16.mxu1 %vm7907_vm0, %v7906_v52  ;;  %v7005_v22 = vld [vmem:[#allocation17 + $0x38] sm:$0xff]  }
 0xb32   : > { %6395 = vmatprep.subr.bf16.mxu1 %v7906_v52 }
 0xb35   : > { %6396 = vmatpush3.bf16.msra.mxu1 %v6973_v59  ;;  %v7007_v59 = vld [vmem:[#allocation17 + $0x30] sm:$0xff]  }
 0xb36   : > { %6397 = vmatprep.subr.bf16.mxu1 %v7906_v52 }
 0xb39   : > { %6398 = vmatpush3.bf16.msra.mxu1 %v6974_v62  ;;  %v7008_v62 = vld [vmem:[#allocation17 + $0x68] sm:$0xff]  }
 0xb3a   : > { %6399 = vmatprep.subr.bf16.mxu1 %v7906_v52 }
 0xb3d   : > { %6400 = vmatpush3.bf16.msra.mxu1 %v6975_v47  ;;  %v7009_v47 = vld [vmem:[#allocation17 + $0x28] sm:$0xff]  }
 0xb3e   : > { %6401 = vmatprep.subr.bf16.mxu1 %v7906_v52 }
 0xb41   : > { %6402 = vmatpush3.bf16.msra.mxu1 %v6976_v50  ;;  %v7010_v50 = vld [vmem:[#allocation17 + $0x60] sm:$0xff]  }
 0xb42   : > { %6403 = vmatprep.subr.bf16.mxu1 %v7906_v52 }
 0xb45   : > { %6404 = vmatpush3.bf16.msra.mxu1 %v6977_v25  ;;  %v7011_v25 = vld [vmem:[#allocation17 + $0x20] sm:$0xff]  }
 0xb46   : > { %6405 = vmatprep.subr.bf16.mxu1 %v7906_v52 }
 0xb49   : > { %6406 = vmatpush3.bf16.msra.mxu1 %v6978_v26  ;;  %v7012_v26 = vld [vmem:[#allocation17 + $0x58] sm:$0xff]  }
 0xb4a   : > { %6407 = vmatprep.subr.bf16.mxu1 %v7906_v52 }
 0xb4d   : > { %6408 = vmatpush3.bf16.msra.mxu1 %v6979_v35  ;;  %v7013_v35 = vld [vmem:[#allocation17 + $0x18] sm:$0xff]  }
 0xb4e   : > { %6171 = vmatprep.subr.bf16.mxu1 %v7004_v20 }
 0xbf0   : > { %v2504_v37 = vpop.f32.mrf.mxu1 }
 0xbf2   : > { %v6391_v40 = vpop.f32.mrf.mxu1 }
 0xbf4   : > { %v2507_v41 = vpop.f32.mrf.mxu1 }
 0xbf5   : > { %v2511_v43 = vpack.c.bf16 %v2507_v41, %v2504_v37 }
 0xbf6   : > { %v6392_v7 = vpop.f32.mrf.mxu1 }
 0xbf7   : > { %6410 = vmatmul.mubr.bf16.vlgmr.msra.gmra.mxu1 %v2511_v43 }
 0xbf8   : > { %6172 = vmatpush3.bf16.msra.mxu1 %v7005_v22 }
 0xbf9   : > { %6173 = vmatprep.subr.bf16.mxu1 %v7006_v23 }
 0xbfc   : > { %6174 = vmatpush3.bf16.msra.mxu1 %v7007_v59 }
 0xbfd   : > { %6175 = vmatprep.subr.bf16.mxu1 %v7008_v62 }
 0xc00   : > { %6176 = vmatpush3.bf16.msra.mxu1 %v7009_v47 }
 0xc01   : > { %6177 = vmatprep.subr.bf16.mxu1 %v7010_v50 }
 0xc04   : > { %6178 = vmatpush3.bf16.msra.mxu1 %v7011_v25 }
 0xc05   : > { %6179 = vmatprep.subr.bf16.mxu1 %v7012_v26 }
 0xc08   : > { %6180 = vmatpush3.bf16.msra.mxu1 %v7013_v35  ;;  %v7020_v35 = vld [vmem:[#allocation5 + $0x5a0] ss:$48 sps:$4 sm:$0xff]  }
 0xcb7   : > { %v2610_v54 = vpop.f32.mrf.mxu1 }
 0xcb8   : > { %v2617_v36 = vadd.f32 %v2610_v54, %v2398_v5  ;;  %v6986_v5 = vld [vmem:[#allocation14 + $0x50] ss:$8 sps:$4 sm:$0xff]  }
 0xcb9   : > { %v6411_v14 = vpop.f32.mrf.mxu1  ;;  %2785 = vmatpush1.bf16.msra.mxu0 %v6986_v5 }
 0xcba   : > { %v2626_v29 = vadd.f32 %v5891_v60, %v2617_v36  ;;  %2786 = vmatprep.subr.bf16.mxu0 %v6991_v8  ;;  %v5892_v14 = vld [vmem:[#allocation11] ss:$0 sm:$0xff] }
 0xcbb   : > { %v2613_v61 = vpop.f32.mrf.mxu1 }
 0xcbc   : > { %v2618_v30 = vadd.f32 %v2613_v61, %v2399_v10  ;;  %v2628_v42 = vadd.f32 %v7332_v39, %v2626_v29  ;;  %v6992_v10 = vld [vmem:[#allocation14 + $0x30] ss:$8 sps:$4 sm:$0xff]   ;;  %v5893_v39 = vld [vmem:[#allocation13] ss:$0 sm:$0xff] }
 0xcbd   : > { %v6412_v44 = vpop.f32.mrf.mxu1  ;;  %2787 = vmatpush1.bf16.msra.mxu0 %v6989_v6 }
 0xcbe   : > { %v2627_v48 = vadd.f32 %v5891_v60, %v2618_v30  ;;  %2630 = vadd.xlane.f32.xlu0 %v2628_v42  ;;  %2788 = vmatprep.subr.bf16.mxu0 %v6994_v9 }
 0xcc0   : > { %v2629_v56 = vadd.f32 %v7333_v55, %v2627_v48 }
 0xcc1   : > { %2789 = vmatpush1.bf16.msra.mxu0 %v6992_v10 }
 0xcc2   : > { %2632 = vadd.xlane.f32.xlu1 %v2629_v56  ;;  %2790 = vmatprep.subr.bf16.mxu0 %v6997_v11 }
 0xcc5   : > { %2791 = vmatpush1.bf16.msra.mxu0 %v6995_v12 }
 0xcc6   : > { %2792 = vmatprep.subr.bf16.mxu0 %v7000_v13 }
 0xcc9   : > { %2793 = vmatpush1.bf16.msra.mxu0 %v6998_v15 }
 0xcca   : > { %2794 = vmatprep.subr.bf16.mxu0 %v7003_v16 }
 0xccd   : > { %2795 = vmatpush1.bf16.msra.mxu0 %v7001_v18  ;;  %v5910_v18 = vld [vmem:[#allocation19] ss:$0 sm:$0xff] }
 0xd47   : > { %v2631_v32 = vpop.xlane.xlu0 %2630 }
 0xd48   : > { %v2635_v38 = vmul.f32 0.0078125, %v2631_v32  ;;  %v7017_v32 = vld [vmem:[#allocation17 + $0x8] sm:$0xff]  }
 0xd4a   : > { %v8551_v21 = vsub.f32 %v2628_v42, %v2635_v38  ;;  %v7018_v38 = vld [vmem:[#allocation17 + $0x40] sm:$0xff]  }
 0xd4b   : > { %v2633_v63 = vpop.xlane.xlu1 %2632 }
 0xd4c   : > { %v2636_v1 = vmul.f32 0.0078125, %v2633_v63  ;;  %v2639_v2 = vmul.f32 %v8551_v21, %v8551_v21  ;;  %v2688_v63 = vld [vmem:[#allocation16] sm:$0x3] }
 0xd4e   : > { %v8555_v3 = vsub.f32 %v2629_v56, %v2636_v1  ;;  %2641 = vadd.xlane.f32.xlu0 %v2639_v2  ;;  %v7014_v56 = vld [vmem:[#allocation17 + $0x50] sm:$0xff]   ;;  %v2697_v2 = vrot.slane %v2688_v63, %v8325_v34 }
 0xd4f   : > { %6181 = vmatprep.subr.bf16.mxu1 %v7014_v56  ;;  %v7032_v56 = vld [vmem:[#allocation5 + $0x4e0] ss:$48 sps:$4 sm:$0xff]  }
 0xd50   : > { %v2640_v4 = vmul.f32 %v8555_v3, %v8555_v3  ;;  %6182 = vmatpush3.bf16.msra.mxu1 %v7015_v57  ;;  %v7035_v57 = vld [vmem:[#allocation5 + $0x4e8] ss:$48 sps:$4 sm:$0xff]  }
 0xd51   : > { %6183 = vmatprep.subr.bf16.mxu1 %v7016_v28  ;;  %v7040_v28 = vld [vmem:[#allocation5 + $0x484] ss:$48 sps:$4 sm:$0xff]  }
 0xd52   : > { %2643 = vadd.xlane.f32.xlu1 %v2640_v4 }
 0xd54   : > { %6184 = vmatpush3.bf16.msra.mxu1 %v7017_v32  ;;  %v7043_v32 = vld [vmem:[#allocation5 + $0x48c] ss:$48 sps:$4 sm:$0xff]  }
 0xd55   : > { %6185 = vmatprep.subr.bf16.mxu1 %v7018_v38  ;;  %v7038_v38 = vld [vmem:[#allocation5 + $0x480] ss:$48 sps:$4 sm:$0xff]  }
 0xdd7   : > { %v2642_v37 = vpop.xlane.xlu0 %2641 }
 0xdd8   : > { %v2645_v40 = vmul.f32 0.0078125, %v2642_v37  ;;  %v7022_v37 = vld [vmem:[#allocation5 + $0x5a4] ss:$48 sps:$4 sm:$0xff]  }
 0xdd9   : > { %3690 = vmatprep.subr.bf16.mxu0 %v7022_v37 }
 0xdda   : > { %v2647_v41 = vadd.f32 1e-05, %v2645_v40  ;;  %v7023_v40 = vld [vmem:[#allocation5 + $0x5a8] ss:$48 sps:$4 sm:$0xff]  }
 0xddb   : > { %v2644_v43 = vpop.xlane.xlu1 %2643 }
 0xddc   : > { %7284 = vrsqrt.f32 %v2647_v41  ;;  %v2646_v7 = vmul.f32 0.0078125, %v2644_v43  ;;  %v7025_v41 = vld [vmem:[#allocation5 + $0x5ac] ss:$48 sps:$4 sm:$0xff]  }
 0xdde   : > { %v2648_v54 = vadd.f32 1e-05, %v2646_v7 }
 0xde0   : > { %7286 = vrsqrt.f32 %v2648_v54 }
 0xde9   : > { %v7285_v60 = vpop.eup %7284 }
 0xdea   : > { %v2651_v36 = vmul.f32 %v7285_v60, %v8551_v21  ;;  %v7019_v21 = vld [vmem:[#allocation17] sm:$0xff]  }
 0xdeb   : > { %6186 = vmatpush3.bf16.msra.mxu1 %v7019_v21  ;;  %v7041_v21 = vld [vmem:[#allocation5 + $0x488] ss:$48 sps:$4 sm:$0xff]  }
 0xdec   : > { %v2660_v30 = vmul.f32 %v5892_v14, %v2651_v36  ;;  %3733 = vmatprep.subr.bf16.mxu1 %v7025_v41 }
 0xded   : > { %v7287_v29 = vpop.eup %7286 }
 0xdee   : > { %v2652_v61 = vmul.f32 %v7287_v29, %v8555_v3  ;;  %v2669_v44 = vadd.f32 %v5893_v39, %v2660_v30  ;;  %v2693_v3 = vrot.slane %v2688_v63, %v8350_v58  ;;  %v7028_v30 = vld [vmem:[#allocation5 + $0x544] ss:$48 sps:$4 sm:$0xff]  }
 0xdef   : > { %v7046_v63 = vld [vmem:[#allocation5 + $0x424] ss:$48 sps:$4 sm:$0xff]  }
 0xdf0   : > { %v2661_v42 = vmul.f32 %v5892_v14, %v2652_v61 }
 0xdf2   : > { %v2670_v48 = vadd.f32 %v5893_v39, %v2661_v42  ;;  %v7031_v39 = vld [vmem:[#allocation5 + $0x54c] ss:$48 sps:$4 sm:$0xff]   ;;  %v7026_v42 = vld [vmem:[#allocation5 + $0x540] ss:$48 sps:$4 sm:$0xff]  }
 0xdf4   : > { %v2671_v55 = vpack.c.bf16 %v2670_v48, %v2669_v44 }
 0xdf6   : > { %2813 = vmatmul.mubr.bf16.vlgmr.msra.gmra.mxu0 %v2671_v55  ;;  %v7037_v55 = vld [vmem:[#allocation5 + $0x4ec] ss:$48 sps:$4 sm:$0xff]  }
 0xdf7   : > { %3722 = vmatprep.mubr.bf16.mxu0 %v7905_v0  ;;  %3691 = vmatpush1.bf16.msra.mxu0 %v7020_v35 }
 0xdf8   : > { %3692 = vmatprep.subr.bf16.mxu0 %v7028_v30  ;;  %v7079_v30 = vld [vmem:[#allocation5 + $0x55c] ss:$48 sps:$4 sm:$0xff]  }
 0xdfb   : > { %3693 = vmatpush1.bf16.msra.mxu0 %v7026_v42  ;;  %v7085_v42 = vld [vmem:[#allocation5 + $0x4fc] ss:$48 sps:$4 sm:$0xff]  }
 0xeb6   : > { %v2814_v1 = vpop.f32.mrf.mxu0 }
 0xeb7   : > { %v2815_v5 = vadd.f32 %v2814_v1, %v2693_v3  ;;  %v7049_v1 = vld [vmem:[#allocation5 + $0x42c] ss:$48 sps:$4 sm:$0xff]  }
 0xeb8   : > { %v2816_v4 = vpop.f32.mrf.mxu0 }
 0xeb9   : > { %v2817_v46 = vadd.f32 %v2816_v4, %v2697_v2  ;;  %v2823_v12 = vmax.f32 %v2815_v5, 0.0  ;;  %v7052_v4 = vld [vmem:[#allocation5 + $0x3c4] ss:$48 sps:$4 sm:$0xff]  }
 0xeba   : > { %v2818_v45 = vpop.f32.mrf.mxu0  ;;  %v7058_v5 = vld [vmem:[#allocation5 + $0x364] ss:$48 sps:$4 sm:$0xff]  }
 0xebb   : > { %v2819_v49 = vadd.f32 %v2818_v45, %v2693_v3  ;;  %v2824_v10 = vmax.f32 %v2817_v46, 0.0  ;;  %v7047_v3 = vld [vmem:[#allocation5 + $0x428] ss:$48 sps:$4 sm:$0xff]   ;;  %v7055_v45 = vld [vmem:[#allocation5 + $0x3cc] ss:$48 sps:$4 sm:$0xff]  }
 0xebc   : > { %v2820_v6 = vpop.f32.mrf.mxu0  ;;  %v7050_v46 = vld [vmem:[#allocation5 + $0x3c0] ss:$48 sps:$4 sm:$0xff]  }
 0xebd   : > { %v2821_v8 = vadd.f32 %v2820_v6, %v2697_v2  ;;  %v2825_v9 = vmax.f32 %v2819_v49, 0.0  ;;  %v7044_v2 = vld [vmem:[#allocation5 + $0x420] ss:$48 sps:$4 sm:$0xff]   ;;  %v7053_v49 = vld [vmem:[#allocation5 + $0x3c8] ss:$48 sps:$4 sm:$0xff]  }
 0xebe   : > { %v7061_v6 = vld [vmem:[#allocation5 + $0x36c] ss:$48 sps:$4 sm:$0xff]  }
 0xebf   : > { %v2826_v11 = vmax.f32 %v2821_v8, 0.0  ;;  %v2827_v15 = vpack.c.bf16 %v2825_v9, %v2823_v12  ;;  %v7056_v8 = vld [vmem:[#allocation5 + $0x360] ss:$48 sps:$4 sm:$0xff]   ;;  %v7059_v9 = vld [vmem:[#allocation5 + $0x368] ss:$48 sps:$4 sm:$0xff]  }
 0xec0   : > { %v7065_v12 = vld [vmem:[#allocation5 + $0x308] ss:$48 sps:$4 sm:$0xff]  }
 0xec1   : > { %v2828_v13 = vpack.c.bf16 %v2826_v11, %v2824_v10  ;;  %v7062_v10 = vld [vmem:[#allocation5 + $0x300] ss:$48 sps:$4 sm:$0xff]   ;;  %v7064_v11 = vld [vmem:[#allocation5 + $0x304] ss:$48 sps:$4 sm:$0xff]  }
 0xec3   : > { %2996 = vmatprep.mubr.bf16.mxu1 %v2828_v13  ;;  %v7067_v13 = vld [vmem:[#allocation5 + $0x30c] ss:$48 sps:$4 sm:$0xff]  }
 0xec4   : > { %2997 = vmatmul.mubr.bf16.vlgmr.msra.gmra.mxu1 %v2827_v15  ;;  %v7070_v15 = vld [vmem:[#allocation5 + $0x5b4] ss:$48 sps:$4 sm:$0xff]  }
 0xec5   : > { %3765 = vmatprep.mubr.bf16.mxu1 %v7905_v0  ;;  %3734 = vmatpush1.bf16.msra.mxu1 %v7023_v40  ;;  %v5928_v40 = vld [vmem:[#allocation22] ss:$0 sm:$0xff] }
 0xec6   : > { %3735 = vmatprep.subr.bf16.mxu1 %v7031_v39  ;;  %v7082_v39 = vld [vmem:[#allocation5 + $0x4f4] ss:$48 sps:$4 sm:$0xff]  }
 0xf84   : > { %v6187_v16 = vpop.f32.mrf.mxu1 }
 0xf86   : > { %v6188_v20 = vpop.f32.mrf.mxu1 }
 0xf87   : > { %v6189_v22 = vadd.f32 %v6188_v20, %v6187_v16  ;;  %v7073_v16 = vld [vmem:[#allocation5 + $0x5bc] ss:$48 sps:$4 sm:$0xff]  }
 0xf88   : > { %v6190_v23 = vpop.f32.mrf.mxu1 }
 0xf89   : > { %v2999_v59 = vadd.f32 %v6189_v22, %v5910_v18 }
 0xf8a   : > { %v6191_v62 = vpop.f32.mrf.mxu1 }
 0xf8b   : > { %v6192_v47 = vadd.f32 %v6191_v62, %v6190_v23  ;;  %v3005_v50 = vadd.f32 %v2999_v59, %v2669_v44  ;;  %v7029_v44 = vld [vmem:[#allocation5 + $0x548] ss:$48 sps:$4 sm:$0xff]  }
 0xf8c   : > { %3736 = vmatpush1.bf16.msra.mxu1 %v7029_v44  ;;  %v7080_v44 = vld [vmem:[#allocation5 + $0x4f0] ss:$48 sps:$4 sm:$0xff]  }
 0xf8d   : > { %v3002_v25 = vadd.f32 %v6192_v47, %v5910_v18  ;;  %3007 = vadd.xlane.f32.xlu0 %v3005_v50  ;;  %3737 = vmatprep.subr.bf16.mxu1 %v7037_v55  ;;  %v7088_v55 = vld [vmem:[#allocation5 + $0x494] ss:$48 sps:$4 sm:$0xff]  }
 0xf8f   : > { %v3006_v26 = vadd.f32 %v3002_v25, %v2670_v48  ;;  %v7034_v48 = vld [vmem:[#allocation5 + $0x4e4] ss:$48 sps:$4 sm:$0xff]  }
 0xf90   : > { %3694 = vmatprep.subr.bf16.mxu0 %v7034_v48  ;;  %3738 = vmatpush1.bf16.msra.mxu1 %v7035_v57  ;;  %v5927_v25 = vld [vmem:[#allocation20] ss:$0 sm:$0xff]  ;;  %v7083_v48 = vld [vmem:[#allocation5 + $0x4f8] ss:$48 sps:$4 sm:$0xff]   ;;  %v7086_v57 = vld [vmem:[#allocation5 + $0x490] ss:$48 sps:$4 sm:$0xff]  }
 0xf91   : > { %3009 = vadd.xlane.f32.xlu1 %v3006_v26  ;;  %3695 = vmatpush1.bf16.msra.mxu0 %v7032_v56  ;;  %v7091_v56 = vld [vmem:[#allocation5 + $0x49c] ss:$48 sps:$4 sm:$0xff]  }
 0xf92   : > { %3696 = vmatprep.subr.bf16.mxu0 %v7040_v28  ;;  %3739 = vmatprep.subr.bf16.mxu1 %v7043_v32  ;;  %v7089_v28 = vld [vmem:[#allocation5 + $0x498] ss:$48 sps:$4 sm:$0xff]   ;;  %v7094_v32 = vld [vmem:[#allocation5 + $0x434] ss:$48 sps:$4 sm:$0xff]  }
 0xf94   : > { %3740 = vmatpush1.bf16.msra.mxu1 %v7041_v21  ;;  %v7092_v21 = vld [vmem:[#allocation5 + $0x430] ss:$48 sps:$4 sm:$0xff]  }
 0xf95   : > { %3697 = vmatpush1.bf16.msra.mxu0 %v7038_v38  ;;  %3741 = vmatprep.subr.bf16.mxu1 %v7049_v1  ;;  %v7097_v38 = vld [vmem:[#allocation5 + $0x43c] ss:$48 sps:$4 sm:$0xff]   ;;  %v7100_v1 = vld [vmem:[#allocation5 + $0x3d4] ss:$48 sps:$4 sm:$0xff]  }
 0xf96   : > { %3698 = vmatprep.subr.bf16.mxu0 %v7046_v63  ;;  %v7095_v63 = vld [vmem:[#allocation5 + $0x438] ss:$48 sps:$4 sm:$0xff]  }
 0xf98   : > { %3742 = vmatpush1.bf16.msra.mxu1 %v7047_v3  ;;  %v7098_v3 = vld [vmem:[#allocation5 + $0x3d0] ss:$48 sps:$4 sm:$0xff]  }
 0xf99   : > { %3699 = vmatpush1.bf16.msra.mxu0 %v7044_v2  ;;  %3743 = vmatprep.subr.bf16.mxu1 %v7055_v45  ;;  %v7103_v2 = vld [vmem:[#allocation5 + $0x3dc] ss:$48 sps:$4 sm:$0xff]   ;;  %v7106_v45 = vld [vmem:[#allocation5 + $0x374] ss:$48 sps:$4 sm:$0xff]  }
 0xf9a   : > { %3700 = vmatprep.subr.bf16.mxu0 %v7052_v4  ;;  %v7101_v4 = vld [vmem:[#allocation5 + $0x3d8] ss:$48 sps:$4 sm:$0xff]  }
 0xf9c   : > { %3744 = vmatpush1.bf16.msra.mxu1 %v7053_v49  ;;  %v7104_v49 = vld [vmem:[#allocation5 + $0x370] ss:$48 sps:$4 sm:$0xff]  }
 0xf9d   : > { %3701 = vmatpush1.bf16.msra.mxu0 %v7050_v46  ;;  %3745 = vmatprep.subr.bf16.mxu1 %v7061_v6  ;;  %v7109_v46 = vld [vmem:[#allocation5 + $0x37c] ss:$48 sps:$4 sm:$0xff]   ;;  %v7112_v6 = vld [vmem:[#allocation5 + $0x314] ss:$48 sps:$4 sm:$0xff]  }
 0xf9e   : > { %3702 = vmatprep.subr.bf16.mxu0 %v7058_v5  ;;  %v7107_v5 = vld [vmem:[#allocation5 + $0x378] ss:$48 sps:$4 sm:$0xff]  }
 0xfa0   : > { %3746 = vmatpush1.bf16.msra.mxu1 %v7059_v9  ;;  %v7110_v9 = vld [vmem:[#allocation5 + $0x310] ss:$48 sps:$4 sm:$0xff]  }
 0xfa1   : > { %3703 = vmatpush1.bf16.msra.mxu0 %v7056_v8  ;;  %3747 = vmatprep.subr.bf16.mxu1 %v7067_v13  ;;  %v7115_v8 = vld [vmem:[#allocation5 + $0x31c] ss:$48 sps:$4 sm:$0xff]   ;;  %v7116_v13 = vld [vmem:[#allocation5 + $0x5c0] ss:$48 sps:$4 sm:$0xff]  }
 0xfa2   : > { %3704 = vmatprep.subr.bf16.mxu0 %v7064_v11  ;;  %v7118_v11 = vld [vmem:[#allocation5 + $0x5c4] ss:$48 sps:$4 sm:$0xff]  }
 0xfa4   : > { %3748 = vmatpush1.bf16.msra.mxu1 %v7065_v12  ;;  %v7121_v12 = vld [vmem:[#allocation5 + $0x5cc] ss:$48 sps:$4 sm:$0xff]  }
 0xfa5   : > { %3705 = vmatpush1.bf16.msra.mxu0 %v7062_v10  ;;  %3819 = vmatprep.subr.bf16.mxu1 %v7073_v16  ;;  %v7113_v10 = vld [vmem:[#allocation5 + $0x318] ss:$48 sps:$4 sm:$0xff]   ;;  %v7124_v16 = vld [vmem:[#allocation5 + $0x564] ss:$48 sps:$4 sm:$0xff]  }
 0xfa6   : > { %3776 = vmatprep.subr.bf16.mxu0 %v7070_v15  ;;  %v7119_v15 = vld [vmem:[#allocation5 + $0x5c8] ss:$48 sps:$4 sm:$0xff]  }
0x1016   : > { %v3008_v43 = vpop.xlane.xlu0 %3007 }
0x1017   : > { %v3011_v7 = vmul.f32 0.0078125, %v3008_v43 }
0x1019   : > { %v8565_v54 = vsub.f32 %v3005_v50, %v3011_v7 }
0x101a   : > { %v3010_v60 = vpop.xlane.xlu1 %3009 }
0x101b   : > { %v3012_v36 = vmul.f32 0.0078125, %v3010_v60  ;;  %v3015_v14 = vmul.f32 %v8565_v54, %v8565_v54  ;;  %v7068_v60 = vld [vmem:[#allocation5 + $0x5b0] ss:$48 sps:$4 sm:$0xff]  }
0x101d   : > { %v8569_v29 = vsub.f32 %v3006_v26, %v3012_v36  ;;  %3017 = vadd.xlane.f32.xlu0 %v3015_v14  ;;  %v7071_v36 = vld [vmem:[#allocation5 + $0x5b8] ss:$48 sps:$4 sm:$0xff]  }
0x101f   : > { %v3016_v61 = vmul.f32 %v8569_v29, %v8569_v29 }
0x1021   : > { %3019 = vadd.xlane.f32.xlu1 %v3016_v61  ;;  %v7076_v61 = vld [vmem:[#allocation5 + $0x554] ss:$48 sps:$4 sm:$0xff]  }
0x10a6   : > { %v3018_v18 = vpop.xlane.xlu0 %3017 }
0x10a7   : > { %v3021_v20 = vmul.f32 0.0078125, %v3018_v18  ;;  %v7127_v18 = vld [vmem:[#allocation5 + $0x56c] ss:$48 sps:$4 sm:$0xff]  }
0x10a9   : > { %v3023_v22 = vadd.f32 1e-05, %v3021_v20  ;;  %v7122_v20 = vld [vmem:[#allocation5 + $0x560] ss:$48 sps:$4 sm:$0xff]  }
0x10aa   : > { %v3020_v23 = vpop.xlane.xlu1 %3019 }
0x10ab   : > { %7288 = vrsqrt.f32 %v3023_v22  ;;  %v3022_v59 = vmul.f32 0.0078125, %v3020_v23  ;;  %v7125_v22 = vld [vmem:[#allocation5 + $0x568] ss:$48 sps:$4 sm:$0xff]   ;;  %v7130_v23 = vld [vmem:[#allocation5 + $0x504] ss:$48 sps:$4 sm:$0xff]  }
0x10ad   : > { %v3024_v62 = vadd.f32 1e-05, %v3022_v59  ;;  %v7133_v59 = vld [vmem:[#allocation5 + $0x50c] ss:$48 sps:$4 sm:$0xff]  }
0x10af   : > { %7290 = vrsqrt.f32 %v3024_v62  ;;  %v7128_v62 = vld [vmem:[#allocation5 + $0x500] ss:$48 sps:$4 sm:$0xff]  }
0x10b8   : > { %v7289_v47 = vpop.eup %7288 }
0x10b9   : > { %v3027_v50 = vmul.f32 %v7289_v47, %v8565_v54  ;;  %v7074_v54 = vld [vmem:[#allocation5 + $0x550] ss:$48 sps:$4 sm:$0xff]   ;;  %v7131_v47 = vld [vmem:[#allocation5 + $0x508] ss:$48 sps:$4 sm:$0xff]  }
0x10bb   : > { %v3036_v35 = vmul.f32 %v5927_v25, %v3027_v50  ;;  %v7136_v50 = vld [vmem:[#allocation5 + $0x4a4] ss:$48 sps:$4 sm:$0xff]  }
0x10bc   : > { %v7291_v26 = vpop.eup %7290 }
0x10bd   : > { %v3028_v37 = vmul.f32 %v7291_v26, %v8569_v29  ;;  %v8575_v43 = vadd.f32 %v5928_v40, %v3036_v35  ;;  %v7077_v29 = vld [vmem:[#allocation5 + $0x558] ss:$48 sps:$4 sm:$0xff]   ;;  %v7134_v26 = vld [vmem:[#allocation5 + $0x4a0] ss:$48 sps:$4 sm:$0xff]  }
0x10be   : > { %v7137_v35 = vld [vmem:[#allocation5 + $0x4a8] ss:$48 sps:$4 sm:$0xff]  }
0x10bf   : > { %v3037_v41 = vmul.f32 %v5927_v25, %v3028_v37  ;;  %v7139_v25 = vld [vmem:[#allocation5 + $0x4ac] ss:$48 sps:$4 sm:$0xff]   ;;  %v7142_v37 = vld [vmem:[#allocation5 + $0x444] ss:$48 sps:$4 sm:$0xff]  }
0x10c1   : > { %v8577_v7 = vadd.f32 %v5928_v40, %v3037_v41  ;;  %v7145_v40 = vld [vmem:[#allocation5 + $0x44c] ss:$48 sps:$4 sm:$0xff]   ;;  %v7140_v41 = vld [vmem:[#allocation5 + $0x440] ss:$48 sps:$4 sm:$0xff]  }
0x10c3   : > { %v8581_v14 = vpack.c.bf16 %v8577_v7, %v8575_v43 }
0x10c5   : > { %3723 = vmatmul.mubr.bf16.vlgmr.msra.gmra.mxu0 %v8581_v14  ;;  %3766 = vmatmul.mubr.bf16.vlgmr.msra.gmra.mxu1 %v8581_v14 }
0x10c6   : > { %3777 = vmatpush1.bf16.msra.mxu0 %v7068_v60  ;;  %3820 = vmatpush1.bf16.msra.mxu1 %v7071_v36  ;;  %v7143_v60 = vld [vmem:[#allocation5 + $0x448] ss:$48 sps:$4 sm:$0xff]   ;;  %v7148_v36 = vld [vmem:[#allocation5 + $0x3e4] ss:$48 sps:$4 sm:$0xff]  }
0x10c7   : > { %3778 = vmatprep.subr.bf16.mxu0 %v7076_v61  ;;  %3821 = vmatprep.subr.bf16.mxu1 %v7079_v30  ;;  %v7151_v61 = vld [vmem:[#allocation5 + $0x3ec] ss:$48 sps:$4 sm:$0xff]   ;;  %v7146_v30 = vld [vmem:[#allocation5 + $0x3e0] ss:$48 sps:$4 sm:$0xff]  }
0x10c8   : > { %3808 = vmatprep.mubr.bf16.mxu0 %v7905_v0  ;;  %3851 = vmatprep.mubr.bf16.mxu1 %v7905_v0 }
0x10ca   : > { %3779 = vmatpush1.bf16.msra.mxu0 %v7074_v54  ;;  %3822 = vmatpush1.bf16.msra.mxu1 %v7077_v29  ;;  %v7149_v54 = vld [vmem:[#allocation5 + $0x3e8] ss:$48 sps:$4 sm:$0xff]   ;;  %v7154_v29 = vld [vmem:[#allocation5 + $0x384] ss:$48 sps:$4 sm:$0xff]  }
0x10cb   : > { %3780 = vmatprep.subr.bf16.mxu0 %v7082_v39  ;;  %3823 = vmatprep.subr.bf16.mxu1 %v7085_v42  ;;  %v7157_v39 = vld [vmem:[#allocation5 + $0x38c] ss:$48 sps:$4 sm:$0xff]   ;;  %v7152_v42 = vld [vmem:[#allocation5 + $0x380] ss:$48 sps:$4 sm:$0xff]  }
0x10ce   : > { %3781 = vmatpush1.bf16.msra.mxu0 %v7080_v44  ;;  %3824 = vmatpush1.bf16.msra.mxu1 %v7083_v48  ;;  %v7155_v44 = vld [vmem:[#allocation5 + $0x388] ss:$48 sps:$4 sm:$0xff]   ;;  %v7160_v48 = vld [vmem:[#allocation5 + $0x324] ss:$48 sps:$4 sm:$0xff]  }
0x10cf   : > { %3782 = vmatprep.subr.bf16.mxu0 %v7088_v55  ;;  %3825 = vmatprep.subr.bf16.mxu1 %v7091_v56  ;;  %v7163_v55 = vld [vmem:[#allocation5 + $0x32c] ss:$48 sps:$4 sm:$0xff]   ;;  %v7158_v56 = vld [vmem:[#allocation5 + $0x320] ss:$48 sps:$4 sm:$0xff]  }
0x10d2   : > { %3783 = vmatpush1.bf16.msra.mxu0 %v7086_v57  ;;  %3826 = vmatpush1.bf16.msra.mxu1 %v7089_v28  ;;  %v7161_v57 = vld [vmem:[#allocation5 + $0x328] ss:$48 sps:$4 sm:$0xff]   ;;  %v3146_v28 = vld [vmem:[#allocation7 + $0xc] sm:$0xff] }
0x10d3   : > { %3784 = vmatprep.subr.bf16.mxu0 %v7094_v32  ;;  %3827 = vmatprep.subr.bf16.mxu1 %v7097_v38 }
0x10d6   : > { %3785 = vmatpush1.bf16.msra.mxu0 %v7092_v21  ;;  %3828 = vmatpush1.bf16.msra.mxu1 %v7095_v63  ;;  %v3161_v21 = vrot.slane %v3146_v28, %v8407_v17  ;;  %v3157_v63 = vrot.slane %v3146_v28, %v8325_v34 }
0x10d7   : > { %3786 = vmatprep.subr.bf16.mxu0 %v7100_v1  ;;  %3829 = vmatprep.subr.bf16.mxu1 %v7103_v2 }
0x10da   : > { %3787 = vmatpush1.bf16.msra.mxu0 %v7098_v3  ;;  %3830 = vmatpush1.bf16.msra.mxu1 %v7101_v4  ;;  %v3165_v3 = vrot.slane %v3146_v28, %v8410_v19 }
0x10db   : > { %3788 = vmatprep.subr.bf16.mxu0 %v7106_v45  ;;  %3831 = vmatprep.subr.bf16.mxu1 %v7109_v46 }
0x10de   : > { %3789 = vmatpush1.bf16.msra.mxu0 %v7104_v49  ;;  %3832 = vmatpush1.bf16.msra.mxu1 %v7107_v5 }
0x10df   : > { %3790 = vmatprep.subr.bf16.mxu0 %v7112_v6  ;;  %3833 = vmatprep.subr.bf16.mxu1 %v7115_v8 }
0x10e2   : > { %3791 = vmatpush1.bf16.msra.mxu0 %v7110_v9  ;;  %3834 = vmatpush1.bf16.msra.mxu1 %v7113_v10 }
0x10e3   : > { %3862 = vmatprep.subr.bf16.mxu0 %v7118_v11  ;;  %3905 = vmatprep.subr.bf16.mxu1 %v7121_v12 }
0x10e5   : > { %3809 = vmatmul.mubr.bf16.vlgmr.msra.gmra.mxu0 %v8581_v14  ;;  %3852 = vmatmul.mubr.bf16.vlgmr.msra.gmra.mxu1 %v8581_v14 }
0x10e6   : > { %3863 = vmatpush1.bf16.msra.mxu0 %v7116_v13  ;;  %3906 = vmatpush1.bf16.msra.mxu1 %v7119_v15 }
0x10e7   : > { %3864 = vmatprep.subr.bf16.mxu0 %v7124_v16  ;;  %3907 = vmatprep.subr.bf16.mxu1 %v7127_v18  ;;  %v3169_v18 = vrot.slane %v3146_v28, %v960_v51 }
0x10e8   : > { %3894 = vmatprep.mubr.bf16.mxu0 %v7905_v0  ;;  %3937 = vmatprep.mubr.bf16.mxu1 %v7905_v0 }
0x10ea   : > { %3865 = vmatpush1.bf16.msra.mxu0 %v7122_v20  ;;  %3908 = vmatpush1.bf16.msra.mxu1 %v7125_v22  ;;  %v3177_v20 = vrot.slane %v3146_v28, %v968_v27  ;;  %v3173_v22 = vrot.slane %v3146_v28, %v964_v53 }
0x10eb   : > { %3866 = vmatprep.subr.bf16.mxu0 %v7130_v23  ;;  %3909 = vmatprep.subr.bf16.mxu1 %v7133_v59  ;;  %v3181_v59 = vrot.slane %v3146_v28, %v972_v33 }
0x10ee   : > { %3867 = vmatpush1.bf16.msra.mxu0 %v7128_v62  ;;  %3910 = vmatpush1.bf16.msra.mxu1 %v7131_v47 }
0x10ef   : > { %3868 = vmatprep.subr.bf16.mxu0 %v7136_v50  ;;  %3911 = vmatprep.subr.bf16.mxu1 %v7139_v25 }
0x10f2   : > { %3869 = vmatpush1.bf16.msra.mxu0 %v7134_v26  ;;  %3912 = vmatpush1.bf16.msra.mxu1 %v7137_v35 }
0x10f3   : > { %3870 = vmatprep.subr.bf16.mxu0 %v7142_v37  ;;  %3913 = vmatprep.subr.bf16.mxu1 %v7145_v40 }
0x10f6   : > { %3871 = vmatpush1.bf16.msra.mxu0 %v7140_v41  ;;  %3914 = vmatpush1.bf16.msra.mxu1 %v7143_v60 }
0x10f7   : > { %3872 = vmatprep.subr.bf16.mxu0 %v7148_v36  ;;  %3915 = vmatprep.subr.bf16.mxu1 %v7151_v61  ;;  %v3153_v36 = vrot.slane %v3146_v28, %v8350_v58 }
0x10fa   : > { %3873 = vmatpush1.bf16.msra.mxu0 %v7146_v30  ;;  %3916 = vmatpush1.bf16.msra.mxu1 %v7149_v54 }
0x10fb   : > { %3874 = vmatprep.subr.bf16.mxu0 %v7154_v29  ;;  %3917 = vmatprep.subr.bf16.mxu1 %v7157_v39 }
0x10fe   : > { %3875 = vmatpush1.bf16.msra.mxu0 %v7152_v42  ;;  %3918 = vmatpush1.bf16.msra.mxu1 %v7155_v44  ;;  %v8650_v42 = vld [vmem:[#allocation7 + $0x14] sm:$0xf] }
0x10ff   : > { %3876 = vmatprep.subr.bf16.mxu0 %v7160_v48  ;;  %3919 = vmatprep.subr.bf16.mxu1 %v7163_v55  ;;  %v3197_v44 = vrot.slane %v8650_v42, %v8410_v19 }
0x1102   : > { %3877 = vmatpush1.bf16.msra.mxu0 %v7158_v56  ;;  %3920 = vmatpush1.bf16.msra.mxu1 %v7161_v57  ;;  %v3185_v56 = vrot.slane %v8650_v42, %v8350_v58 }
0x1103   : > { %6413 = vmatprep.subr.bf16.mxu0 %v7906_v52  ;;  %6431 = vmatprep.subr.bf16.mxu1 %v7906_v52 }
0x1105   : > { %3895 = vmatmul.mubr.bf16.vlgmr.msra.gmra.mxu0 %v8581_v14  ;;  %3938 = vmatmul.mubr.bf16.vlgmr.msra.gmra.mxu1 %v8581_v14 }
0x1106   : > { %6415 = vmatprep.mubr.msk.bf16.mxu0 %vm7907_vm0, %v7906_v52  ;;  %6433 = vmatprep.mubr.msk.bf16.mxu1 %vm7907_vm0, %v7906_v52 }
0x1185   : > { %v3724_v32 = vpop.f32.mrf.mxu0  ;;  %v3767_v38 = vpop.f32.mrf.mxu1 }
0x1186   : > { %v8602_v14 = vadd.f32 %v3767_v38, %v3161_v21  ;;  %v3725_v29 = vadd.f32 %v3724_v32, %v3153_v36  ;;  %v3189_v32 = vrot.slane %v8650_v42, %v8325_v34 }
0x1187   : > { %v3726_v1 = vpop.f32.mrf.mxu0  ;;  %v3769_v2 = vpop.f32.mrf.mxu1 }
0x1188   : > { %v8606_v49 = vadd.f32 %v3726_v1, %v3157_v63  ;;  %v8608_v8 = vadd.f32 %v3769_v2, %v3165_v3 }
0x1189   : > { %v3728_v4 = vpop.f32.mrf.mxu0  ;;  %v3771_v45 = vpop.f32.mrf.mxu1 }
0x118a   : > { %v8604_v46 = vadd.f32 %v3771_v45, %v3161_v21  ;;  %v3729_v54 = vadd.f32 %v3728_v4, %v3153_v36 }
0x118b   : > { %v3730_v5 = vpop.f32.mrf.mxu0  ;;  %v3773_v6 = vpop.f32.mrf.mxu1 }
0x118c   : > { %v4383_v9 = vpack.c.bf16 %v8604_v46, %v8602_v14  ;;  %v8612_v10 = vadd.f32 %v3730_v5, %v3157_v63  ;;  %v8614_v11 = vadd.f32 %v3773_v6, %v3165_v3  ;;  %v3948_v39 = vpack.c.bf16 %v3729_v54, %v3725_v29 }
0x118e   : > { %v4077_v12 = vpack.c.bf16 %v8612_v10, %v8606_v49  ;;  %v4602_v13 = vpack.c.bf16 %v8614_v11, %v8608_v8 }
0x11a5   : > { %v3810_v15 = vpop.f32.mrf.mxu0  ;;  %v3853_v16 = vpop.f32.mrf.mxu1 }
0x11a6   : > { %v3811_v25 = vadd.f32 %v3810_v15, %v3169_v18  ;;  %v8628_v26 = vadd.f32 %v3853_v16, %v3177_v20 }
0x11a7   : > { %v3812_v23 = vpop.f32.mrf.mxu0  ;;  %v3855_v62 = vpop.f32.mrf.mxu1 }
0x11a8   : > { %v8632_v51 = vadd.f32 %v3812_v23, %v3173_v22  ;;  %v8634_v40 = vadd.f32 %v3855_v62, %v3181_v59 }
0x11a9   : > { %v3814_v47 = vpop.f32.mrf.mxu0  ;;  %v3857_v50 = vpop.f32.mrf.mxu1 }
0x11aa   : > { %v3815_v35 = vadd.f32 %v3814_v47, %v3169_v18  ;;  %v8630_v37 = vadd.f32 %v3857_v50, %v3177_v20 }
0x11ab   : > { %v3816_v27 = vpop.f32.mrf.mxu0  ;;  %v3859_v41 = vpop.f32.mrf.mxu1 }
0x11ac   : > { %v3949_v53 = vpack.c.bf16 %v3815_v35, %v3811_v25  ;;  %v4384_v31 = vpack.c.bf16 %v8630_v37, %v8628_v26  ;;  %v8638_v33 = vadd.f32 %v3816_v27, %v3173_v22  ;;  %v8640_v60 = vadd.f32 %v3859_v41, %v3181_v59 }
0x11ae   : > { %v4078_v61 = vpack.c.bf16 %v8638_v33, %v8632_v51  ;;  %v4603_v30 = vpack.c.bf16 %v8640_v60, %v8634_v40  ;;  %6414 = vmatpush3.bf16.xpose.msra.mxu0 %v3949_v53  ;;  %v7186_v40 = vld [vmem:[#allocation8 + $0x188] sm:$0xff]   ;;  %v7187_v60 = vld [vmem:[#allocation8 + $0x180] sm:$0xff]  }
0x11af   : > { %6419 = vmatprep.subr.bf16.mxu0 %v7906_v52 }
0x11b5   : > { %6416 = vmatmul.mubr.bf16.vlgmr.msra.gmra.mxu0 %v3948_v39 }
0x11b6   : > { %6421 = vmatprep.mubr.msk.bf16.mxu0 %vm7907_vm0, %v7906_v52 }
0x11c5   : > { %v3896_v48 = vpop.f32.mrf.mxu0  ;;  %v8654_v55 = vpop.f32.mrf.mxu1 }
0x11c6   : > { %v3897_v1 = vadd.f32 %v3896_v48, %v3185_v56 }
0x11c7   : > { %v3898_v57 = vpop.f32.mrf.mxu0  ;;  %v3941_v28 = vpop.f32.mrf.mxu1 }
0x11c8   : > { %v8660_v38 = vadd.f32 %v3941_v28, %v3197_v44  ;;  %v3899_v4 = vadd.f32 %v3898_v57, %v3189_v32 }
0x11c9   : > { %v3900_v21 = vpop.f32.mrf.mxu0  ;;  %v8662_v63 = vpop.f32.mrf.mxu1 }
0x11ca   : > { %v3901_v2 = vadd.f32 %v3900_v21, %v3185_v56 }
0x11cb   : > { %v3902_v3 = vpop.f32.mrf.mxu0  ;;  %v3945_v19 = vpop.f32.mrf.mxu1 }
0x11cc   : > { %v3950_v45 = vpack.c.bf16 %v3901_v2, %v3897_v1  ;;  %v3903_v5 = vadd.f32 %v3902_v3, %v3189_v32  ;;  %v8664_v6 = vadd.f32 %v3945_v19, %v3197_v44 }
0x11ce   : > { %v4079_v15 = vpack.c.bf16 %v3903_v5, %v3899_v4  ;;  %v4604_v16 = vpack.c.bf16 %v8664_v6, %v8660_v38  ;;  %6420 = vmatpush3.bf16.msra.mxu0 %v3950_v45 }
0x11cf   : > { %6425 = vmatprep.subr.bf16.mxu0 %v7906_v52 }
0x11d0   : > { %6432 = vmatpush3.bf16.msra.mxu1 %v4079_v15 }
0x11d1   : > { %6457 = vmatprep.subr.bf16.mxu1 %v7906_v52 }
0x1275   : > { %v3985_v18 = vpop.f32.mrf.mxu0 }
0x1276   : > { %v3986_v20 = vadd.f32 %v3985_v18, %v8374_v24 }
0x1277   : > { %v6417_v22 = vpop.f32.mrf.mxu0 }
0x1278   : > { %v3992_v23 = vsel %vm1790_vm2, %v3986_v20, -inf }
0x1279   : > { %3993 = vmax.xlane.f32.xlu0 %v3992_v23  ;;  %v3988_v59 = vpop.f32.mrf.mxu0 }
0x127a   : > { %v3989_v62 = vadd.f32 %v3988_v59, %v8374_v24 }
0x127b   : > { %v6418_v47 = vpop.f32.mrf.mxu0 }
0x127c   : > { %v3995_v50 = vsel %vm1790_vm2, %v3989_v62, -inf }
0x127d   : > { %3996 = vmax.xlane.f32.xlu1 %v3995_v50 }
0x1302   : > { %v3994_v25 = vpop.xlane.xlu0 %3993 }
0x1303   : > { %v3998_v35 = vsub.f32 %v3986_v20, %v3994_v25 }
0x1305   : > { %v4000_v27 = vmul.f32 1.442695, %v3998_v35 }
0x1306   : > { %v3997_v41 = vpop.xlane.xlu1 %3996 }
0x1307   : > { %7292 = vpow2.f32 %v4000_v27  ;;  %v3999_v53 = vsub.f32 %v3989_v62, %v3997_v41  ;;  %v7172_v27 = vld [vmem:[#allocation8 + $0x178] sm:$0xff]   ;;  %v7173_v41 = vld [vmem:[#allocation8 + $0x170] sm:$0xff]  }
0x1309   : > { %v4002_v36 = vmul.f32 1.442695, %v3999_v53  ;;  %v7174_v53 = vld [vmem:[#allocation8 + $0x168] sm:$0xff]  }
0x130b   : > { %7294 = vpow2.f32 %v4002_v36  ;;  %v7175_v36 = vld [vmem:[#allocation8 + $0x160] sm:$0xff]  }
0x1314   : > { %v7293_v54 = vpop.eup %7292 }
0x1315   : > { %v4004_v29 = vsel %vm1790_vm2, %v7293_v54, 0.0 }
0x1316   : > { %4005 = vadd.xlane.f32.xlu0 %v4004_v29  ;;  %v7177_v29 = vld [vmem:[#allocation8 + $0x150] sm:$0xff]  }
0x1318   : > { %v7295_v39 = vpop.eup %7294 }
0x1319   : > { %v4007_v44 = vsel %vm1790_vm2, %v7295_v39, 0.0 }
0x131a   : > { %4008 = vadd.xlane.f32.xlu1 %v4007_v44 }
0x139f   : > { %v4006_v48 = vpop.xlane.xlu0 %4005 }
0x13a0   : > { %7296 = vrcp.f32 %v4006_v48 }
0x13a3   : > { %v4009_v56 = vpop.xlane.xlu1 %4008 }
0x13a4   : > { %7298 = vrcp.f32 %v4009_v56 }
0x13ad   : > { %v7297_v57 = vpop.eup %7296 }
0x13ae   : > { %v4012_v32 = vmul.f32 %v7297_v57, %v7293_v54  ;;  %v7176_v54 = vld [vmem:[#allocation8 + $0x158] sm:$0xff]  }
0x13b1   : > { %v7299_v28 = vpop.eup %7298 }
0x13b2   : > { %v4013_v21 = vmul.f32 %v7299_v28, %v7295_v39  ;;  %v7178_v39 = vld [vmem:[#allocation8 + $0x148] sm:$0xff]  }
0x13b4   : > { %v4014_v1 = vpack.c.bf16 %v4013_v21, %v4012_v32  ;;  %v7164_v21 = vld [vmem:[#allocation8 + $0x138] sm:$0xff]  }
0x13b6   : > { %6422 = vmatmul.mubr.msk.bf16.vlgmr.msra.gmra.mxu0 %vm1790_vm2, %v4014_v1 }
0x13b7   : > { %6426 = vmatpush3.bf16.xpose.msra.mxu0 %v4078_v61  ;;  %6427 = vmatprep.mubr.msk.bf16.mxu0 %vm7907_vm0, %v7906_v52 }
0x13b8   : > { %6437 = vmatprep.subr.bf16.mxu0 %v7906_v52 }
0x13be   : > { %6428 = vmatmul.mubr.bf16.vlgmr.msra.gmra.mxu0 %v4077_v12 }
0x13bf   : > { %6453 = vmatprep.mubr.msk.bf16.mxu0 %vm7907_vm0, %v7906_v52  ;;  %6438 = vmatpush3.bf16.msra.mxu0 %v7172_v27 }
0x13c0   : > { %6439 = vmatprep.subr.bf16.mxu0 %v7906_v52 }
0x13c3   : > { %6440 = vmatpush3.bf16.msra.mxu0 %v7173_v41 }
0x13c4   : > { %6441 = vmatprep.subr.bf16.mxu0 %v7906_v52 }
0x13c7   : > { %6442 = vmatpush3.bf16.msra.mxu0 %v7174_v53 }
0x13c8   : > { %6443 = vmatprep.subr.bf16.mxu0 %v7906_v52 }
0x13cb   : > { %6444 = vmatpush3.bf16.msra.mxu0 %v7175_v36 }
0x13cc   : > { %6445 = vmatprep.subr.bf16.mxu0 %v7906_v52 }
0x13cf   : > { %6446 = vmatpush3.bf16.msra.mxu0 %v7176_v54 }
0x13d0   : > { %6447 = vmatprep.subr.bf16.mxu0 %v7906_v52 }
0x13d3   : > { %6448 = vmatpush3.bf16.msra.mxu0 %v7177_v29 }
0x13d4   : > { %6449 = vmatprep.subr.bf16.mxu0 %v7906_v52 }
0x13d7   : > { %6450 = vmatpush3.bf16.msra.mxu0 %v7178_v39 }
0x13d8   : > { %6451 = vmatprep.subr.bf16.mxu0 %v7906_v52 }
0x1476   : > { %v8688_v2 = vpop.f32.mrf.mxu0 }
0x1478   : > { %v6423_v3 = vpop.f32.mrf.mxu0 }
0x1479   : > { %v7165_v3 = vld [vmem:[#allocation8 + $0x130] sm:$0xff]  }
0x147a   : > { %v8690_v19 = vpop.f32.mrf.mxu0 }
0x147b   : > { %v4059_v51 = vpack.c.bf16 %v8690_v19, %v8688_v2 }
0x147c   : > { %v6424_v33 = vpop.f32.mrf.mxu0 }
0x147d   : > { %v7166_v33 = vld [vmem:[#allocation8 + $0x128] sm:$0xff]  }
0x147e   : > { %v4114_v61 = vpop.f32.mrf.mxu0 }
0x147f   : > { %v4115_v4 = vadd.f32 %v4114_v61, %v8374_v24  ;;  %v7167_v61 = vld [vmem:[#allocation8 + $0x120] sm:$0xff]  }
0x1480   : > { %v6429_v45 = vpop.f32.mrf.mxu0 }
0x1481   : > { %v4121_v5 = vsel %vm1790_vm2, %v4115_v4, -inf  ;;  %v7169_v45 = vld [vmem:[#allocation8 + $0x110] sm:$0xff]  }
0x1482   : > { %4122 = vmax.xlane.f32.xlu0 %v4121_v5  ;;  %v4117_v49 = vpop.f32.mrf.mxu0  ;;  %v7170_v5 = vld [vmem:[#allocation8 + $0x108] sm:$0xff]  }
0x1483   : > { %v4118_v10 = vadd.f32 %v4117_v49, %v8374_v24  ;;  %v3193_v49 = vrot.slane %v8650_v42, %v8407_v17  ;;  %v7179_v17 = vld [vmem:[#allocation8 + $0x140] sm:$0xff]  }
0x1484   : > { %v6430_v12 = vpop.f32.mrf.mxu0  ;;  %6452 = vmatpush3.bf16.msra.mxu0 %v7179_v17 }
0x1485   : > { %v4124_v15 = vsel %vm1790_vm2, %v4118_v10, -inf  ;;  %v3944_v12 = vadd.f32 %v8662_v63, %v3193_v49  ;;  %6477 = vmatprep.subr.bf16.mxu0 %v7906_v52 }
0x1486   : > { %4125 = vmax.xlane.f32.xlu1 %v4124_v15  ;;  %v3940_v15 = vadd.f32 %v8654_v55, %v3193_v49 }
0x150b   : > { %v4123_v18 = vpop.xlane.xlu0 %4122 }
0x150c   : > { %v4127_v20 = vsub.f32 %v4115_v4, %v4123_v18  ;;  %v7168_v4 = vld [vmem:[#allocation8 + $0x118] sm:$0xff]   ;;  %v4385_v18 = vpack.c.bf16 %v3944_v12, %v3940_v15 }
0x150e   : > { %v4129_v22 = vmul.f32 1.442695, %v4127_v20 }
0x150f   : > { %v4126_v23 = vpop.xlane.xlu1 %4125 }
0x1510   : > { %7300 = vpow2.f32 %v4129_v22  ;;  %v4128_v59 = vsub.f32 %v4118_v10, %v4126_v23  ;;  %v7171_v10 = vld [vmem:[#allocation8 + $0x100] sm:$0xff]  }
0x1512   : > { %v4131_v62 = vmul.f32 1.442695, %v4128_v59 }
0x1514   : > { %7302 = vpow2.f32 %v4131_v62 }
0x151d   : > { %v7301_v47 = vpop.eup %7300 }
0x151e   : > { %v4133_v50 = vsel %vm1790_vm2, %v7301_v47, 0.0 }
0x151f   : > { %4134 = vadd.xlane.f32.xlu0 %v4133_v50 }
0x1521   : > { %v7303_v25 = vpop.eup %7302 }
0x1522   : > { %v4136_v35 = vsel %vm1790_vm2, %v7303_v25, 0.0 }
0x1523   : > { %4137 = vadd.xlane.f32.xlu1 %v4136_v35 }
0x15a8   : > { %v4135_v44 = vpop.xlane.xlu0 %4134 }
0x15a9   : > { %7304 = vrcp.f32 %v4135_v44 }
0x15ac   : > { %v4138_v48 = vpop.xlane.xlu1 %4137 }
0x15ad   : > { %7306 = vrcp.f32 %v4138_v48 }
0x15b6   : > { %v7305_v56 = vpop.eup %7304 }
0x15b7   : > { %v4141_v28 = vmul.f32 %v7305_v56, %v7301_v47 }
0x15ba   : > { %v7307_v57 = vpop.eup %7306 }
0x15bb   : > { %v4142_v32 = vmul.f32 %v7307_v57, %v7303_v25  ;;  %v7180_v57 = vld [vmem:[#allocation8 + $0x1b8] sm:$0xff]  }
0x15bd   : > { %v4143_v1 = vpack.c.bf16 %v4142_v32, %v4141_v28  ;;  %v7181_v28 = vld [vmem:[#allocation8 + $0x1b0] sm:$0xff]   ;;  %v7182_v32 = vld [vmem:[#allocation8 + $0x1a8] sm:$0xff]  }
0x15bf   : > { %6434 = vmatmul.mubr.msk.bf16.vlgmr.msra.gmra.mxu1 %vm1790_vm2, %v4143_v1  ;;  %v7184_v1 = vld [vmem:[#allocation8 + $0x198] sm:$0xff]  }
0x15c0   : > { %6458 = vmatpush3.bf16.msra.mxu1 %v7164_v21  ;;  %6473 = vmatprep.mubr.msk.bf16.mxu1 %vm7907_vm0, %v7906_v52  ;;  %v7183_v21 = vld [vmem:[#allocation8 + $0x1a0] sm:$0xff]  }
0x15c1   : > { %6459 = vmatprep.subr.bf16.mxu1 %v7906_v52 }
0x15c4   : > { %6460 = vmatpush3.bf16.msra.mxu1 %v7165_v3  ;;  %v7185_v3 = vld [vmem:[#allocation8 + $0x190] sm:$0xff]  }
0x15c5   : > { %6461 = vmatprep.subr.bf16.mxu1 %v7906_v52 }
0x15c8   : > { %6462 = vmatpush3.bf16.msra.mxu1 %v7166_v33 }
0x15c9   : > { %6463 = vmatprep.subr.bf16.mxu1 %v7906_v52 }
0x15cc   : > { %6464 = vmatpush3.bf16.msra.mxu1 %v7167_v61 }
0x15cd   : > { %6465 = vmatprep.subr.bf16.mxu1 %v7906_v52 }
0x15d0   : > { %6466 = vmatpush3.bf16.msra.mxu1 %v7168_v4 }
0x15d1   : > { %6467 = vmatprep.subr.bf16.mxu1 %v7906_v52 }
0x15d4   : > { %6468 = vmatpush3.bf16.msra.mxu1 %v7169_v45 }
0x15d5   : > { %6469 = vmatprep.subr.bf16.mxu1 %v7906_v52 }
0x15d8   : > { %6470 = vmatpush3.bf16.msra.mxu1 %v7170_v5 }
0x15d9   : > { %6471 = vmatprep.subr.bf16.mxu1 %v7906_v52 }
0x15dc   : > { %6472 = vmatpush3.bf16.msra.mxu1 %v7171_v10 }
0x15dd   : > { %6483 = vmatprep.subr.bf16.mxu1 %v7906_v52 }
0x15df   : > { %6474 = vmatmul.mubr.bf16.vlgmr.msra.gmra.mxu1 %v4059_v51 }
0x15e0   : > { %6484 = vmatpush3.bf16.msra.mxu1 %v4385_v18  ;;  %6485 = vmatprep.mubr.msk.bf16.mxu1 %vm7907_vm0, %v7906_v52 }
0x15e1   : > { %6509 = vmatprep.subr.bf16.mxu1 %v7906_v52 }
0x167f   : > { %v4181_v42 = vpop.f32.mrf.mxu1 }
0x1681   : > { %v6435_v55 = vpop.f32.mrf.mxu1 }
0x1683   : > { %v4184_v63 = vpop.f32.mrf.mxu1 }
0x1684   : > { %v4188_v20 = vpack.c.bf16 %v4184_v63, %v4181_v42 }
0x1685   : > { %v6436_v22 = vpop.f32.mrf.mxu1 }
0x1686   : > { %6454 = vmatmul.mubr.bf16.vlgmr.msra.gmra.mxu0 %v4188_v20 }
0x1687   : > { %6478 = vmatpush3.bf16.xpose.msra.mxu0 %v4384_v31  ;;  %6479 = vmatprep.mubr.msk.bf16.mxu0 %vm7907_vm0, %v7906_v52 }
0x1688   : > { %6489 = vmatprep.subr.bf16.mxu0 %v7906_v52 }
0x168e   : > { %6480 = vmatmul.mubr.bf16.vlgmr.msra.gmra.mxu0 %v4383_v9 }
0x168f   : > { %6505 = vmatprep.mubr.msk.bf16.mxu0 %vm7907_vm0, %v7906_v52  ;;  %6490 = vmatpush3.bf16.msra.mxu0 %v7180_v57  ;;  %v7194_v57 = vld [vmem:[#allocation8 + $0x1c8] sm:$0xff]  }
0x1690   : > { %6491 = vmatprep.subr.bf16.mxu0 %v7906_v52 }
0x1693   : > { %6492 = vmatpush3.bf16.msra.mxu0 %v7181_v28  ;;  %v7195_v28 = vld [vmem:[#allocation8 + $0x1c0] sm:$0xff]  }
0x1694   : > { %6493 = vmatprep.subr.bf16.mxu0 %v7906_v52 }
0x1697   : > { %6494 = vmatpush3.bf16.msra.mxu0 %v7182_v32 }
0x1698   : > { %6495 = vmatprep.subr.bf16.mxu0 %v7906_v52 }
0x169b   : > { %6496 = vmatpush3.bf16.msra.mxu0 %v7183_v21 }
0x169c   : > { %6497 = vmatprep.subr.bf16.mxu0 %v7906_v52 }
0x169f   : > { %v8740_v2 = vpop.f32.mrf.mxu1  ;;  %6498 = vmatpush3.bf16.msra.mxu0 %v7184_v1 }
0x16a0   : > { %6499 = vmatprep.subr.bf16.mxu0 %v7906_v52 }
0x16a1   : > { %v6475_v19 = vpop.f32.mrf.mxu1 }
0x16a3   : > { %v8742_v51 = vpop.f32.mrf.mxu1  ;;  %6500 = vmatpush3.bf16.msra.mxu0 %v7185_v3 }
0x16a4   : > { %6501 = vmatprep.subr.bf16.mxu0 %v7906_v52 }
0x16a5   : > { %v6476_v23 = vpop.f32.mrf.mxu1 }
0x16a7   : > { %6502 = vmatpush3.bf16.msra.mxu0 %v7186_v40 }
0x16a8   : > { %6503 = vmatprep.subr.bf16.mxu0 %v7906_v52 }
0x16ab   : > { %6504 = vmatpush3.bf16.msra.mxu0 %v7187_v60 }
0x1746   : > { %v8744_v26 = vpop.f32.mrf.mxu0 }
0x1748   : > { %v6455_v37 = vpop.f32.mrf.mxu0 }
0x174a   : > { %v8746_v31 = vpop.f32.mrf.mxu0 }
0x174c   : > { %v6456_v59 = vpop.f32.mrf.mxu0 }
0x174e   : > { %v4420_v62 = vpop.f32.mrf.mxu0 }
0x174f   : > { %v4421_v47 = vadd.f32 %v4420_v62, %v8374_v24 }
0x1750   : > { %v6481_v14 = vpop.f32.mrf.mxu0 }
0x1751   : > { %v4427_v46 = vsel %vm1790_vm2, %v4421_v47, -inf }
0x1752   : > { %4428 = vmax.xlane.f32.xlu0 %v4427_v46  ;;  %v4423_v9 = vpop.f32.mrf.mxu0 }
0x1753   : > { %v4424_v50 = vadd.f32 %v4423_v9, %v8374_v24 }
0x1754   : > { %v6482_v25 = vpop.f32.mrf.mxu0 }
0x1755   : > { %v4430_v35 = vsel %vm1790_vm2, %v4424_v50, -inf }
0x1756   : > { %4431 = vmax.xlane.f32.xlu1 %v4430_v35 }
0x17db   : > { %v4429_v27 = vpop.xlane.xlu0 %4428 }
0x17dc   : > { %v4433_v41 = vsub.f32 %v4421_v47, %v4429_v27 }
0x17de   : > { %v4435_v53 = vmul.f32 1.442695, %v4433_v41 }
0x17df   : > { %v4432_v36 = vpop.xlane.xlu1 %4431 }
0x17e0   : > { %7308 = vpow2.f32 %v4435_v53  ;;  %v4434_v54 = vsub.f32 %v4424_v50, %v4432_v36  ;;  %v4380_v50 = vadd.f32 %v8742_v51, %v8746_v31  ;;  %v7190_v51 = vld [vmem:[#allocation8 + $0x1e8] sm:$0xff]   ;;  %v7192_v31 = vld [vmem:[#allocation8 + $0x1d8] sm:$0xff]  }
0x17e2   : > { %v4437_v29 = vmul.f32 1.442695, %v4434_v54 }
0x17e4   : > { %7310 = vpow2.f32 %v4437_v29 }
0x17ed   : > { %v7309_v39 = vpop.eup %7308 }
0x17ee   : > { %v4439_v44 = vsel %vm1790_vm2, %v7309_v39, 0.0 }
0x17ef   : > { %4440 = vadd.xlane.f32.xlu0 %v4439_v44  ;;  %v7188_v44 = vld [vmem:[#allocation8 + $0x1f8] sm:$0xff]  }
0x17f1   : > { %v7311_v48 = vpop.eup %7310 }
0x17f2   : > { %v4442_v56 = vsel %vm1790_vm2, %v7311_v48, 0.0 }
0x17f3   : > { %4443 = vadd.xlane.f32.xlu1 %v4442_v56  ;;  %v7193_v56 = vld [vmem:[#allocation8 + $0x1d0] sm:$0xff]  }
0x1878   : > { %v4441_v33 = vpop.xlane.xlu0 %4440 }
0x1879   : > { %7312 = vrcp.f32 %v4441_v33 }
0x187c   : > { %v4444_v61 = vpop.xlane.xlu1 %4443 }
0x187d   : > { %7314 = vrcp.f32 %v4444_v61 }
0x1886   : > { %v7313_v4 = vpop.eup %7312 }
0x1887   : > { %v4447_v5 = vmul.f32 %v7313_v4, %v7309_v39  ;;  %v6061_v4 = vld [vmem:[#allocation10 + $0x1] ss:$0 sm:$0xff] }
0x188a   : > { %v7315_v45 = vpop.eup %7314 }
0x188b   : > { %v4448_v49 = vmul.f32 %v7315_v45, %v7311_v48 }
0x188d   : > { %v4449_v10 = vpack.c.bf16 %v4448_v49, %v4447_v5 }
0x188f   : > { %6486 = vmatmul.mubr.msk.bf16.vlgmr.msra.gmra.mxu1 %vm1790_vm2, %v4449_v10 }
0x1890   : > { %6510 = vmatpush3.bf16.xpose.msra.mxu1 %v4603_v30  ;;  %6511 = vmatprep.mubr.msk.bf16.mxu1 %vm7907_vm0, %v7906_v52 }
0x1891   : > { %6515 = vmatprep.subr.bf16.mxu1 %v7906_v52 }
0x1897   : > { %6512 = vmatmul.mubr.bf16.vlgmr.msra.gmra.mxu1 %v4602_v13 }
0x1898   : > { %6516 = vmatpush3.bf16.msra.mxu1 %v4604_v16  ;;  %6517 = vmatprep.mubr.msk.bf16.mxu1 %vm7907_vm0, %v7906_v52 }
0x1899   : > { %6521 = vmatprep.subr.bf16.mxu1 %v7906_v52 }
0x194f   : > { %v4487_v30 = vpop.f32.mrf.mxu1 }
0x1951   : > { %v6487_v12 = vpop.f32.mrf.mxu1 }
0x1953   : > { %v4490_v15 = vpop.f32.mrf.mxu1 }
0x1954   : > { %v4494_v8 = vpack.c.bf16 %v4490_v15, %v4487_v30 }
0x1955   : > { %v6488_v11 = vpop.f32.mrf.mxu1 }
0x1956   : > { %6506 = vmatmul.mubr.bf16.vlgmr.msra.gmra.mxu0 %v4494_v8  ;;  %v7196_v8 = vld [vmem:[#allocation14 + $0xf0] ss:$8 sps:$4 sm:$0xff]   ;;  %v7198_v11 = vld [vmem:[#allocation14 + $0xf4] ss:$8 sps:$4 sm:$0xff]  }
0x1957   : > { %v4639_v13 = vpop.f32.mrf.mxu1  ;;  %5018 = vmatprep.mubr.bf16.mxu0 %v7905_v0  ;;  %4986 = vmatprep.subr.bf16.mxu0 %v7198_v11 }
0x1958   : > { %v4640_v38 = vadd.f32 %v4639_v13, %v8374_v24  ;;  %4987 = vmatpush1.bf16.msra.mxu0 %v7196_v8 }
0x1959   : > { %v6513_v6 = vpop.f32.mrf.mxu1 }
0x195a   : > { %v4646_v16 = vsel %vm1790_vm2, %v4640_v38, -inf }
0x195b   : > { %4647 = vmax.xlane.f32.xlu0 %v4646_v16  ;;  %v4642_v18 = vpop.f32.mrf.mxu1 }
0x195c   : > { %v4643_v17 = vadd.f32 %v4642_v18, %v8374_v24  ;;  %v4377_v24 = vadd.f32 %v8740_v2, %v8744_v26  ;;  %v7189_v2 = vld [vmem:[#allocation8 + $0x1f0] sm:$0xff]   ;;  %v7191_v26 = vld [vmem:[#allocation8 + $0x1e0] sm:$0xff]  }
0x195d   : > { %v6514_v42 = vpop.f32.mrf.mxu1 }
0x195e   : > { %v4649_v55 = vsel %vm1790_vm2, %v4643_v17, -inf  ;;  %v7201_v42 = vld [vmem:[#allocation14 + $0xe4] ss:$8 sps:$4 sm:$0xff]  }
0x195f   : > { %4650 = vmax.xlane.f32.xlu1 %v4649_v55  ;;  %v7199_v55 = vld [vmem:[#allocation14 + $0xe0] ss:$8 sps:$4 sm:$0xff]   ;;  %4988 = vmatprep.subr.bf16.mxu0 %v7201_v42 }
0x1960   : > { %4989 = vmatpush1.bf16.msra.mxu0 %v7199_v55 }
0x19e4   : > { %v4648_v63 = vpop.xlane.xlu0 %4647 }
0x19e5   : > { %v4652_v20 = vsub.f32 %v4640_v38, %v4648_v63  ;;  %v7204_v63 = vld [vmem:[#allocation14 + $0xd4] ss:$8 sps:$4 sm:$0xff]  }
0x19e6   : > { %4990 = vmatprep.subr.bf16.mxu0 %v7204_v63 }
0x19e7   : > { %v4654_v22 = vmul.f32 1.442695, %v4652_v20  ;;  %v7202_v20 = vld [vmem:[#allocation14 + $0xd0] ss:$8 sps:$4 sm:$0xff]  }
0x19e8   : > { %v4651_v19 = vpop.xlane.xlu1 %4650  ;;  %4991 = vmatpush1.bf16.msra.mxu0 %v7202_v20 }
0x19e9   : > { %7316 = vpow2.f32 %v4654_v22  ;;  %v4653_v23 = vsub.f32 %v4643_v17, %v4651_v19  ;;  %v7205_v22 = vld [vmem:[#allocation14 + $0xc0] ss:$8 sps:$4 sm:$0xff]   ;;  %v7207_v19 = vld [vmem:[#allocation14 + $0xc4] ss:$8 sps:$4 sm:$0xff]  }
0x19ea   : > { %4992 = vmatprep.subr.bf16.mxu0 %v7207_v19 }
0x19eb   : > { %v4656_v0 = vmul.f32 1.442695, %v4653_v23  ;;  %v7210_v23 = vld [vmem:[#allocation14 + $0xb4] ss:$8 sps:$4 sm:$0xff]  }
0x19ec   : > { %4993 = vmatpush1.bf16.msra.mxu0 %v7205_v22 }
0x19ed   : > { %7318 = vpow2.f32 %v4656_v0  ;;  %v7208_v0 = vld [vmem:[#allocation14 + $0xb0] ss:$8 sps:$4 sm:$0xff]   ;;  %4994 = vmatprep.subr.bf16.mxu0 %v7210_v23 }
0x19f0   : > { %4995 = vmatpush1.bf16.msra.mxu0 %v7208_v0 }
0x19f6   : > { %v7317_v37 = vpop.eup %7316 }
0x19f7   : > { %v4658_v59 = vsel %vm1790_vm2, %v7317_v37, 0.0 }
0x19f8   : > { %4659 = vadd.xlane.f32.xlu0 %v4658_v59  ;;  %v7211_v59 = vld [vmem:[#allocation14 + $0xa0] ss:$8 sps:$4 sm:$0xff]  }
0x19fa   : > { %v7319_v62 = vpop.eup %7318 }
0x19fb   : > { %v4661_v47 = vsel %vm1790_vm2, %v7319_v62, 0.0 }
0x19fc   : > { %4662 = vadd.xlane.f32.xlu1 %v4661_v47  ;;  %v7214_v47 = vld [vmem:[#allocation14 + $0x90] ss:$8 sps:$4 sm:$0xff]  }
0x1a16   : > { %v4593_v14 = vpop.f32.mrf.mxu0 }
0x1a17   : > { %v4600_v46 = vadd.f32 %v4593_v14, %v4377_v24  ;;  %v7219_v24 = vld [vmem:[#allocation14 + $0x84] ss:$8 sps:$4 sm:$0xff]   ;;  %v7217_v14 = vld [vmem:[#allocation14 + $0x80] ss:$8 sps:$4 sm:$0xff]  }
0x1a18   : > { %v6507_v9 = vpop.f32.mrf.mxu0 }
0x1a19   : > { %v7221_v9 = vld [vmem:[#allocation17 + $0xb8] sm:$0xff]  }
0x1a1a   : > { %v4596_v25 = vpop.f32.mrf.mxu0 }
0x1a1b   : > { %v4601_v35 = vadd.f32 %v4596_v25, %v4380_v50  ;;  %v7222_v50 = vld [vmem:[#allocation17 + $0xf0] sm:$0xff]  }
0x1a1c   : > { %v6508_v27 = vpop.f32.mrf.mxu0  ;;  %v7223_v25 = vld [vmem:[#allocation17 + $0xb0] sm:$0xff]  }
0x1a1d   : > { %v7225_v27 = vld [vmem:[#allocation17 + $0xa8] sm:$0xff]  }
0x1a81   : > { %v4660_v41 = vpop.xlane.xlu0 %4659 }
0x1a82   : > { %7320 = vrcp.f32 %v4660_v41  ;;  %v7226_v41 = vld [vmem:[#allocation17 + $0xe0] sm:$0xff]  }
0x1a85   : > { %v4663_v53 = vpop.xlane.xlu1 %4662 }
0x1a86   : > { %7322 = vrcp.f32 %v4663_v53  ;;  %v7227_v53 = vld [vmem:[#allocation17 + $0xa0] sm:$0xff]  }
0x1a8f   : > { %v7321_v36 = vpop.eup %7320 }
0x1a90   : > { %v4666_v29 = vmul.f32 %v7321_v36, %v7317_v37  ;;  %v7213_v37 = vld [vmem:[#allocation14 + $0xa4] ss:$8 sps:$4 sm:$0xff]   ;;  %v7228_v36 = vld [vmem:[#allocation17 + $0xd8] sm:$0xff]  }
0x1a91   : > { %4996 = vmatprep.subr.bf16.mxu0 %v7213_v37 }
0x1a92   : > { %4997 = vmatpush1.bf16.msra.mxu0 %v7211_v59 }
0x1a93   : > { %v7323_v54 = vpop.eup %7322 }
0x1a94   : > { %v4667_v39 = vmul.f32 %v7323_v54, %v7319_v62  ;;  %v7216_v62 = vld [vmem:[#allocation14 + $0x94] ss:$8 sps:$4 sm:$0xff]  }
0x1a95   : > { %4998 = vmatprep.subr.bf16.mxu0 %v7216_v62  ;;  %v7229_v54 = vld [vmem:[#allocation17 + $0x98] sm:$0xff]  }
0x1a96   : > { %v4668_v48 = vpack.c.bf16 %v4667_v39, %v4666_v29  ;;  %4999 = vmatpush1.bf16.msra.mxu0 %v7214_v47 }
0x1a97   : > { %5000 = vmatprep.subr.bf16.mxu0 %v7219_v24 }
0x1a98   : > { %6518 = vmatmul.mubr.msk.bf16.vlgmr.msra.gmra.mxu1 %vm1790_vm2, %v4668_v48 }
0x1a99   : > { %6522 = vmatpush3.bf16.msra.mxu1 %v7188_v44  ;;  %6537 = vmatprep.mubr.msk.bf16.mxu1 %vm7907_vm0, %v7906_v52 }
0x1a9a   : > { %6523 = vmatprep.subr.bf16.mxu1 %v7906_v52  ;;  %5001 = vmatpush1.bf16.msra.mxu0 %v7217_v14 }
0x1a9b   : > { %6541 = vmatprep.subr.bf16.mxu0 %v7906_v52 }
0x1a9d   : > { %6524 = vmatpush3.bf16.msra.mxu1 %v7189_v2 }
0x1a9e   : > { %6525 = vmatprep.subr.bf16.mxu1 %v7906_v52 }
0x1aa1   : > { %6526 = vmatpush3.bf16.msra.mxu1 %v7190_v51 }
0x1aa2   : > { %6527 = vmatprep.subr.bf16.mxu1 %v7906_v52 }
0x1aa5   : > { %6528 = vmatpush3.bf16.msra.mxu1 %v7191_v26 }
0x1aa6   : > { %6529 = vmatprep.subr.bf16.mxu1 %v7906_v52 }
0x1aa9   : > { %6530 = vmatpush3.bf16.msra.mxu1 %v7192_v31 }
0x1aaa   : > { %6531 = vmatprep.subr.bf16.mxu1 %v7906_v52 }
0x1aad   : > { %6532 = vmatpush3.bf16.msra.mxu1 %v7193_v56  ;;  %v6062_v56 = vld [vmem:[#allocation11 + $0x1] ss:$0 sm:$0xff] }
0x1aae   : > { %6533 = vmatprep.subr.bf16.mxu1 %v7906_v52 }
0x1ab1   : > { %6534 = vmatpush3.bf16.msra.mxu1 %v7194_v57 }
0x1ab2   : > { %6535 = vmatprep.subr.bf16.mxu1 %v7906_v52 }
0x1ab5   : > { %6536 = vmatpush3.bf16.msra.mxu1 %v7195_v28 }
0x1b58   : > { %v4706_v32 = vpop.f32.mrf.mxu1 }
0x1b5a   : > { %v6519_v21 = vpop.f32.mrf.mxu1 }
0x1b5b   : > { %v6063_v21 = vld [vmem:[#allocation13 + $0x1] ss:$0 sm:$0xff] }
0x1b5c   : > { %v4709_v1 = vpop.f32.mrf.mxu1 }
0x1b5d   : > { %v4713_v3 = vpack.c.bf16 %v4709_v1, %v4706_v32 }
0x1b5e   : > { %v6520_v33 = vpop.f32.mrf.mxu1 }
0x1b5f   : > { %6538 = vmatmul.mubr.bf16.vlgmr.msra.gmra.mxu1 %v4713_v3 }
0x1c1f   : > { %v4812_v61 = vpop.f32.mrf.mxu1 }
0x1c20   : > { %v4819_v45 = vadd.f32 %v4812_v61, %v4600_v46  ;;  %v7220_v46 = vld [vmem:[#allocation17 + $0xf8] sm:$0xff]  }
0x1c21   : > { %v6539_v5 = vpop.f32.mrf.mxu1  ;;  %6245 = vmatprep.subr.bf16.mxu1 %v7220_v46 }
0x1c22   : > { %v4829_v49 = vadd.f32 %v6061_v4, %v4819_v45  ;;  %6246 = vmatpush3.bf16.msra.mxu1 %v7221_v9  ;;  %v7231_v45 = vld [vmem:[#allocation17 + $0x90] sm:$0xff]   ;;  %v7232_v5 = vld [vmem:[#allocation17 + $0xc8] sm:$0xff]  }
0x1c23   : > { %v4815_v10 = vpop.f32.mrf.mxu1  ;;  %6247 = vmatprep.subr.bf16.mxu1 %v7222_v50 }
0x1c24   : > { %v4820_v40 = vadd.f32 %v4815_v10, %v4601_v35  ;;  %v4831_v60 = vadd.f32 %v4829_v49, %v8575_v43  ;;  %v7224_v35 = vld [vmem:[#allocation17 + $0xe8] sm:$0xff]   ;;  %v7234_v10 = vld [vmem:[#allocation17 + $0xc0] sm:$0xff]  }
0x1c25   : > { %v6540_v30 = vpop.f32.mrf.mxu1  ;;  %v7233_v49 = vld [vmem:[#allocation17 + $0x88] sm:$0xff]  }
0x1c26   : > { %v4830_v12 = vadd.f32 %v6061_v4, %v4820_v40  ;;  %4833 = vadd.xlane.f32.xlu0 %v4831_v60  ;;  %6248 = vmatpush3.bf16.msra.mxu1 %v7223_v25  ;;  %v7230_v4 = vld [vmem:[#allocation17 + $0xd0] sm:$0xff]   ;;  %v7235_v40 = vld [vmem:[#allocation17 + $0x80] sm:$0xff]  }
0x1c27   : > { %6249 = vmatprep.subr.bf16.mxu1 %v7224_v35 }
0x1c28   : > { %v4832_v15 = vadd.f32 %v4830_v12, %v8577_v7 }
0x1c2a   : > { %4835 = vadd.xlane.f32.xlu1 %v4832_v15  ;;  %6250 = vmatpush3.bf16.msra.mxu1 %v7225_v27 }
0x1c2b   : > { %6251 = vmatprep.subr.bf16.mxu1 %v7226_v41  ;;  %v7236_v41 = vld [vmem:[#allocation23 + $0x38] sm:$0xff]  }
0x1c2e   : > { %6252 = vmatpush3.bf16.msra.mxu1 %v7227_v53  ;;  %v7237_v53 = vld [vmem:[#allocation23 + $0x30] sm:$0xff]  }
0x1c2f   : > { %6253 = vmatprep.subr.bf16.mxu1 %v7228_v36  ;;  %v7238_v36 = vld [vmem:[#allocation23 + $0x28] sm:$0xff]  }
0x1c32   : > { %6254 = vmatpush3.bf16.msra.mxu1 %v7229_v54  ;;  %v7239_v54 = vld [vmem:[#allocation23 + $0x20] sm:$0xff]  }
0x1c33   : > { %6255 = vmatprep.subr.bf16.mxu1 %v7230_v4 }
0x1c36   : > { %6256 = vmatpush3.bf16.msra.mxu1 %v7231_v45  ;;  %v6097_v45 = vld [vmem:[#allocation20 + $0x1] ss:$0 sm:$0xff] }
0x1c37   : > { %6257 = vmatprep.subr.bf16.mxu1 %v7232_v5 }
0x1c3a   : > { %6258 = vmatpush3.bf16.msra.mxu1 %v7233_v49 }
0x1c3b   : > { %6259 = vmatprep.subr.bf16.mxu1 %v7234_v10 }
0x1c3e   : > { %6260 = vmatpush3.bf16.msra.mxu1 %v7235_v40  ;;  %v6098_v40 = vld [vmem:[#allocation22 + $0x1] ss:$0 sm:$0xff] }
0x1c3f   : > { %6561 = vmatprep.subr.bf16.mxu1 %v7906_v52 }
0x1caf   : > { %v4834_v13 = vpop.xlane.xlu0 %4833 }
0x1cb0   : > { %v4837_v38 = vmul.f32 0.0078125, %v4834_v13 }
0x1cb2   : > { %v8800_v6 = vsub.f32 %v4831_v60, %v4837_v38  ;;  %v4894_v60 = vld [vmem:[#allocation16 + $0x2] sm:$0x3] }
0x1cb3   : > { %v4836_v16 = vpop.xlane.xlu1 %4835  ;;  %v4903_v12 = vrot.slane %v4894_v60, %v8325_v34 }
0x1cb4   : > { %v4838_v18 = vmul.f32 0.0078125, %v4836_v16  ;;  %v4841_v17 = vmul.f32 %v8800_v6, %v8800_v6 }
0x1cb6   : > { %v8804_v43 = vsub.f32 %v4832_v15, %v4838_v18  ;;  %4843 = vadd.xlane.f32.xlu0 %v4841_v17  ;;  %v4899_v15 = vrot.slane %v4894_v60, %v8350_v58  ;;  %v6080_v58 = vld [vmem:[#allocation19 + $0x1] ss:$0 sm:$0xff] }
0x1cb8   : > { %v4842_v7 = vmul.f32 %v8804_v43, %v8804_v43 }
0x1cba   : > { %4845 = vadd.xlane.f32.xlu1 %v4842_v7 }
0x1d3f   : > { %v4844_v29 = vpop.xlane.xlu0 %4843 }
0x1d40   : > { %v4847_v39 = vmul.f32 0.0078125, %v4844_v29  ;;  %v7240_v29 = vld [vmem:[#allocation23 + $0x18] sm:$0xff]  }
0x1d42   : > { %v4849_v44 = vadd.f32 1e-05, %v4847_v39  ;;  %v7241_v39 = vld [vmem:[#allocation23 + $0x10] sm:$0xff]  }
0x1d43   : > { %v4846_v48 = vpop.xlane.xlu1 %4845 }
0x1d44   : > { %7324 = vrsqrt.f32 %v4849_v44  ;;  %v4848_v2 = vmul.f32 0.0078125, %v4846_v48  ;;  %v7242_v44 = vld [vmem:[#allocation23 + $0x8] sm:$0xff]   ;;  %v7243_v48 = vld [vmem:[#allocation23] sm:$0xff]  }
0x1d46   : > { %v4850_v51 = vadd.f32 1e-05, %v4848_v2  ;;  %v7244_v2 = vld [vmem:[#allocation26 + $0x38] sm:$0xff]  }
0x1d48   : > { %7326 = vrsqrt.f32 %v4850_v51  ;;  %v7245_v51 = vld [vmem:[#allocation26 + $0x30] sm:$0xff]  }
0x1d51   : > { %v7325_v26 = vpop.eup %7324 }
0x1d52   : > { %v4853_v31 = vmul.f32 %v7325_v26, %v8800_v6  ;;  %v7246_v26 = vld [vmem:[#allocation26 + $0x28] sm:$0xff]  }
0x1d54   : > { %v4863_v32 = vmul.f32 %v6062_v56, %v4853_v31  ;;  %v7247_v31 = vld [vmem:[#allocation26 + $0x20] sm:$0xff]  }
0x1d55   : > { %v7327_v57 = vpop.eup %7326 }
0x1d56   : > { %v4854_v28 = vmul.f32 %v7327_v57, %v8804_v43  ;;  %v4873_v3 = vadd.f32 %v6063_v21, %v4863_v32  ;;  %v7249_v57 = vld [vmem:[#allocation26 + $0x10] sm:$0xff]  }
0x1d58   : > { %v4864_v1 = vmul.f32 %v6062_v56, %v4854_v28  ;;  %v7248_v56 = vld [vmem:[#allocation26 + $0x18] sm:$0xff]  }
0x1d5a   : > { %v4874_v33 = vadd.f32 %v6063_v21, %v4864_v1 }
0x1d5c   : > { %v4875_v61 = vpack.c.bf16 %v4874_v33, %v4873_v3 }
0x1d5e   : > { %5019 = vmatmul.mubr.bf16.vlgmr.msra.gmra.mxu0 %v4875_v61 }
0x1d5f   : > { %6557 = vmatprep.mubr.msk.bf16.mxu0 %vm7907_vm0, %v7906_v52  ;;  %6542 = vmatpush3.bf16.msra.mxu0 %v7236_v41 }
0x1d60   : > { %6543 = vmatprep.subr.bf16.mxu0 %v7906_v52 }
0x1d63   : > { %6544 = vmatpush3.bf16.msra.mxu0 %v7237_v53 }
0x1d64   : > { %6545 = vmatprep.subr.bf16.mxu0 %v7906_v52 }
0x1d67   : > { %6546 = vmatpush3.bf16.msra.mxu0 %v7238_v36 }
0x1d68   : > { %6547 = vmatprep.subr.bf16.mxu0 %v7906_v52 }
0x1d6b   : > { %6548 = vmatpush3.bf16.msra.mxu0 %v7239_v54 }
0x1d6c   : > { %6549 = vmatprep.subr.bf16.mxu0 %v7906_v52 }
0x1d6f   : > { %6550 = vmatpush3.bf16.msra.mxu0 %v7240_v29 }
0x1d70   : > { %6551 = vmatprep.subr.bf16.mxu0 %v7906_v52 }
0x1d73   : > { %6552 = vmatpush3.bf16.msra.mxu0 %v7241_v39 }
0x1d74   : > { %6553 = vmatprep.subr.bf16.mxu0 %v7906_v52 }
0x1d77   : > { %6554 = vmatpush3.bf16.msra.mxu0 %v7242_v44 }
0x1d78   : > { %6555 = vmatprep.subr.bf16.mxu0 %v7906_v52 }
0x1d7b   : > { %6556 = vmatpush3.bf16.msra.mxu0 %v7243_v48 }
0x1e1e   : > { %v5020_v30 = vpop.f32.mrf.mxu0 }
0x1e1f   : > { %v5021_v6 = vadd.f32 %v5020_v30, %v4899_v15 }
0x1e20   : > { %v5022_v8 = vpop.f32.mrf.mxu0 }
0x1e21   : > { %v5023_v13 = vadd.f32 %v5022_v8, %v4903_v12  ;;  %v5029_v42 = vmax.f32 %v5021_v6, 0.0 }
0x1e22   : > { %v5024_v11 = vpop.f32.mrf.mxu0 }
0x1e23   : > { %v5025_v38 = vadd.f32 %v5024_v11, %v4899_v15  ;;  %v5030_v43 = vmax.f32 %v5023_v13, 0.0 }
0x1e24   : > { %v5026_v16 = vpop.f32.mrf.mxu0 }
0x1e25   : > { %v5027_v18 = vadd.f32 %v5026_v16, %v4903_v12  ;;  %v5031_v17 = vmax.f32 %v5025_v38, 0.0 }
0x1e27   : > { %v5032_v7 = vmax.f32 %v5027_v18, 0.0  ;;  %v5033_v63 = vpack.c.bf16 %v5031_v17, %v5029_v42  ;;  %v5283_v42 = vld [vmem:[#allocation25] sm:$0x1] }
0x1e29   : > { %v5034_v55 = vpack.c.bf16 %v5032_v7, %v5030_v43  ;;  %v7250_v43 = vld [vmem:[#allocation26 + $0x8] sm:$0xff]   ;;  %v7251_v7 = vld [vmem:[#allocation26] sm:$0xff]  }
0x1e2b   : > { %5204 = vmatprep.mubr.bf16.mxu1 %v5034_v55 }
0x1e2c   : > { %5205 = vmatmul.mubr.bf16.vlgmr.msra.gmra.mxu1 %v5033_v63 }
0x1e2d   : > { %6577 = vmatprep.mubr.msk.bf16.mxu1 %vm7907_vm0, %v7906_v52  ;;  %6562 = vmatpush3.bf16.msra.mxu1 %v7244_v2 }
0x1e2e   : > { %6563 = vmatprep.subr.bf16.mxu1 %v7906_v52 }
0x1e31   : > { %6564 = vmatpush3.bf16.msra.mxu1 %v7245_v51 }
0x1e32   : > { %6565 = vmatprep.subr.bf16.mxu1 %v7906_v52 }
0x1e35   : > { %6566 = vmatpush3.bf16.msra.mxu1 %v7246_v26 }
0x1e36   : > { %6567 = vmatprep.subr.bf16.mxu1 %v7906_v52 }
0x1e39   : > { %6568 = vmatpush3.bf16.msra.mxu1 %v7247_v31 }
0x1e3a   : > { %6569 = vmatprep.subr.bf16.mxu1 %v7906_v52 }
0x1e3d   : > { %6570 = vmatpush3.bf16.msra.mxu1 %v7248_v56 }
0x1e3e   : > { %6571 = vmatprep.subr.bf16.mxu1 %v7906_v52 }
0x1e41   : > { %6572 = vmatpush3.bf16.msra.mxu1 %v7249_v57 }
0x1e42   : > { %6573 = vmatprep.subr.bf16.mxu1 %v7906_v52 }
0x1e45   : > { %6574 = vmatpush3.bf16.msra.mxu1 %v7250_v43 }
0x1e46   : > { %6575 = vmatprep.subr.bf16.mxu1 %v7906_v52 }
0x1e49   : > { %6576 = vmatpush3.bf16.msra.mxu1 %v7251_v7 }
0x1eec   : > { %v6261_v34 = vpop.f32.mrf.mxu1 }
0x1eee   : > { %v6262_v20 = vpop.f32.mrf.mxu1 }
0x1eef   : > { %v6263_v22 = vadd.f32 %v6262_v20, %v6261_v34 }
0x1ef0   : > { %v6264_v19 = vpop.f32.mrf.mxu1 }
0x1ef1   : > { %v5207_v23 = vadd.f32 %v6263_v22, %v6080_v58 }
0x1ef2   : > { %v6265_v0 = vpop.f32.mrf.mxu1 }
0x1ef3   : > { %v6266_v37 = vadd.f32 %v6265_v0, %v6264_v19  ;;  %v5213_v59 = vadd.f32 %v5207_v23, %v4873_v3  ;;  %v5390_v23 = vld [vmem:[#allocation28] sm:$0x1] }
0x1ef5   : > { %v5210_v62 = vadd.f32 %v6266_v37, %v6080_v58  ;;  %5215 = vadd.xlane.f32.xlu0 %v5213_v59 }
0x1ef7   : > { %v5214_v47 = vadd.f32 %v5210_v62, %v4874_v33 }
0x1ef9   : > { %5217 = vadd.xlane.f32.xlu1 %v5214_v47 }
0x1f7e   : > { %v5216_v24 = vpop.xlane.xlu0 %5215 }
0x1f7f   : > { %v5219_v14 = vmul.f32 0.0078125, %v5216_v24 }
0x1f81   : > { %v5221_v46 = vsub.f32 %v5213_v59, %v5219_v14 }
0x1f82   : > { %v5218_v9 = vpop.xlane.xlu1 %5217 }
0x1f83   : > { %v5220_v50 = vmul.f32 0.0078125, %v5218_v9  ;;  %v5223_v25 = vmul.f32 %v5221_v46, %v5221_v46 }
0x1f85   : > { %v5222_v35 = vsub.f32 %v5214_v47, %v5220_v50  ;;  %5225 = vadd.xlane.f32.xlu0 %v5223_v25 }
0x1f87   : > { %v5224_v27 = vmul.f32 %v5222_v35, %v5222_v35 }
0x1f89   : > { %5227 = vadd.xlane.f32.xlu1 %v5224_v27 }
0x200e   : > { %v5226_v28 = vpop.xlane.xlu0 %5225 }
0x200f   : > { %v5229_v32 = vmul.f32 0.0078125, %v5226_v28 }
0x2011   : > { %v5231_v21 = vadd.f32 1e-05, %v5229_v32 }
0x2012   : > { %v5228_v1 = vpop.xlane.xlu1 %5227 }
0x2013   : > { %7328 = vrsqrt.f32 %v5231_v21  ;;  %v5230_v3 = vmul.f32 0.0078125, %v5228_v1 }
0x2015   : > { %v5232_v33 = vadd.f32 1e-05, %v5230_v3 }
0x2017   : > { %7330 = vrsqrt.f32 %v5232_v33 }
0x2020   : > { %v7329_v61 = vpop.eup %7328 }
0x2021   : > { %v5235_v4 = vmul.f32 %v7329_v61, %v5221_v46 }
0x2023   : > { %v5245_v49 = vmul.f32 %v6097_v45, %v5235_v4 }
0x2024   : > { %v7331_v5 = vpop.eup %7330 }
0x2025   : > { %v5236_v10 = vmul.f32 %v7331_v5, %v5222_v35  ;;  %v5255_v30 = vadd.f32 %v6098_v40, %v5245_v49 }
0x2027   : > { %v5246_v60 = vmul.f32 %v6097_v45, %v5236_v10 }
0x2029   : > { %v5256_v12 = vadd.f32 %v6098_v40, %v5246_v60 }
0x202b   : > { %v5257_v15 = vadd.f32 %v5256_v12, %v5255_v30 }
0x202d   : > { %v5258_v8 = vrot.slane %v5257_v15, 4 }
0x202f   : > { %v5259_v11 = vadd.f32 %v5258_v8, %v5257_v15 }
0x2031   : > { %v5260_v13 = vrot.slane %v5259_v11, 2 }
0x2033   : > { %v5261_v38 = vadd.f32 %v5260_v13, %v5259_v11 }
0x2035   : > { %v5262_v6 = vrot.slane %v5261_v38, 1 }
0x2037   : > { %v5263_v16 = vadd.f32 %v5262_v6, %v5261_v38 }
0x2039   : > { %v5265_v18 = vmul.f32 0.0625, %v5263_v16 }
0x203b   : > { %v5266_v17 = vpack.c.bf16 %v5265_v18, %v5265_v18 }
0x203d   : > { %6558 = vmatmul.mubr.bf16.vlgmr.msra.gmra.mxu0 %v5266_v17 }
0x20fd   : > { %v5366_v55 = vpop.f32.mrf.mxu0 }
0x20fe   : > { %v5367_v63 = vadd.f32 %v5366_v55, %v5283_v42 }
0x20ff   : > { %v6559_v34 = vpop.f32.mrf.mxu0 }
0x2100   : > { %v5372_v58 = vmax.f32 %v5367_v63, 0.0 }
0x2101   : > { %v5369_v20 = vpop.f32.mrf.mxu0 }
0x2102   : > { %v5373_v22 = vpack.c.bf16 %v5372_v58, %v5372_v58 }
0x2103   : > { %v6560_v19 = vpop.f32.mrf.mxu0 }
0x2104   : > { %6578 = vmatmul.mubr.bf16.vlgmr.msra.gmra.mxu1 %v5373_v22 }
0x21c4   : > { %v5473_v0 = vpop.f32.mrf.mxu1 }
0x21c5   : > { %v5474_v37 = vadd.f32 %v5473_v0, %v5390_v23 }
0x21c6   : > { %v6579_v52 = vpop.f32.mrf.mxu1 }
0x21c7   : > { %5479 = vst [vmem:[%s829_s27] sm:$0x1] %v5474_v37 }
0x21c8   : > { %v5476_v59 = vpop.f32.mrf.mxu1 }
0x21c9   : > { %7791 = shalt.err (!%p7788_p8)
}
0x21ca   : > { %s7792_s26 = scalar_lea.hbm %s8837_s1, 16  ;;  %s7796_s23 = scalar_lea.hbm %s8975_s24, 32 }
0x21cb   : > { %p7793_p7 = scmp.ne.s32.totalorder %s8837_s1, %s7792_s26  ;;  %p7797_p6 = scmp.lt.s32.totalorder %s8837_s1, %s8975_s24 }
0x21cc   : > { %p7798_p0 = scmp.lt.s32.totalorder %s7796_s23, %s7792_s26 }
0x21cd   : > { %p7794_p9 = pnand %p7793_p7, %p8976_p11 }
0x21ce   : > { %p7799_p2 = por %p7798_p0, %p7797_p6 }
0x21cf   : > { %p7795_p3 = pneg %p7794_p9 }
0x21d1   : > { %p7800_p5 = pnand %p7799_p2, %p7795_p3 }
0x21d3   : > { %7803 = shalt.err (!%p7800_p5)
}
0x21d4   : > { %6647 = dma.vmem_to_hbm [thread:$0]  (%p8976_p11), %s8839_s4, 16, %s8837_s1, %s5481_s3   ;;  %v6580_v62 = vpop.f32.mrf.mxu1 }
0x21d5 PF: > { %s8977_s5 = sld [smem:[#allocation40_spill]]  ;;  %p8978_p1 = scmp.ne.s32.totalorder %s8952_s18, 0 }
0x21d6   : > { %p8979_p4 = scmp.ge.s32.totalorder %s7874_s30, 2 }
0x21d8   : > { %p6703_p10 = pnand %p8979_p4, %p8978_p1 }
0x21da   : > { %p6704_p12 = pneg %p6703_p10 }
0x21db   : > { %s5505_s9 = sand.u32 1, %s8977_s5  }
0x21dc   : > { %s5506_s8 = scalar_lea.sflag [#allocation4], %s5505_s9 }
0x21dd   : > { %7857 = dma.done.wait (%p6704_p12), %s5506_s8, 16  }
0x21de   : > { %7859 = vsyncadd (%p6704_p12), %s5506_s8, 4294967280  ;;  %p39_p13 = scmp.ge.s32.totalorder %s8194_s2, 4   ;;  %s8980_s27 = smov %s7866_s28 }
0x21df   : > { %s8981_s28 = smov %s7870_s29  ;;  %s8982_s29 = smov %s8205_s0 }
0x21e0   : > { %s8983_s30 = smov %s8194_s2  ;;  %41 = sbr.rel (!%p39_p13) target bundleno = 25 (0x19), region = 216 }
0x21e5   :  { %5510 = vsyncpa [#allocation3], 1 }
0x21e6   :  { %5512 = vsyncpa [#allocation3 + $0x1], 1 }
0x21e7   :  { %5513 = vsyncpa [#allocation6], 1 }
0x21e8   :  { %5514 = vsyncpa [#allocation9], 1 }
0x21e9   :  { %5515 = vsyncpa [#allocation12], 1 }
0x21ea   :  { %5516 = vsyncpa [#allocation15], 1 }
0x21eb   :  { %5517 = vsyncpa [#allocation18], 1 }
0x21ec   :  { %5518 = vsyncpa [#allocation21], 1 }
0x21ed   :  { %5519 = vsyncpa [#allocation24], 1 }
0x21ee   :  { %5520 = vsyncpa [#allocation27], 1 }
0x21ef   :  { %5521 = vsyncpa [#allocation4], 1 }
0x21f0   :  { %5523 = vsyncpa [#allocation4 + $0x1], 1 }

</bundles_post_ra>
